<compile_context>
chip_gen: v7x
topology: tpu7x:2x2x1
jax: 0.10.0
libtpu: 0.0.40
codegen_flags: <defaults>
</compile_context>

<pallas_src>
import functools

import jax
import jax.numpy as jnp
from jax import lax
from jax.experimental import pallas as pl
from jax.experimental.pallas import tpu as pltpu

BN_EPS = 1e-5


# ----------------------------- Pallas kernels ------------------------------

def _b0_main_kernel(x_ref, wp_ref, sh1_ref, al1_ref,
                    wd_ref, sh2_ref, al2_ref, wexp_ref, o_ref):
    """Upsampling bottleneck, main (ext) branch, fully fused.

    projection(64->4) + BN1 + PReLU1
    -> ConvTranspose2d(4->8, k=2, s=2) as one (4 -> 4*8) matmul (tap-major)
       + BN2 + PReLU2 (params tiled per tap)
    -> expansion 1x1 (8->8) per tap via a block-diagonal (32,32) matmul,
       with BN3 scale (main half) folded in.
    Output columns are (sy, sx, cout) -- pixel-shuffled later.
    """
    a = jnp.dot(x_ref[...], wp_ref[...], preferred_element_type=jnp.float32)
    a = a + sh1_ref[...]
    a = jnp.where(a >= 0, a, al1_ref[...] * a)

    d = jnp.dot(a.astype(jnp.bfloat16), wd_ref[...],
                preferred_element_type=jnp.float32)
    d = d + sh2_ref[...]
    d = jnp.where(d >= 0, d, al2_ref[...] * d)

    o = jnp.dot(d.astype(jnp.bfloat16), wexp_ref[...],
                preferred_element_type=jnp.float32)
    o_ref[...] = o.astype(o_ref.dtype)


def _b0_combine_kernel(u_ref, m_ref, w3_ref, sh3_ref, al3_ref, o_ref,
                       *, tile_h, wo):
    """Upsampling bottleneck, skip conv + concat + BN3 + PReLU3.

    3x3 'same' conv on the unpooled 64-channel tensor done as 9 accumulating
    shifted matmuls (reads the zero-padded input once, no im2col buffer).
    The main-branch contribution (already BN3-scaled) is concatenated and the
    final 16-wide activation is written in one store.
    """
    r = pl.program_id(1)
    row0 = pl.multiple_of(r * tile_h, tile_h)

    acc = jnp.zeros((tile_h * wo, 8), jnp.float32)
    for ky in range(3):
        rows = u_ref[0, pl.ds(row0 + ky, tile_h)]          # (tile_h, wo+2, 64)
        for kx in range(3):
            win = rows[:, kx:kx + wo, :].reshape(tile_h * wo, 64)
            acc = acc + jnp.dot(win, w3_ref[ky * 3 + kx],
                                preferred_element_type=jnp.float32)

    main = m_ref[0].reshape(tile_h * wo, 8).astype(jnp.float32)
    y = jnp.concatenate([main, acc], axis=-1) + sh3_ref[...]
    y = jnp.where(y >= 0, y, al3_ref[...] * y)
    o_ref[0] = y.reshape(tile_h, wo, 16).astype(o_ref.dtype)


def _b1_kernel(x_ref, wp_ref, sh1_ref, al1_ref, wc_ref, sh2_ref, al2_ref,
               we_ref, sh3_ref, al3_ref, o_ref, *, tile_h, ho, wo, wpad):
    """Regular bottleneck (16->16), fully fused in one kernel.

    projection(16->8)+BN1+PReLU1 -> 2x2 'same' conv as 4 accumulating shifted
    matmuls (+bias+BN2 folded)+PReLU2 -> expansion(8->16, BN3 scale folded)
    + shift3 + PReLU3.  The conv's zero padding is applied in "a"-space by
    masking the halo row / pad columns to zero.
    """
    r = pl.program_id(1)
    row0 = pl.multiple_of(r * tile_h, tile_h)

    xin = x_ref[0, pl.ds(row0, tile_h + 1)]                # (tile_h+1, wpad, 16)
    p = (tile_h + 1) * wpad
    a = jnp.dot(xin.reshape(p, 16), wp_ref[...],
                preferred_element_type=jnp.float32)
    a = a + sh1_ref[...]
    a = jnp.where(a >= 0, a, al1_ref[...] * a)
    a = a.reshape(tile_h + 1, wpad, 8)

    # zero the conv's 'same' padding region (rows >= Ho, cols >= Wo)
    gr = row0 + lax.broadcasted_iota(jnp.int32, (tile_h + 1, wpad, 8), 0)
    gc = lax.broadcasted_iota(jnp.int32, (tile_h + 1, wpad, 8), 1)
    a = jnp.where((gr < ho) & (gc < wo), a, 0.0).astype(jnp.bfloat16)

    acc = jnp.zeros((tile_h * wo, 8), jnp.float32)
    for ky in range(2):
        for kx in range(2):
            win = a[ky:ky + tile_h, kx:kx + wo, :].reshape(tile_h * wo, 8)
            acc = acc + jnp.dot(win, wc_ref[ky * 2 + kx],
                                preferred_element_type=jnp.float32)
    b = acc + sh2_ref[...]
    b = jnp.where(b >= 0, b, al2_ref[...] * b)

    o = jnp.dot(b.astype(jnp.bfloat16), we_ref[...],
                preferred_element_type=jnp.float32)
    o = o + sh3_ref[...]
    o = jnp.where(o >= 0, o, al3_ref[...] * o)
    o_ref[0] = o.reshape(tile_h, wo, 16)


# ------------------------------ pallas wrappers -----------------------------

def b0_main(x_flat_bf16, fw, tile_p):
    P = x_flat_bf16.shape[0]
    grid = (P // tile_p,)
    return pl.pallas_call(
        _b0_main_kernel,
        out_shape=jax.ShapeDtypeStruct((P, 32), jnp.bfloat16),
        grid=grid,
        in_specs=[pl.BlockSpec((tile_p, 64), lambda i: (i, 0)),
                  pl.BlockSpec((64, 4), lambda i: (0, 0)),
                  pl.BlockSpec((1, 4), lambda i: (0, 0)),
                  pl.BlockSpec((1, 4), lambda i: (0, 0)),
                  pl.BlockSpec((4, 32), lambda i: (0, 0)),
                  pl.BlockSpec((1, 32), lambda i: (0, 0)),
                  pl.BlockSpec((1, 32), lambda i: (0, 0)),
                  pl.BlockSpec((32, 32), lambda i: (0, 0))],
        out_specs=pl.BlockSpec((tile_p, 32), lambda i: (i, 0)),
        compiler_params=pltpu.CompilerParams(dimension_semantics=("parallel",)),
        cost_estimate=pl.CostEstimate(
            flops=2 * P * (64 * 4 + 4 * 32 + 32 * 32),
            transcendentals=0,
            bytes_accessed=P * (64 + 32) * 2),
    )(x_flat_bf16, fw['wp'], fw['sh1'], fw['al1'],
      fw['wd'], fw['sh2'], fw['al2'], fw['wexp'])


def b0_combine(u_pad, out3_shuf, fw, tile_h):
    N, Hop, Wop, _ = u_pad.shape
    Ho, Wo = Hop - 2, Wop - 2
    ntiles = Ho // tile_h
    kern = functools.partial(_b0_combine_kernel, tile_h=tile_h, wo=Wo)
    return pl.pallas_call(
        kern,
        out_shape=jax.ShapeDtypeStruct((N, Ho, Wo, 16), jnp.bfloat16),
        grid=(N, ntiles),
        in_specs=[pl.BlockSpec((1, Hop, Wop, 64), lambda n, r: (n, 0, 0, 0)),
                  pl.BlockSpec((1, tile_h, Wo, 8), lambda n, r: (n, r, 0, 0)),
                  pl.BlockSpec((9, 64, 8), lambda n, r: (0, 0, 0)),
                  pl.BlockSpec((1, 16), lambda n, r: (0, 0)),
                  pl.BlockSpec((1, 16), lambda n, r: (0, 0))],
        out_specs=pl.BlockSpec((1, tile_h, Wo, 16), lambda n, r: (n, r, 0, 0)),
        compiler_params=pltpu.CompilerParams(
            dimension_semantics=("parallel", "parallel")),
        cost_estimate=pl.CostEstimate(
            flops=2 * N * Ho * Wo * 9 * 64 * 8,
            transcendentals=0,
            bytes_accessed=u_pad.size * 2 + N * Ho * Wo * (8 + 16) * 2),
    )(u_pad, out3_shuf, fw['w3'], fw['sh3'], fw['al3'])


def b1_fused(y0p, fw, tile_h, Ho, Wo):
    N, Hp, Wp, _ = y0p.shape
    ntiles = Ho // tile_h
    kern = functools.partial(_b1_kernel, tile_h=tile_h, ho=Ho, wo=Wo, wpad=Wp)
    return pl.pallas_call(
        kern,
        out_shape=jax.ShapeDtypeStruct((N, Ho, Wo, 16), jnp.float32),
        grid=(N, ntiles),
        in_specs=[pl.BlockSpec((1, Hp, Wp, 16), lambda n, r: (n, 0, 0, 0)),
                  pl.BlockSpec((16, 8), lambda n, r: (0, 0)),
                  pl.BlockSpec((1, 8), lambda n, r: (0, 0)),
                  pl.BlockSpec((1, 8), lambda n, r: (0, 0)),
                  pl.BlockSpec((4, 8, 8), lambda n, r: (0, 0, 0)),
                  pl.BlockSpec((1, 8), lambda n, r: (0, 0)),
                  pl.BlockSpec((1, 8), lambda n, r: (0, 0)),
                  pl.BlockSpec((8, 16), lambda n, r: (0, 0)),
                  pl.BlockSpec((1, 16), lambda n, r: (0, 0)),
                  pl.BlockSpec((1, 16), lambda n, r: (0, 0))],
        out_specs=pl.BlockSpec((1, tile_h, Wo, 16), lambda n, r: (n, r, 0, 0)),
        compiler_params=pltpu.CompilerParams(
            dimension_semantics=("parallel", "parallel")),
        cost_estimate=pl.CostEstimate(
            flops=2 * N * Ho * Wo * (16 * 8 + 4 * 8 * 8 + 8 * 16),
            transcendentals=0,
            bytes_accessed=y0p.size * 2 + N * Ho * Wo * 16 * 4),
    )(y0p, fw['wp'], fw['sh1'], fw['al1'], fw['wc'], fw['sh2'], fw['al2'],
      fw['we'], fw['sh3'], fw['al3'])


# -------------------------- BN folding / weight packing ---------------------

def fold_bn(bn, bias=None):
    """BN(conv + bias) = conv*s + shift, s = gamma/sqrt(var+eps)."""
    s = bn['gamma'] / jnp.sqrt(bn['var'] + BN_EPS)
    b = bias if bias is not None else jnp.zeros_like(bn['mean'])
    return s, (b - bn['mean']) * s + bn['beta']


def fold_b0(p):
    s1, sh1 = fold_bn(p['bn1'])
    wp = p['w_proj'][:, :, 0, 0].T * s1[None, :]                       # (64, 4)

    s2, sh2 = fold_bn(p['bn2'])
    wd = jnp.transpose(p['w_deconv'], (0, 2, 3, 1)).reshape(4, 32)     # (ci,(sy,sx,co))
    wd = wd * jnp.tile(s2, 4)[None, :]

    s3, sh3 = fold_bn(p['bn3'])
    we = p['w_exp'][:, :, 0, 0].T * s3[:8][None, :]                    # (8, 8)
    wexp = jnp.kron(jnp.eye(4, dtype=we.dtype), we)                    # block-diag (32,32)
    w3 = jnp.transpose(p['w_pad'], (2, 3, 1, 0)).reshape(9, 64, 8)     # (tap, ci, co)
    w3 = w3 * s3[8:][None, None, :]

    return dict(
        wp=wp.astype(jnp.bfloat16),
        sh1=sh1.reshape(1, 4), al1=p['a1'].reshape(1, 4),
        wd=wd.astype(jnp.bfloat16),
        sh2=jnp.tile(sh2, 4).reshape(1, 32),
        al2=jnp.tile(p['a2'], 4).reshape(1, 32),
        wexp=wexp.astype(jnp.bfloat16),
        w3=w3.astype(jnp.bfloat16),
        sh3=sh3.reshape(1, 16), al3=p['a3'].reshape(1, 16))


def fold_b1(p):
    s1, sh1 = fold_bn(p['bn1'])
    wp = p['w_proj'][:, :, 0, 0].T * s1[None, :]                       # (16, 8)

    s2, sh2 = fold_bn(p['bn2'], bias=p['b_conv'])
    wc = jnp.transpose(p['w_conv'], (2, 3, 1, 0)).reshape(4, 8, 8)     # (tap, ci, co)
    wc = wc * s2[None, None, :]

    s3, sh3 = fold_bn(p['bn3'])
    we = p['w_exp'][:, :, 0, 0].T * s3[None, :]                        # (8, 16)

    return dict(
        wp=wp.astype(jnp.bfloat16),
        sh1=sh1.reshape(1, 8), al1=p['a1'].reshape(1, 8),
        wc=wc.astype(jnp.bfloat16),
        sh2=sh2.reshape(1, 8), al2=p['a2'].reshape(1, 8),
        we=we.astype(jnp.bfloat16),
        sh3=sh3.reshape(1, 16), al3=p['a3'].reshape(1, 16))


# ------------------------------- forward ------------------------------------

def enet_stage5(params, x_nchw, indices, output_size, *, tile_p=64, tile_h=8):
    N, C, H, W = x_nchw.shape
    assert C == 64, "EnetStage5 expects 64 input channels"
    Ho, Wo = output_size
    assert (Ho, Wo) == (2 * H, 2 * W)
    assert Wo % 8 == 0, "fine-grid width must be a multiple of 8"

    fw0 = fold_b0(params['b0'])
    fw1 = fold_b1(params['b1'])

    x_nhwc = jnp.transpose(x_nchw, (0, 2, 3, 1))
    idx_nhwc = jnp.transpose(indices, (0, 2, 3, 1)).astype(jnp.int32)
    x_bf16 = x_nhwc.astype(jnp.bfloat16)

    # ---- bottleneck 0 (UPSAMPLING + DECONVOLUTION), main branch: one kernel
    P1 = N * H * W
    tp = tile_p if P1 % tile_p == 0 else P1
    out3_tap = b0_main(x_bf16.reshape(P1, 64), fw0, tp)        # (P1, 32) bf16

    # pixel-shuffle the main branch to the fine grid (small 8-ch tensor).
    # TODO(synk): pixel shuffle + MaxUnpool compare/select kept in XLA glue;
    # in-kernel strided stores were not used for the interleave.
    out3 = out3_tap.reshape(N, H, W, 2, 2, 8).transpose(0, 1, 3, 2, 4, 5)
    out3 = out3.reshape(N, Ho, Wo, 8)

    # ---- skip branch: MaxUnpool2d(2,2) as vectorized compare/select (no scatter)
    hh = jnp.arange(H)
    ww = jnp.arange(W)
    ss = jnp.arange(2)
    cand = ((2 * hh[:, None, None, None] + ss[None, None, :, None]) * Wo
            + (2 * ww[None, :, None, None] + ss[None, None, None, :]))   # (H,W,2,2)
    m = idx_nhwc[:, :, :, :, None, None] == cand[None, :, :, None, :, :]
    u6 = jnp.where(m, x_bf16[..., None, None], 0)                        # (N,H,W,64,2,2)
    u = u6.transpose(0, 1, 4, 2, 5, 3).reshape(N, Ho, Wo, 64)
    u_pad = jnp.pad(u, ((0, 0), (1, 1), (1, 1), (0, 0)))                 # zero 'same' pad

    # ---- skip 3x3 conv + concat + BN3 + PReLU3: one kernel, tiled over rows
    th = tile_h if Ho % tile_h == 0 else Ho
    y0 = b0_combine(u_pad, out3, fw0, th)                      # (N, Ho, Wo, 16) bf16

    # ---- bottleneck 1 (REGULAR + REGULAR): one fully fused kernel
    y0p = jnp.pad(y0, ((0, 0), (0, 1), (0, 8), (0, 0)))        # halo row + lane-friendly W pad
    out = b1_fused(y0p, fw1, th, Ho, Wo)                       # (N, Ho, Wo, 16) f32

    # second element of the stage-5 output tuple is None (indices consumed)
    return jnp.transpose(out, (0, 3, 1, 2)), None


# -------------------------- parameter construction --------------------------

def init_params(key):
    ks = iter(jax.random.split(key, 64))

    def nrm(shape, scale=0.1):
        return scale * jax.random.normal(next(ks), shape, jnp.float32)

    def bn(c):
        return dict(gamma=1.0 + 0.1 * jax.random.normal(next(ks), (c,), jnp.float32),
                    beta=0.1 * jax.random.normal(next(ks), (c,), jnp.float32),
                    mean=0.1 * jax.random.normal(next(ks), (c,), jnp.float32),
                    var=1.0 + 0.1 * jax.random.uniform(next(ks), (c,), jnp.float32))

    def prelu(c):
        return 0.25 + 0.05 * jax.random.normal(next(ks), (c,), jnp.float32)

    p = {}
    # Bottleneck 0: UPSAMPLING + DECONVOLUTION, 64 -> 16 (torch weight layouts)
    p['b0'] = dict(
        w_proj=nrm((4, 64, 1, 1)),        # Conv2d(64,4,1,bias=False)
        bn1=bn(4), a1=prelu(4),
        w_deconv=nrm((4, 8, 2, 2)),       # ConvTranspose2d(4,8,2,2,bias=False)
        bn2=bn(8), a2=prelu(8),
        w_exp=nrm((8, 8, 1, 1)),          # Conv2d(8,8,1,bias=False)
        w_pad=nrm((8, 64, 3, 3)),         # Conv2d(64,8,3,padding='same',bias=False)
        bn3=bn(16), a3=prelu(16),
    )
    # Bottleneck 1: REGULAR + REGULAR, 16 -> 16
    p['b1'] = dict(
        w_proj=nrm((8, 16, 1, 1)),        # Conv2d(16,8,1,bias=False)
        bn1=bn(8), a1=prelu(8),
        w_conv=nrm((8, 8, 2, 2)),         # Conv2d(8,8,2,padding='same') (has bias)
        b_conv=nrm((8,)),
        bn2=bn(8), a2=prelu(8),
        w_exp=nrm((16, 8, 1, 1)),         # Conv2d(8,16,1,bias=False)
        bn3=bn(16), a3=prelu(16),
    )
    return p


# --------------------------------- main --------------------------------------

if __name__ == "__main__":
    key = jax.random.PRNGKey(0)
    kx, ki1, ki2, kp = jax.random.split(key, 4)

    N, C, H, W = 2, 64, 8, 8                  # in_channels fixed to 64 by the module
    output_size = (2 * H, 2 * W)

    x = jax.random.normal(kx, (N, C, H, W), jnp.float32)
    # synthetic MaxPool2d(2,2) argmax indices: flat indices into the (2H,2W) plane
    di = jax.random.randint(ki1, (N, C, H, W), 0, 2)
    dj = jax.random.randint(ki2, (N, C, H, W), 0, 2)
    ii = jnp.arange(H).reshape(1, 1, H, 1)
    jj = jnp.arange(W).reshape(1, 1, 1, W)
    indices = (2 * ii + di) * (2 * W) + (2 * jj + dj)

    params = init_params(kp)
    fwd = jax.jit(functools.partial(enet_stage5, output_size=output_size))
    out, out_indices = fwd(params, x, indices)
    out = jax.block_until_ready(out)
    assert out.shape == (N, 16, 2 * H, 2 * W), out.shape
    assert out_indices is None
    print("KERNEL_OK")
</pallas_src>

<mosaic_0001>
module attributes {stable_mosaic.version = 11 : i64} {
  func.func @_b0_main_kernel(%arg0: i32, %arg1: memref<64x64xbf16, #tpu.memory_space<vmem>>, %arg2: memref<64x4xbf16, #tpu.memory_space<vmem>>, %arg3: memref<1x4xf32, #tpu.memory_space<vmem>>, %arg4: memref<1x4xf32, #tpu.memory_space<vmem>>, %arg5: memref<4x32xbf16, #tpu.memory_space<vmem>>, %arg6: memref<1x32xf32, #tpu.memory_space<vmem>>, %arg7: memref<1x32xf32, #tpu.memory_space<vmem>>, %arg8: memref<32x32xbf16, #tpu.memory_space<vmem>>, %arg9: memref<64x32xbf16, #tpu.memory_space<vmem>>) attributes {dimension_semantics = [#tpu.dimension_semantics<parallel>], iteration_bounds = array<i64: 2>, scalar_prefetch = 0 : i64, scratch_operands = 0 : i64, tpu.core_type = #tpu.core_type<tc>, window_params = [{transform_indices = @transform_0, window_bounds = array<i64: 64, 64>}, {pipeline_mode = #tpu.pipeline_mode<synchronous>, transform_indices = @transform_1, window_bounds = array<i64: 64, 4>}, {pipeline_mode = #tpu.pipeline_mode<synchronous>, transform_indices = @transform_2, window_bounds = array<i64: 1, 4>}, {pipeline_mode = #tpu.pipeline_mode<synchronous>, transform_indices = @transform_3, window_bounds = array<i64: 1, 4>}, {pipeline_mode = #tpu.pipeline_mode<synchronous>, transform_indices = @transform_4, window_bounds = array<i64: 4, 32>}, {pipeline_mode = #tpu.pipeline_mode<synchronous>, transform_indices = @transform_5, window_bounds = array<i64: 1, 32>}, {pipeline_mode = #tpu.pipeline_mode<synchronous>, transform_indices = @transform_6, window_bounds = array<i64: 1, 32>}, {pipeline_mode = #tpu.pipeline_mode<synchronous>, transform_indices = @transform_7, window_bounds = array<i64: 32, 32>}, {transform_indices = @transform_8, window_bounds = array<i64: 64, 32>}]} {
    %c0 = arith.constant 0 : index
    %c0_0 = arith.constant 0 : index
    %0 = vector.load %arg1[%c0, %c0_0] : memref<64x64xbf16, #tpu.memory_space<vmem>>, vector<64x64xbf16>
    %c0_1 = arith.constant 0 : index
    %c0_2 = arith.constant 0 : index
    %1 = vector.load %arg2[%c0_1, %c0_2] : memref<64x4xbf16, #tpu.memory_space<vmem>>, vector<64x4xbf16>
    %cst = arith.constant dense<0.000000e+00> : vector<64x4xf32>
    %2 = tpu.matmul %0, %1, %cst {dimension_numbers = #tpu.dot_dimension_numbers<[1], [0], [0], [1], [0, 0, 1, 1], [], []>} : vector<64x64xbf16>, vector<64x4xbf16>, vector<64x4xf32> -> vector<64x4xf32>
    %c0_3 = arith.constant 0 : index
    %c0_4 = arith.constant 0 : index
    %3 = vector.load %arg3[%c0_3, %c0_4] : memref<1x4xf32, #tpu.memory_space<vmem>>, vector<1x4xf32>
    %4 = vector.broadcast %3 : vector<1x4xf32> to vector<64x4xf32>
    %5 = arith.addf %2, %4 : vector<64x4xf32>
    %cst_5 = arith.constant 0.000000e+00 : f32
    %6 = vector.broadcast %cst_5 : f32 to vector<64x4xf32>
    %7 = arith.cmpf oge, %5, %6 : vector<64x4xf32>
    %c0_6 = arith.constant 0 : index
    %c0_7 = arith.constant 0 : index
    %8 = vector.load %arg4[%c0_6, %c0_7] : memref<1x4xf32, #tpu.memory_space<vmem>>, vector<1x4xf32>
    %9 = vector.broadcast %8 : vector<1x4xf32> to vector<64x4xf32>
    %10 = arith.mulf %9, %5 : vector<64x4xf32>
    %11 = arith.select %7, %5, %10 : vector<64x4xi1>, vector<64x4xf32>
    %12 = arith.truncf %11 : vector<64x4xf32> to vector<64x4xbf16>
    %c0_8 = arith.constant 0 : index
    %c0_9 = arith.constant 0 : index
    %13 = vector.load %arg5[%c0_8, %c0_9] : memref<4x32xbf16, #tpu.memory_space<vmem>>, vector<4x32xbf16>
    %cst_10 = arith.constant dense<0.000000e+00> : vector<64x32xf32>
    %14 = tpu.matmul %12, %13, %cst_10 {dimension_numbers = #tpu.dot_dimension_numbers<[1], [0], [0], [1], [0, 0, 1, 1], [], []>} : vector<64x4xbf16>, vector<4x32xbf16>, vector<64x32xf32> -> vector<64x32xf32>
    %c0_11 = arith.constant 0 : index
    %c0_12 = arith.constant 0 : index
    %15 = vector.load %arg6[%c0_11, %c0_12] : memref<1x32xf32, #tpu.memory_space<vmem>>, vector<1x32xf32>
    %16 = vector.broadcast %15 : vector<1x32xf32> to vector<64x32xf32>
    %17 = arith.addf %14, %16 : vector<64x32xf32>
    %cst_13 = arith.constant 0.000000e+00 : f32
    %18 = vector.broadcast %cst_13 : f32 to vector<64x32xf32>
    %19 = arith.cmpf oge, %17, %18 : vector<64x32xf32>
    %c0_14 = arith.constant 0 : index
    %c0_15 = arith.constant 0 : index
    %20 = vector.load %arg7[%c0_14, %c0_15] : memref<1x32xf32, #tpu.memory_space<vmem>>, vector<1x32xf32>
    %21 = vector.broadcast %20 : vector<1x32xf32> to vector<64x32xf32>
    %22 = arith.mulf %21, %17 : vector<64x32xf32>
    %23 = arith.select %19, %17, %22 : vector<64x32xi1>, vector<64x32xf32>
    %24 = arith.truncf %23 : vector<64x32xf32> to vector<64x32xbf16>
    %c0_16 = arith.constant 0 : index
    %c0_17 = arith.constant 0 : index
    %25 = vector.load %arg8[%c0_16, %c0_17] : memref<32x32xbf16, #tpu.memory_space<vmem>>, vector<32x32xbf16>
    %cst_18 = arith.constant dense<0.000000e+00> : vector<64x32xf32>
    %26 = tpu.matmul %24, %25, %cst_18 {dimension_numbers = #tpu.dot_dimension_numbers<[1], [0], [0], [1], [0, 0, 1, 1], [], []>} : vector<64x32xbf16>, vector<32x32xbf16>, vector<64x32xf32> -> vector<64x32xf32>
    %27 = arith.truncf %26 : vector<64x32xf32> to vector<64x32xbf16>
    %c0_19 = arith.constant 0 : index
    %c0_20 = arith.constant 0 : index
    %28 = vector.load %arg9[%c0_19, %c0_20] : memref<64x32xbf16, #tpu.memory_space<vmem>>, vector<64x32xbf16>
    tpu.vector_store %arg9[%c0_19, %c0_20], %27 {strides = array<i32>} : memref<64x32xbf16, #tpu.memory_space<vmem>>, vector<64x32xbf16>,
    return
  }
  func.func @transform_0(%arg0: i32) -> (i32, i32) {
    %c0_i32 = arith.constant 0 : i32
    %c0_i32_0 = arith.constant 0 : i32
    return %arg0, %c0_i32 : i32, i32
  }
  func.func @transform_1(%arg0: i32) -> (i32, i32) {
    %c0_i32 = arith.constant 0 : i32
    %c0_i32_0 = arith.constant 0 : i32
    %c0_i32_1 = arith.constant 0 : i32
    return %c0_i32, %c0_i32_0 : i32, i32
  }
  func.func @transform_2(%arg0: i32) -> (i32, i32) {
    %c0_i32 = arith.constant 0 : i32
    %c0_i32_0 = arith.constant 0 : i32
    %c0_i32_1 = arith.constant 0 : i32
    return %c0_i32, %c0_i32_0 : i32, i32
  }
  func.func @transform_3(%arg0: i32) -> (i32, i32) {
    %c0_i32 = arith.constant 0 : i32
    %c0_i32_0 = arith.constant 0 : i32
    %c0_i32_1 = arith.constant 0 : i32
    return %c0_i32, %c0_i32_0 : i32, i32
  }
  func.func @transform_4(%arg0: i32) -> (i32, i32) {
    %c0_i32 = arith.constant 0 : i32
    %c0_i32_0 = arith.constant 0 : i32
    %c0_i32_1 = arith.constant 0 : i32
    return %c0_i32, %c0_i32_0 : i32, i32
  }
  func.func @transform_5(%arg0: i32) -> (i32, i32) {
    %c0_i32 = arith.constant 0 : i32
    %c0_i32_0 = arith.constant 0 : i32
    %c0_i32_1 = arith.constant 0 : i32
    return %c0_i32, %c0_i32_0 : i32, i32
  }
  func.func @transform_6(%arg0: i32) -> (i32, i32) {
    %c0_i32 = arith.constant 0 : i32
    %c0_i32_0 = arith.constant 0 : i32
    %c0_i32_1 = arith.constant 0 : i32
    return %c0_i32, %c0_i32_0 : i32, i32
  }
  func.func @transform_7(%arg0: i32) -> (i32, i32) {
    %c0_i32 = arith.constant 0 : i32
    %c0_i32_0 = arith.constant 0 : i32
    %c0_i32_1 = arith.constant 0 : i32
    return %c0_i32, %c0_i32_0 : i32, i32
  }
  func.func @transform_8(%arg0: i32) -> (i32, i32) {
    %c0_i32 = arith.constant 0 : i32
    %c0_i32_0 = arith.constant 0 : i32
    return %arg0, %c0_i32 : i32, i32
  }
}

module attributes {stable_mosaic.version = 11 : i64} {
  func.func @_b0_combine_kernel(%arg0: i32, %arg1: i32, %arg2: memref<1x18x18x64xbf16, #tpu.memory_space<vmem>>, %arg3: memref<1x8x16x8xbf16, #tpu.memory_space<vmem>>, %arg4: memref<9x64x8xbf16, #tpu.memory_space<vmem>>, %arg5: memref<1x16xf32, #tpu.memory_space<vmem>>, %arg6: memref<1x16xf32, #tpu.memory_space<vmem>>, %arg7: memref<1x8x16x16xbf16, #tpu.memory_space<vmem>>) attributes {dimension_semantics = [#tpu.dimension_semantics<parallel>, #tpu.dimension_semantics<parallel>], iteration_bounds = array<i64: 2, 2>, scalar_prefetch = 0 : i64, scratch_operands = 0 : i64, tpu.core_type = #tpu.core_type<tc>, window_params = [{transform_indices = @transform_0, window_bounds = array<i64: 1, 18, 18, 64>}, {transform_indices = @transform_1, window_bounds = array<i64: 1, 8, 16, 8>}, {pipeline_mode = #tpu.pipeline_mode<synchronous>, transform_indices = @transform_2, window_bounds = array<i64: 9, 64, 8>}, {pipeline_mode = #tpu.pipeline_mode<synchronous>, transform_indices = @transform_3, window_bounds = array<i64: 1, 16>}, {pipeline_mode = #tpu.pipeline_mode<synchronous>, transform_indices = @transform_4, window_bounds = array<i64: 1, 16>}, {transform_indices = @transform_5, window_bounds = array<i64: 1, 8, 16, 16>}]} {
    %c8_i32 = arith.constant 8 : i32
    %0 = arith.muli %arg1, %c8_i32 : i32
    %1 = tpu.assume_multiple %0, 8 : i32
    %cst = arith.constant 0.000000e+00 : f32
    %2 = vector.broadcast %cst : f32 to vector<128x8xf32>
    %c0_i32 = arith.constant 0 : i32
    %3 = arith.addi %1, %c0_i32 : i32
    %c0 = arith.constant 0 : index
    %4 = arith.index_cast %3 : i32 to index
    %c0_0 = arith.constant 0 : index
    %c0_1 = arith.constant 0 : index
    %5 = vector.load %arg2[%c0, %4, %c0_0, %c0_1] : memref<1x18x18x64xbf16, #tpu.memory_space<vmem>>, vector<1x8x18x64xbf16>
    %6 = vector.shape_cast %5 : vector<1x8x18x64xbf16> to vector<8x18x64xbf16>
    %7 = vector.extract_strided_slice %6 {offsets = [0, 0, 0], sizes = [8, 16, 64], strides = [1, 1, 1]} : vector<8x18x64xbf16> to vector<8x16x64xbf16>
    %8 = vector.shape_cast %7 : vector<8x16x64xbf16> to vector<128x64xbf16>
    %c0_2 = arith.constant 0 : index
    %c0_3 = arith.constant 0 : index
    %c0_4 = arith.constant 0 : index
    %9 = vector.load %arg4[%c0_2, %c0_3, %c0_4] : memref<9x64x8xbf16, #tpu.memory_space<vmem>>, vector<1x64x8xbf16>
    %10 = vector.shape_cast %9 : vector<1x64x8xbf16> to vector<64x8xbf16>
    %cst_5 = arith.constant dense<0.000000e+00> : vector<128x8xf32>
    %11 = tpu.matmul %8, %10, %cst_5 {dimension_numbers = #tpu.dot_dimension_numbers<[1], [0], [0], [1], [0, 0, 1, 1], [], []>} : vector<128x64xbf16>, vector<64x8xbf16>, vector<128x8xf32> -> vector<128x8xf32>
    %12 = arith.addf %2, %11 : vector<128x8xf32>
    %13 = vector.extract_strided_slice %6 {offsets = [0, 1, 0], sizes = [8, 16, 64], strides = [1, 1, 1]} : vector<8x18x64xbf16> to vector<8x16x64xbf16>
    %14 = vector.shape_cast %13 : vector<8x16x64xbf16> to vector<128x64xbf16>
    %c1 = arith.constant 1 : index
    %c0_6 = arith.constant 0 : index
    %c0_7 = arith.constant 0 : index
    %15 = vector.load %arg4[%c1, %c0_6, %c0_7] : memref<9x64x8xbf16, #tpu.memory_space<vmem>>, vector<1x64x8xbf16>
    %16 = vector.shape_cast %15 : vector<1x64x8xbf16> to vector<64x8xbf16>
    %cst_8 = arith.constant dense<0.000000e+00> : vector<128x8xf32>
    %17 = tpu.matmul %14, %16, %cst_8 {dimension_numbers = #tpu.dot_dimension_numbers<[1], [0], [0], [1], [0, 0, 1, 1], [], []>} : vector<128x64xbf16>, vector<64x8xbf16>, vector<128x8xf32> -> vector<128x8xf32>
    %18 = arith.addf %12, %17 : vector<128x8xf32>
    %19 = vector.extract_strided_slice %6 {offsets = [0, 2, 0], sizes = [8, 16, 64], strides = [1, 1, 1]} : vector<8x18x64xbf16> to vector<8x16x64xbf16>
    %20 = vector.shape_cast %19 : vector<8x16x64xbf16> to vector<128x64xbf16>
    %c2 = arith.constant 2 : index
    %c0_9 = arith.constant 0 : index
    %c0_10 = arith.constant 0 : index
    %21 = vector.load %arg4[%c2, %c0_9, %c0_10] : memref<9x64x8xbf16, #tpu.memory_space<vmem>>, vector<1x64x8xbf16>
    %22 = vector.shape_cast %21 : vector<1x64x8xbf16> to vector<64x8xbf16>
    %cst_11 = arith.constant dense<0.000000e+00> : vector<128x8xf32>
    %23 = tpu.matmul %20, %22, %cst_11 {dimension_numbers = #tpu.dot_dimension_numbers<[1], [0], [0], [1], [0, 0, 1, 1], [], []>} : vector<128x64xbf16>, vector<64x8xbf16>, vector<128x8xf32> -> vector<128x8xf32>
    %24 = arith.addf %18, %23 : vector<128x8xf32>
    %c1_i32 = arith.constant 1 : i32
    %25 = arith.addi %1, %c1_i32 : i32
    %c0_12 = arith.constant 0 : index
    %26 = arith.index_cast %25 : i32 to index
    %c0_13 = arith.constant 0 : index
    %c0_14 = arith.constant 0 : index
    %27 = vector.load %arg2[%c0_12, %26, %c0_13, %c0_14] : memref<1x18x18x64xbf16, #tpu.memory_space<vmem>>, vector<1x8x18x64xbf16>
    %28 = vector.shape_cast %27 : vector<1x8x18x64xbf16> to vector<8x18x64xbf16>
    %29 = vector.extract_strided_slice %28 {offsets = [0, 0, 0], sizes = [8, 16, 64], strides = [1, 1, 1]} : vector<8x18x64xbf16> to vector<8x16x64xbf16>
    %30 = vector.shape_cast %29 : vector<8x16x64xbf16> to vector<128x64xbf16>
    %c3 = arith.constant 3 : index
    %c0_15 = arith.constant 0 : index
    %c0_16 = arith.constant 0 : index
    %31 = vector.load %arg4[%c3, %c0_15, %c0_16] : memref<9x64x8xbf16, #tpu.memory_space<vmem>>, vector<1x64x8xbf16>
    %32 = vector.shape_cast %31 : vector<1x64x8xbf16> to vector<64x8xbf16>
    %cst_17 = arith.constant dense<0.000000e+00> : vector<128x8xf32>
    %33 = tpu.matmul %30, %32, %cst_17 {dimension_numbers = #tpu.dot_dimension_numbers<[1], [0], [0], [1], [0, 0, 1, 1], [], []>} : vector<128x64xbf16>, vector<64x8xbf16>, vector<128x8xf32> -> vector<128x8xf32>
    %34 = arith.addf %24, %33 : vector<128x8xf32>
    %35 = vector.extract_strided_slice %28 {offsets = [0, 1, 0], sizes = [8, 16, 64], strides = [1, 1, 1]} : vector<8x18x64xbf16> to vector<8x16x64xbf16>
    %36 = vector.shape_cast %35 : vector<8x16x64xbf16> to vector<128x64xbf16>
    %c4 = arith.constant 4 : index
    %c0_18 = arith.constant 0 : index
    %c0_19 = arith.constant 0 : index
    %37 = vector.load %arg4[%c4, %c0_18, %c0_19] : memref<9x64x8xbf16, #tpu.memory_space<vmem>>, vector<1x64x8xbf16>
    %38 = vector.shape_cast %37 : vector<1x64x8xbf16> to vector<64x8xbf16>
    %cst_20 = arith.constant dense<0.000000e+00> : vector<128x8xf32>
    %39 = tpu.matmul %36, %38, %cst_20 {dimension_numbers = #tpu.dot_dimension_numbers<[1], [0], [0], [1], [0, 0, 1, 1], [], []>} : vector<128x64xbf16>, vector<64x8xbf16>, vector<128x8xf32> -> vector<128x8xf32>
    %40 = arith.addf %34, %39 : vector<128x8xf32>
    %41 = vector.extract_strided_slice %28 {offsets = [0, 2, 0], sizes = [8, 16, 64], strides = [1, 1, 1]} : vector<8x18x64xbf16> to vector<8x16x64xbf16>
    %42 = vector.shape_cast %41 : vector<8x16x64xbf16> to vector<128x64xbf16>
    %c5 = arith.constant 5 : index
    %c0_21 = arith.constant 0 : index
    %c0_22 = arith.constant 0 : index
    %43 = vector.load %arg4[%c5, %c0_21, %c0_22] : memref<9x64x8xbf16, #tpu.memory_space<vmem>>, vector<1x64x8xbf16>
    %44 = vector.shape_cast %43 : vector<1x64x8xbf16> to vector<64x8xbf16>
    %cst_23 = arith.constant dense<0.000000e+00> : vector<128x8xf32>
    %45 = tpu.matmul %42, %44, %cst_23 {dimension_numbers = #tpu.dot_dimension_numbers<[1], [0], [0], [1], [0, 0, 1, 1], [], []>} : vector<128x64xbf16>, vector<64x8xbf16>, vector<128x8xf32> -> vector<128x8xf32>
    %46 = arith.addf %40, %45 : vector<128x8xf32>
    %c2_i32 = arith.constant 2 : i32
    %47 = arith.addi %1, %c2_i32 : i32
    %c0_24 = arith.constant 0 : index
    %48 = arith.index_cast %47 : i32 to index
    %c0_25 = arith.constant 0 : index
    %c0_26 = arith.constant 0 : index
    %49 = vector.load %arg2[%c0_24, %48, %c0_25, %c0_26] : memref<1x18x18x64xbf16, #tpu.memory_space<vmem>>, vector<1x8x18x64xbf16>
    %50 = vector.shape_cast %49 : vector<1x8x18x64xbf16> to vector<8x18x64xbf16>
    %51 = vector.extract_strided_slice %50 {offsets = [0, 0, 0], sizes = [8, 16, 64], strides = [1, 1, 1]} : vector<8x18x64xbf16> to vector<8x16x64xbf16>
    %52 = vector.shape_cast %51 : vector<8x16x64xbf16> to vector<128x64xbf16>
    %c6 = arith.constant 6 : index
    %c0_27 = arith.constant 0 : index
    %c0_28 = arith.constant 0 : index
    %53 = vector.load %arg4[%c6, %c0_27, %c0_28] : memref<9x64x8xbf16, #tpu.memory_space<vmem>>, vector<1x64x8xbf16>
    %54 = vector.shape_cast %53 : vector<1x64x8xbf16> to vector<64x8xbf16>
    %cst_29 = arith.constant dense<0.000000e+00> : vector<128x8xf32>
    %55 = tpu.matmul %52, %54, %cst_29 {dimension_numbers = #tpu.dot_dimension_numbers<[1], [0], [0], [1], [0, 0, 1, 1], [], []>} : vector<128x64xbf16>, vector<64x8xbf16>, vector<128x8xf32> -> vector<128x8xf32>
    %56 = arith.addf %46, %55 : vector<128x8xf32>
    %57 = vector.extract_strided_slice %50 {offsets = [0, 1, 0], sizes = [8, 16, 64], strides = [1, 1, 1]} : vector<8x18x64xbf16> to vector<8x16x64xbf16>
    %58 = vector.shape_cast %57 : vector<8x16x64xbf16> to vector<128x64xbf16>
    %c7 = arith.constant 7 : index
    %c0_30 = arith.constant 0 : index
    %c0_31 = arith.constant 0 : index
    %59 = vector.load %arg4[%c7, %c0_30, %c0_31] : memref<9x64x8xbf16, #tpu.memory_space<vmem>>, vector<1x64x8xbf16>
    %60 = vector.shape_cast %59 : vector<1x64x8xbf16> to vector<64x8xbf16>
    %cst_32 = arith.constant dense<0.000000e+00> : vector<128x8xf32>
    %61 = tpu.matmul %58, %60, %cst_32 {dimension_numbers = #tpu.dot_dimension_numbers<[1], [0], [0], [1], [0, 0, 1, 1], [], []>} : vector<128x64xbf16>, vector<64x8xbf16>, vector<128x8xf32> -> vector<128x8xf32>
    %62 = arith.addf %56, %61 : vector<128x8xf32>
    %63 = vector.extract_strided_slice %50 {offsets = [0, 2, 0], sizes = [8, 16, 64], strides = [1, 1, 1]} : vector<8x18x64xbf16> to vector<8x16x64xbf16>
    %64 = vector.shape_cast %63 : vector<8x16x64xbf16> to vector<128x64xbf16>
    %c8 = arith.constant 8 : index
    %c0_33 = arith.constant 0 : index
    %c0_34 = arith.constant 0 : index
    %65 = vector.load %arg4[%c8, %c0_33, %c0_34] : memref<9x64x8xbf16, #tpu.memory_space<vmem>>, vector<1x64x8xbf16>
    %66 = vector.shape_cast %65 : vector<1x64x8xbf16> to vector<64x8xbf16>
    %cst_35 = arith.constant dense<0.000000e+00> : vector<128x8xf32>
    %67 = tpu.matmul %64, %66, %cst_35 {dimension_numbers = #tpu.dot_dimension_numbers<[1], [0], [0], [1], [0, 0, 1, 1], [], []>} : vector<128x64xbf16>, vector<64x8xbf16>, vector<128x8xf32> -> vector<128x8xf32>
    %68 = arith.addf %62, %67 : vector<128x8xf32>
    %c0_36 = arith.constant 0 : index
    %c0_37 = arith.constant 0 : index
    %c0_38 = arith.constant 0 : index
    %c0_39 = arith.constant 0 : index
    %69 = vector.load %arg3[%c0_36, %c0_37, %c0_38, %c0_39] : memref<1x8x16x8xbf16, #tpu.memory_space<vmem>>, vector<1x8x16x8xbf16>
    %70 = vector.shape_cast %69 : vector<1x8x16x8xbf16> to vector<8x16x8xbf16>
    %71 = vector.shape_cast %70 : vector<8x16x8xbf16> to vector<128x8xbf16>
    %72 = arith.extf %71 : vector<128x8xbf16> to vector<128x8xf32>
    %73 = tpu.concatenate %72, %68 in 1 : vector<128x8xf32>, vector<128x8xf32> -> vector<128x16xf32>
    %c0_40 = arith.constant 0 : index
    %c0_41 = arith.constant 0 : index
    %74 = vector.load %arg5[%c0_40, %c0_41] : memref<1x16xf32, #tpu.memory_space<vmem>>, vector<1x16xf32>
    %75 = vector.broadcast %74 : vector<1x16xf32> to vector<128x16xf32>
    %76 = arith.addf %73, %75 : vector<128x16xf32>
    %cst_42 = arith.constant 0.000000e+00 : f32
    %77 = vector.broadcast %cst_42 : f32 to vector<128x16xf32>
    %78 = arith.cmpf oge, %76, %77 : vector<128x16xf32>
    %c0_43 = arith.constant 0 : index
    %c0_44 = arith.constant 0 : index
    %79 = vector.load %arg6[%c0_43, %c0_44] : memref<1x16xf32, #tpu.memory_space<vmem>>, vector<1x16xf32>
    %80 = vector.broadcast %79 : vector<1x16xf32> to vector<128x16xf32>
    %81 = arith.mulf %80, %76 : vector<128x16xf32>
    %82 = arith.select %78, %76, %81 : vector<128x16xi1>, vector<128x16xf32>
    %83 = vector.shape_cast %82 : vector<128x16xf32> to vector<8x16x16xf32>
    %84 = arith.truncf %83 : vector<8x16x16xf32> to vector<8x16x16xbf16>
    %c0_45 = arith.constant 0 : index
    %c0_46 = arith.constant 0 : index
    %c0_47 = arith.constant 0 : index
    %c0_48 = arith.constant 0 : index
    %85 = vector.load %arg7[%c0_45, %c0_46, %c0_47, %c0_48] : memref<1x8x16x16xbf16, #tpu.memory_space<vmem>>, vector<1x8x16x16xbf16>
    %86 = vector.shape_cast %85 : vector<1x8x16x16xbf16> to vector<8x16x16xbf16>
    %87 = vector.shape_cast %84 : vector<8x16x16xbf16> to vector<1x8x16x16xbf16>
    tpu.vector_store %arg7[%c0_45, %c0_46, %c0_47, %c0_48], %87 {strides = array<i32>} : memref<1x8x16x16xbf16, #tpu.memory_space<vmem>>, vector<1x8x16x16xbf16>,
    return
  }
  func.func @transform_0(%arg0: i32, %arg1: i32) -> (i32, i32, i32, i32) {
    %c0_i32 = arith.constant 0 : i32
    %c0_i32_0 = arith.constant 0 : i32
    %c0_i32_1 = arith.constant 0 : i32
    %c0_i32_2 = arith.constant 0 : i32
    return %arg0, %c0_i32, %c0_i32_0, %c0_i32_1 : i32, i32, i32, i32
  }
  func.func @transform_1(%arg0: i32, %arg1: i32) -> (i32, i32, i32, i32) {
    %c0_i32 = arith.constant 0 : i32
    %c0_i32_0 = arith.constant 0 : i32
    %c0_i32_1 = arith.constant 0 : i32
    return %arg0, %arg1, %c0_i32, %c0_i32_0 : i32, i32, i32, i32
  }
  func.func @transform_2(%arg0: i32, %arg1: i32) -> (i32, i32, i32) {
    %c0_i32 = arith.constant 0 : i32
    %c0_i32_0 = arith.constant 0 : i32
    %c0_i32_1 = arith.constant 0 : i32
    %c0_i32_2 = arith.constant 0 : i32
    return %c0_i32, %c0_i32_0, %c0_i32_1 : i32, i32, i32
  }
  func.func @transform_3(%arg0: i32, %arg1: i32) -> (i32, i32) {
    %c0_i32 = arith.constant 0 : i32
    %c0_i32_0 = arith.constant 0 : i32
    %c0_i32_1 = arith.constant 0 : i32
    return %c0_i32, %c0_i32_0 : i32, i32
  }
  func.func @transform_4(%arg0: i32, %arg1: i32) -> (i32, i32) {
    %c0_i32 = arith.constant 0 : i32
    %c0_i32_0 = arith.constant 0 : i32
    %c0_i32_1 = arith.constant 0 : i32
    return %c0_i32, %c0_i32_0 : i32, i32
  }
  func.func @transform_5(%arg0: i32, %arg1: i32) -> (i32, i32, i32, i32) {
    %c0_i32 = arith.constant 0 : i32
    %c0_i32_0 = arith.constant 0 : i32
    %c0_i32_1 = arith.constant 0 : i32
    return %arg0, %arg1, %c0_i32, %c0_i32_0 : i32, i32, i32, i32
  }
}

module attributes {stable_mosaic.version = 11 : i64} {
  func.func @_b1_kernel(%arg0: i32, %arg1: i32, %arg2: memref<1x17x24x16xbf16, #tpu.memory_space<vmem>>, %arg3: memref<16x8xbf16, #tpu.memory_space<vmem>>, %arg4: memref<1x8xf32, #tpu.memory_space<vmem>>, %arg5: memref<1x8xf32, #tpu.memory_space<vmem>>, %arg6: memref<4x8x8xbf16, #tpu.memory_space<vmem>>, %arg7: memref<1x8xf32, #tpu.memory_space<vmem>>, %arg8: memref<1x8xf32, #tpu.memory_space<vmem>>, %arg9: memref<8x16xbf16, #tpu.memory_space<vmem>>, %arg10: memref<1x16xf32, #tpu.memory_space<vmem>>, %arg11: memref<1x16xf32, #tpu.memory_space<vmem>>, %arg12: memref<1x8x16x16xf32, #tpu.memory_space<vmem>>) attributes {dimension_semantics = [#tpu.dimension_semantics<parallel>, #tpu.dimension_semantics<parallel>], iteration_bounds = array<i64: 2, 2>, scalar_prefetch = 0 : i64, scratch_operands = 0 : i64, tpu.core_type = #tpu.core_type<tc>, window_params = [{transform_indices = @transform_0, window_bounds = array<i64: 1, 17, 24, 16>}, {pipeline_mode = #tpu.pipeline_mode<synchronous>, transform_indices = @transform_1, window_bounds = array<i64: 16, 8>}, {pipeline_mode = #tpu.pipeline_mode<synchronous>, transform_indices = @transform_2, window_bounds = array<i64: 1, 8>}, {pipeline_mode = #tpu.pipeline_mode<synchronous>, transform_indices = @transform_3, window_bounds = array<i64: 1, 8>}, {pipeline_mode = #tpu.pipeline_mode<synchronous>, transform_indices = @transform_4, window_bounds = array<i64: 4, 8, 8>}, {pipeline_mode = #tpu.pipeline_mode<synchronous>, transform_indices = @transform_5, window_bounds = array<i64: 1, 8>}, {pipeline_mode = #tpu.pipeline_mode<synchronous>, transform_indices = @transform_6, window_bounds = array<i64: 1, 8>}, {pipeline_mode = #tpu.pipeline_mode<synchronous>, transform_indices = @transform_7, window_bounds = array<i64: 8, 16>}, {pipeline_mode = #tpu.pipeline_mode<synchronous>, transform_indices = @transform_8, window_bounds = array<i64: 1, 16>}, {pipeline_mode = #tpu.pipeline_mode<synchronous>, transform_indices = @transform_9, window_bounds = array<i64: 1, 16>}, {transform_indices = @transform_10, window_bounds = array<i64: 1, 8, 16, 16>}]} {
    %c8_i32 = arith.constant 8 : i32
    %0 = arith.muli %arg1, %c8_i32 : i32
    %1 = tpu.assume_multiple %0, 8 : i32
    %c0 = arith.constant 0 : index
    %2 = arith.index_cast %1 : i32 to index
    %c0_0 = arith.constant 0 : index
    %c0_1 = arith.constant 0 : index
    %3 = vector.load %arg2[%c0, %2, %c0_0, %c0_1] : memref<1x17x24x16xbf16, #tpu.memory_space<vmem>>, vector<1x9x24x16xbf16>
    %4 = vector.shape_cast %3 : vector<1x9x24x16xbf16> to vector<9x24x16xbf16>
    %5 = vector.shape_cast %4 : vector<9x24x16xbf16> to vector<216x16xbf16>
    %c0_2 = arith.constant 0 : index
    %c0_3 = arith.constant 0 : index
    %6 = vector.load %arg3[%c0_2, %c0_3] : memref<16x8xbf16, #tpu.memory_space<vmem>>, vector<16x8xbf16>
    %cst = arith.constant dense<0.000000e+00> : vector<216x8xf32>
    %7 = tpu.matmul %5, %6, %cst {dimension_numbers = #tpu.dot_dimension_numbers<[1], [0], [0], [1], [0, 0, 1, 1], [], []>} : vector<216x16xbf16>, vector<16x8xbf16>, vector<216x8xf32> -> vector<216x8xf32>
    %c0_4 = arith.constant 0 : index
    %c0_5 = arith.constant 0 : index
    %8 = vector.load %arg4[%c0_4, %c0_5] : memref<1x8xf32, #tpu.memory_space<vmem>>, vector<1x8xf32>
    %9 = vector.broadcast %8 : vector<1x8xf32> to vector<216x8xf32>
    %10 = arith.addf %7, %9 : vector<216x8xf32>
    %cst_6 = arith.constant 0.000000e+00 : f32
    %11 = vector.broadcast %cst_6 : f32 to vector<216x8xf32>
    %12 = arith.cmpf oge, %10, %11 : vector<216x8xf32>
    %c0_7 = arith.constant 0 : index
    %c0_8 = arith.constant 0 : index
    %13 = vector.load %arg5[%c0_7, %c0_8] : memref<1x8xf32, #tpu.memory_space<vmem>>, vector<1x8xf32>
    %14 = vector.broadcast %13 : vector<1x8xf32> to vector<216x8xf32>
    %15 = arith.mulf %14, %10 : vector<216x8xf32>
    %16 = arith.select %12, %10, %15 : vector<216x8xi1>, vector<216x8xf32>
    %17 = vector.shape_cast %16 : vector<216x8xf32> to vector<9x24x8xf32>
    %18 = tpu.iota {dimensions = array<i32: 0>} : vector<9x24x8xi32>
    %19 = vector.broadcast %1 : i32 to vector<9x24x8xi32>
    %20 = arith.addi %19, %18 : vector<9x24x8xi32>
    %21 = tpu.iota {dimensions = array<i32: 1>} : vector<9x24x8xi32>
    %c16_i32 = arith.constant 16 : i32
    %22 = vector.broadcast %c16_i32 : i32 to vector<9x24x8xi32>
    %23 = arith.cmpi slt, %20, %22 : vector<9x24x8xi32>
    %c16_i32_9 = arith.constant 16 : i32
    %24 = vector.broadcast %c16_i32_9 : i32 to vector<9x24x8xi32>
    %25 = arith.cmpi slt, %21, %24 : vector<9x24x8xi32>
    %26 = arith.andi %23, %25 : vector<9x24x8xi1>
    %cst_10 = arith.constant 0.000000e+00 : f32
    %27 = vector.broadcast %cst_10 : f32 to vector<9x24x8xf32>
    %28 = arith.select %26, %17, %27 : vector<9x24x8xi1>, vector<9x24x8xf32>
    %29 = arith.truncf %28 : vector<9x24x8xf32> to vector<9x24x8xbf16>
    %cst_11 = arith.constant 0.000000e+00 : f32
    %30 = vector.broadcast %cst_11 : f32 to vector<128x8xf32>
    %31 = vector.extract_strided_slice %29 {offsets = [0, 0, 0], sizes = [8, 16, 8], strides = [1, 1, 1]} : vector<9x24x8xbf16> to vector<8x16x8xbf16>
    %32 = vector.shape_cast %31 : vector<8x16x8xbf16> to vector<128x8xbf16>
    %c0_12 = arith.constant 0 : index
    %c0_13 = arith.constant 0 : index
    %c0_14 = arith.constant 0 : index
    %33 = vector.load %arg6[%c0_12, %c0_13, %c0_14] : memref<4x8x8xbf16, #tpu.memory_space<vmem>>, vector<1x8x8xbf16>
    %34 = vector.shape_cast %33 : vector<1x8x8xbf16> to vector<8x8xbf16>
    %cst_15 = arith.constant dense<0.000000e+00> : vector<128x8xf32>
    %35 = tpu.matmul %32, %34, %cst_15 {dimension_numbers = #tpu.dot_dimension_numbers<[1], [0], [0], [1], [0, 0, 1, 1], [], []>} : vector<128x8xbf16>, vector<8x8xbf16>, vector<128x8xf32> -> vector<128x8xf32>
    %36 = arith.addf %30, %35 : vector<128x8xf32>
    %37 = vector.extract_strided_slice %29 {offsets = [0, 1, 0], sizes = [8, 16, 8], strides = [1, 1, 1]} : vector<9x24x8xbf16> to vector<8x16x8xbf16>
    %38 = vector.shape_cast %37 : vector<8x16x8xbf16> to vector<128x8xbf16>
    %c1 = arith.constant 1 : index
    %c0_16 = arith.constant 0 : index
    %c0_17 = arith.constant 0 : index
    %39 = vector.load %arg6[%c1, %c0_16, %c0_17] : memref<4x8x8xbf16, #tpu.memory_space<vmem>>, vector<1x8x8xbf16>
    %40 = vector.shape_cast %39 : vector<1x8x8xbf16> to vector<8x8xbf16>
    %cst_18 = arith.constant dense<0.000000e+00> : vector<128x8xf32>
    %41 = tpu.matmul %38, %40, %cst_18 {dimension_numbers = #tpu.dot_dimension_numbers<[1], [0], [0], [1], [0, 0, 1, 1], [], []>} : vector<128x8xbf16>, vector<8x8xbf16>, vector<128x8xf32> -> vector<128x8xf32>
    %42 = arith.addf %36, %41 : vector<128x8xf32>
    %43 = vector.extract_strided_slice %29 {offsets = [1, 0, 0], sizes = [8, 16, 8], strides = [1, 1, 1]} : vector<9x24x8xbf16> to vector<8x16x8xbf16>
    %44 = vector.shape_cast %43 : vector<8x16x8xbf16> to vector<128x8xbf16>
    %c2 = arith.constant 2 : index
    %c0_19 = arith.constant 0 : index
    %c0_20 = arith.constant 0 : index
    %45 = vector.load %arg6[%c2, %c0_19, %c0_20] : memref<4x8x8xbf16, #tpu.memory_space<vmem>>, vector<1x8x8xbf16>
    %46 = vector.shape_cast %45 : vector<1x8x8xbf16> to vector<8x8xbf16>
    %cst_21 = arith.constant dense<0.000000e+00> : vector<128x8xf32>
    %47 = tpu.matmul %44, %46, %cst_21 {dimension_numbers = #tpu.dot_dimension_numbers<[1], [0], [0], [1], [0, 0, 1, 1], [], []>} : vector<128x8xbf16>, vector<8x8xbf16>, vector<128x8xf32> -> vector<128x8xf32>
    %48 = arith.addf %42, %47 : vector<128x8xf32>
    %49 = vector.extract_strided_slice %29 {offsets = [1, 1, 0], sizes = [8, 16, 8], strides = [1, 1, 1]} : vector<9x24x8xbf16> to vector<8x16x8xbf16>
    %50 = vector.shape_cast %49 : vector<8x16x8xbf16> to vector<128x8xbf16>
    %c3 = arith.constant 3 : index
    %c0_22 = arith.constant 0 : index
    %c0_23 = arith.constant 0 : index
    %51 = vector.load %arg6[%c3, %c0_22, %c0_23] : memref<4x8x8xbf16, #tpu.memory_space<vmem>>, vector<1x8x8xbf16>
    %52 = vector.shape_cast %51 : vector<1x8x8xbf16> to vector<8x8xbf16>
    %cst_24 = arith.constant dense<0.000000e+00> : vector<128x8xf32>
    %53 = tpu.matmul %50, %52, %cst_24 {dimension_numbers = #tpu.dot_dimension_numbers<[1], [0], [0], [1], [0, 0, 1, 1], [], []>} : vector<128x8xbf16>, vector<8x8xbf16>, vector<128x8xf32> -> vector<128x8xf32>
    %54 = arith.addf %48, %53 : vector<128x8xf32>
    %c0_25 = arith.constant 0 : index
    %c0_26 = arith.constant 0 : index
    %55 = vector.load %arg7[%c0_25, %c0_26] : memref<1x8xf32, #tpu.memory_space<vmem>>, vector<1x8xf32>
    %56 = vector.broadcast %55 : vector<1x8xf32> to vector<128x8xf32>
    %57 = arith.addf %54, %56 : vector<128x8xf32>
    %cst_27 = arith.constant 0.000000e+00 : f32
    %58 = vector.broadcast %cst_27 : f32 to vector<128x8xf32>
    %59 = arith.cmpf oge, %57, %58 : vector<128x8xf32>
    %c0_28 = arith.constant 0 : index
    %c0_29 = arith.constant 0 : index
    %60 = vector.load %arg8[%c0_28, %c0_29] : memref<1x8xf32, #tpu.memory_space<vmem>>, vector<1x8xf32>
    %61 = vector.broadcast %60 : vector<1x8xf32> to vector<128x8xf32>
    %62 = arith.mulf %61, %57 : vector<128x8xf32>
    %63 = arith.select %59, %57, %62 : vector<128x8xi1>, vector<128x8xf32>
    %64 = arith.truncf %63 : vector<128x8xf32> to vector<128x8xbf16>
    %c0_30 = arith.constant 0 : index
    %c0_31 = arith.constant 0 : index
    %65 = vector.load %arg9[%c0_30, %c0_31] : memref<8x16xbf16, #tpu.memory_space<vmem>>, vector<8x16xbf16>
    %cst_32 = arith.constant dense<0.000000e+00> : vector<128x16xf32>
    %66 = tpu.matmul %64, %65, %cst_32 {dimension_numbers = #tpu.dot_dimension_numbers<[1], [0], [0], [1], [0, 0, 1, 1], [], []>} : vector<128x8xbf16>, vector<8x16xbf16>, vector<128x16xf32> -> vector<128x16xf32>
    %c0_33 = arith.constant 0 : index
    %c0_34 = arith.constant 0 : index
    %67 = vector.load %arg10[%c0_33, %c0_34] : memref<1x16xf32, #tpu.memory_space<vmem>>, vector<1x16xf32>
    %68 = vector.broadcast %67 : vector<1x16xf32> to vector<128x16xf32>
    %69 = arith.addf %66, %68 : vector<128x16xf32>
    %cst_35 = arith.constant 0.000000e+00 : f32
    %70 = vector.broadcast %cst_35 : f32 to vector<128x16xf32>
    %71 = arith.cmpf oge, %69, %70 : vector<128x16xf32>
    %c0_36 = arith.constant 0 : index
    %c0_37 = arith.constant 0 : index
    %72 = vector.load %arg11[%c0_36, %c0_37] : memref<1x16xf32, #tpu.memory_space<vmem>>, vector<1x16xf32>
    %73 = vector.broadcast %72 : vector<1x16xf32> to vector<128x16xf32>
    %74 = arith.mulf %73, %69 : vector<128x16xf32>
    %75 = arith.select %71, %69, %74 : vector<128x16xi1>, vector<128x16xf32>
    %76 = vector.shape_cast %75 : vector<128x16xf32> to vector<8x16x16xf32>
    %c0_38 = arith.constant 0 : index
    %c0_39 = arith.constant 0 : index
    %c0_40 = arith.constant 0 : index
    %c0_41 = arith.constant 0 : index
    %77 = vector.load %arg12[%c0_38, %c0_39, %c0_40, %c0_41] : memref<1x8x16x16xf32, #tpu.memory_space<vmem>>, vector<1x8x16x16xf32>
    %78 = vector.shape_cast %77 : vector<1x8x16x16xf32> to vector<8x16x16xf32>
    %79 = vector.shape_cast %76 : vector<8x16x16xf32> to vector<1x8x16x16xf32>
    tpu.vector_store %arg12[%c0_38, %c0_39, %c0_40, %c0_41], %79 {strides = array<i32>} : memref<1x8x16x16xf32, #tpu.memory_space<vmem>>, vector<1x8x16x16xf32>,
    return
  }
  func.func @transform_0(%arg0: i32, %arg1: i32) -> (i32, i32, i32, i32) {
    %c0_i32 = arith.constant 0 : i32
    %c0_i32_0 = arith.constant 0 : i32
    %c0_i32_1 = arith.constant 0 : i32
    %c0_i32_2 = arith.constant 0 : i32
    return %arg0, %c0_i32, %c0_i32_0, %c0_i32_1 : i32, i32, i32, i32
  }
  func.func @transform_1(%arg0: i32, %arg1: i32) -> (i32, i32) {
    %c0_i32 = arith.constant 0 : i32
    %c0_i32_0 = arith.constant 0 : i32
    %c0_i32_1 = arith.constant 0 : i32
    return %c0_i32, %c0_i32_0 : i32, i32
  }
  func.func @transform_2(%arg0: i32, %arg1: i32) -> (i32, i32) {
    %c0_i32 = arith.constant 0 : i32
    %c0_i32_0 = arith.constant 0 : i32
    %c0_i32_1 = arith.constant 0 : i32
    return %c0_i32, %c0_i32_0 : i32, i32
  }
  func.func @transform_3(%arg0: i32, %arg1: i32) -> (i32, i32) {
    %c0_i32 = arith.constant 0 : i32
    %c0_i32_0 = arith.constant 0 : i32
    %c0_i32_1 = arith.constant 0 : i32
    return %c0_i32, %c0_i32_0 : i32, i32
  }
  func.func @transform_4(%arg0: i32, %arg1: i32) -> (i32, i32, i32) {
    %c0_i32 = arith.constant 0 : i32
    %c0_i32_0 = arith.constant 0 : i32
    %c0_i32_1 = arith.constant 0 : i32
    %c0_i32_2 = arith.constant 0 : i32
    return %c0_i32, %c0_i32_0, %c0_i32_1 : i32, i32, i32
  }
  func.func @transform_5(%arg0: i32, %arg1: i32) -> (i32, i32) {
    %c0_i32 = arith.constant 0 : i32
    %c0_i32_0 = arith.constant 0 : i32
    %c0_i32_1 = arith.constant 0 : i32
    return %c0_i32, %c0_i32_0 : i32, i32
  }
  func.func @transform_6(%arg0: i32, %arg1: i32) -> (i32, i32) {
    %c0_i32 = arith.constant 0 : i32
    %c0_i32_0 = arith.constant 0 : i32
    %c0_i32_1 = arith.constant 0 : i32
    return %c0_i32, %c0_i32_0 : i32, i32
  }
  func.func @transform_7(%arg0: i32, %arg1: i32) -> (i32, i32) {
    %c0_i32 = arith.constant 0 : i32
    %c0_i32_0 = arith.constant 0 : i32
    %c0_i32_1 = arith.constant 0 : i32
    return %c0_i32, %c0_i32_0 : i32, i32
  }
  func.func @transform_8(%arg0: i32, %arg1: i32) -> (i32, i32) {
    %c0_i32 = arith.constant 0 : i32
    %c0_i32_0 = arith.constant 0 : i32
    %c0_i32_1 = arith.constant 0 : i32
    return %c0_i32, %c0_i32_0 : i32, i32
  }
  func.func @transform_9(%arg0: i32, %arg1: i32) -> (i32, i32) {
    %c0_i32 = arith.constant 0 : i32
    %c0_i32_0 = arith.constant 0 : i32
    %c0_i32_1 = arith.constant 0 : i32
    return %c0_i32, %c0_i32_0 : i32, i32
  }
  func.func @transform_10(%arg0: i32, %arg1: i32) -> (i32, i32, i32, i32) {
    %c0_i32 = arith.constant 0 : i32
    %c0_i32_0 = arith.constant 0 : i32
    %c0_i32_1 = arith.constant 0 : i32
    return %arg0, %arg1, %c0_i32, %c0_i32_0 : i32, i32, i32, i32
  }
}

</mosaic_0001>

<bundles_post_ra>
// kernel: tile.18
= control target key start
LH: loop header
LB: loop body
LE: loop exit
PB: predicated region body
PF: predicated region fallthrough
CT: control target
= control target key end

     0   :  { %s22_s0 = inlined_call_operand.vmem [shape: f32[8], index: 0, kind: input, shape index: {}]   ;;  %s23_s1 = inlined_call_operand.vmem [shape: f32[4,8], index: 1, kind: output, shape index: {}]  }
   0x1   :  { %v4_v0 = vld [vmem:[%s22_s0] ss:$0 sm:$0xff] }
   0x2   :  { %5 = vst [vmem:[%s23_s1] sm:$0xf] %v4_v0 }

// kernel: mul.58
= control target key start
LH: loop header
LB: loop body
LE: loop exit
PB: predicated region body
PF: predicated region fallthrough
CT: control target
= control target key end

     0   :  { %vm7_vm0 = vcmask 64512   ;;  %s37_s8 = smov 8   ;;  %s38_s9 = smov 16   ;;  %vm13_vm1 = vcmask 261312   ;;  %vm19_vm2 = vcmask 195712   ;;  %vm25_vm3 = vcmask 130112   ;;  %s55_s0 = inlined_call_operand.vmem [shape: f32[4,8], index: 0, kind: input, shape index: {}]   ;;  %s56_s1 = inlined_call_operand.vmem [shape: f32[32], index: 1, kind: output, shape index: {}]  }
   0x1   :  { %v4_v0 = vld [vmem:[%s55_s0] sm:$0xf]  ;;  %s36_s0 = smov 24  }
   0x2   :  { %5 = vst [vmem:[#allocation1] sm:$0xf] %v4_v0 }
   0x9   :  { %v10_v1 = vld [vmem:[#allocation1 + $0x3] sm:$0x1]   ;;  %v22_v2 = vld [vmem:[#allocation1 + $0x1] sm:$0x1]   ;;  %v6_v3 = vld [vmem:[#allocation1] sm:$0x1]  }
   0xa   :  { %11 = vrot.lane.b32.xlu0 %v10_v1, %s36_s0  ;;  %23 = vrot.lane.b32.xlu1 %v22_v2, %s37_s8  ;;  %v16_v4 = vld [vmem:[#allocation1 + $0x2] sm:$0x1]   ;;  %8 = vst.msk [vmem:[#allocation0] sm:$0x1] %vm7_vm0, %v6_v3  }
   0xe   :  { %17 = vrot.lane.b32.xlu0 %v16_v4, %s38_s9 }
  0x7c   :  { %v12_v5 = vpop.permute.xlu0 %11   ;;  %v24_v6 = vpop.permute.xlu1 %23  }
  0x7d   :  { %14 = vst.msk [vmem:[#allocation0] sm:$0x1] %vm13_vm1, %v12_v5  }
  0x80   :  { %v18_v7 = vpop.permute.xlu0 %17  }
  0x81   :  { %20 = vst.msk [vmem:[#allocation0] sm:$0x1] %vm19_vm2, %v18_v7  }
  0x82   :  { %26 = vst.msk [vmem:[#allocation0] sm:$0x1] %vm25_vm3, %v24_v6  }
  0x89   :  { %v30_v8 = vld [vmem:[#allocation0] sm:$0x1] }
  0x8a   :  { %32 = vst [vmem:[%s56_s1] sm:$0x1] %v30_v8 }

// kernel: tile.24
= control target key start
LH: loop header
LB: loop body
LE: loop exit
PB: predicated region body
PF: predicated region fallthrough
CT: control target
= control target key end

     0   :  { %vm7_vm0 = vcmask 64512   ;;  %s37_s8 = smov 8   ;;  %s38_s9 = smov 16   ;;  %vm13_vm1 = vcmask 261312   ;;  %vm19_vm2 = vcmask 195712   ;;  %vm25_vm3 = vcmask 130112   ;;  %s55_s0 = inlined_call_operand.vmem [shape: f32[4,8], index: 0, kind: input, shape index: {}]   ;;  %s56_s1 = inlined_call_operand.vmem [shape: f32[1,32], index: 1, kind: output, shape index: {}]  }
   0x1   :  { %v4_v0 = vld [vmem:[%s55_s0] sm:$0xf]  ;;  %s36_s0 = smov 24  }
   0x2   :  { %5 = vst [vmem:[#allocation1] sm:$0xf] %v4_v0 }
   0x9   :  { %v10_v1 = vld [vmem:[#allocation1 + $0x3] sm:$0x1]   ;;  %v22_v2 = vld [vmem:[#allocation1 + $0x1] sm:$0x1]   ;;  %v6_v3 = vld [vmem:[#allocation1] sm:$0x1]  }
   0xa   :  { %11 = vrot.lane.b32.xlu0 %v10_v1, %s36_s0  ;;  %23 = vrot.lane.b32.xlu1 %v22_v2, %s37_s8  ;;  %v16_v4 = vld [vmem:[#allocation1 + $0x2] sm:$0x1]   ;;  %8 = vst.msk [vmem:[#allocation0] sm:$0x1] %vm7_vm0, %v6_v3  }
   0xe   :  { %17 = vrot.lane.b32.xlu0 %v16_v4, %s38_s9 }
  0x7c   :  { %v12_v5 = vpop.permute.xlu0 %11   ;;  %v24_v6 = vpop.permute.xlu1 %23  }
  0x7d   :  { %14 = vst.msk [vmem:[#allocation0] sm:$0x1] %vm13_vm1, %v12_v5  }
  0x80   :  { %v18_v7 = vpop.permute.xlu0 %17  }
  0x81   :  { %20 = vst.msk [vmem:[#allocation0] sm:$0x1] %vm19_vm2, %v18_v7  }
  0x82   :  { %26 = vst.msk [vmem:[#allocation0] sm:$0x1] %vm25_vm3, %v24_v6  }
  0x89   :  { %v30_v8 = vld [vmem:[#allocation0] sm:$0x1] }
  0x8a   :  { %32 = vst [vmem:[%s56_s1] sm:$0x1] %v30_v8 }

// kernel: enet_stage5.3
= control target key start
LH: loop header
LB: loop body
LE: loop exit
PB: predicated region body
PF: predicated region fallthrough
CT: control target
= control target key end

     0   :  { %s988_s27 = smov 0   ;;  %s1061_s0 = inlined_call_operand.vmem [shape: bf16[128,64], index: 0, kind: input, shape index: {}]   ;;  %s1062_s1 = inlined_call_operand.vmem [shape: bf16[64,4], index: 1, kind: input, shape index: {}]   ;;  %s1063_s2 = inlined_call_operand.vmem [shape: f32[1,4], index: 2, kind: input, shape index: {}]   ;;  %s1064_s3 = inlined_call_operand.vmem [shape: f32[1,4], index: 3, kind: input, shape index: {}]   ;;  %s1065_s4 = inlined_call_operand.vmem [shape: bf16[4,32], index: 4, kind: input, shape index: {}]   ;;  %s1066_s5 = inlined_call_operand.vmem [shape: f32[1,32], index: 5, kind: input, shape index: {}]   ;;  %s1067_s6 = inlined_call_operand.vmem [shape: f32[1,32], index: 6, kind: input, shape index: {}]   ;;  %s1068_s7 = inlined_call_operand.vmem [shape: bf16[32,32], index: 7, kind: input, shape index: {}]   ;;  %s1069_s8 = inlined_call_operand.vmem [shape: bf16[128,32], index: 8, kind: output, shape index: {}]  }
   0x1 LB: > { %s806_s28 = sadd.s32 4294967295, %s941_s27   ;;  %p810_p0 = scmp.ge.s32.totalorder %s941_s27, 1  ;;  %s941_s27 = sphi %s988_s27, %s18_s27  }
   0x2   : > { %p263_p1 = scmp.lt.s32.totalorder %s941_s27, 3 }
   0x4   : > { %p264_p2 = pnand %p810_p0, %p263_p1 }
   0x5   : > { %v925_v0 = vld [vmem:[%s1062_s1] sm:$0xff] (!%p264_p2)   ;;  %s811_s9 = sshll.u32 (!%p264_p2), %s806_s28, 3  ;;  %v926_v1 = vld [vmem:[%s1062_s1 + $0x8] sm:$0xff] (!%p264_p2)   ;;  %v927_v2 = vld [vmem:[%s1062_s1 + $0x10] sm:$0xff] (!%p264_p2)   ;;  %vm377_vm0 = vcmask (!%p264_p2), 523264   ;;  %vm511_vm1 = vcmask (!%p264_p2), 1041408  }
   0x6   : > { %267 = sbr.rel (%p264_p2) target bundleno = 694 (0x2b6), region = 52  ;;  %p298_p3 = scmp.lt.s32.totalorder (!%p264_p2), %s811_s9, 15  ;;  %878 = vmatprep.subr.bf16.mxu0 (!%p264_p2), %v925_v0  ;;  %v928_v4 = vld [vmem:[%s1062_s1 + $0x18] sm:$0xff] (!%p264_p2)   ;;  %v490_v8 = vld [vmem:[%s1065_s4] sm:$0x3] (!%p264_p2)  ;;  %vm498_vm6 = vcmask (!%p264_p2), 31744  }
   0x7   : > { %879 = vmatpush3.bf16.msra.mxu0 (!%p264_p2), %v925_v0  ;;  %916 = vmatprep.subr.msk.bf16.mxu1 (!%p264_p2), %vm511_vm1, %v490_v8  ;;  %v513_v9 = vsel (!%p264_p2), %vm511_vm1, %v490_v8, 0  ;;  %v933_v10 = vld [vmem:[%s1068_s7] sm:$0xff] (!%p264_p2)   ;;  %v934_v49 = vld [vmem:[%s1068_s7 + $0x8] sm:$0xff] (!%p264_p2)   ;;  %vm631_vm15 = vcmask (!%p264_p2), 261120  }
   0x8   : > { %880 = vmatprep.subr.bf16.mxu0 (!%p264_p2), %v926_v1  ;;  %895 = vmatpush3.bf16.msra.mxu1 (!%p264_p2), %v513_v9  ;;  %v815_v11 = vld [vmem:[%s1063_s2] ss:$0 sm:$0xff] (!%p264_p2) }
   0x9   : > { %904 = vmatprep.subr.bf16.mxu1 (!%p264_p2), %v933_v10  ;;  %v828_v13 = vld [vmem:[%s1064_s3] ss:$0 sm:$0xff] (!%p264_p2) }
   0xa   : > { %v829_v50 = vld [vmem:[%s1066_s5] ss:$0 sm:$0xff] (!%p264_p2) }
   0xb   : > { %881 = vmatpush3.bf16.msra.mxu0 (!%p264_p2), %v926_v1  ;;  %v834_v52 = vld [vmem:[%s1067_s6] ss:$0 sm:$0xff] (!%p264_p2) }
   0xc   : > { %882 = vmatprep.subr.bf16.mxu0 (!%p264_p2), %v927_v2 }
   0xd   : > { %s1071_s9 = smov (!%p298_p3, %s811_s9), 15 }
   0xe   : > { %s812_s14 = sshll.u32 %s1071_s9, 2 }
   0xf   : > { %s301_s17 = scalar_lea.vmem %s1061_s0, %s812_s14  ;;  %883 = vmatpush3.bf16.msra.mxu0 %v927_v2 }
  0x10   : > { %v929_v3 = vld [vmem:[%s301_s17] sm:$0xff]   ;;  %884 = vmatprep.subr.bf16.mxu0 %v928_v4  ;;  %v930_v5 = vld [vmem:[%s301_s17 + $0x8] sm:$0xff]   ;;  %v931_v6 = vld [vmem:[%s301_s17 + $0x10] sm:$0xff]  }
  0x11   : > { %886 = vmatprep.mubr.msk.bf16.mxu0 %vm377_vm0, %v929_v3  ;;  %v932_v7 = vld [vmem:[%s301_s17 + $0x18] sm:$0xff]   ;;  %s307_s17 = scalar_lea.vmem %s1069_s8, %s812_s14 }
  0x13   : > { %885 = vmatpush3.bf16.msra.mxu0 %v928_v4 }
  0x16   : > { %887 = vmatmul.mubr.msk.bf16.vlgmr.msra.gmra.mrb[0].mxu0 %vm377_vm0, %v930_v5 }
  0x17   : > { %890 = vmatprep.mubr.msk.bf16.mxu0 %vm377_vm0, %v931_v6 }
  0x1e   : > { %891 = vmatmul.mubr.msk.bf16.gmra.mrb[4].mxu0 %vm377_vm0, %v932_v7 }
  0xe9   : > { %v888_v12 = vpop.f32.mrb[0].mxu0 }
  0xea   : > { %v433_v14 = vadd.f32 %v888_v12, %v815_v11  ;;  %v424_v15 = vpop.f32.mrb[1].mxu0 }
  0xeb   : > { %v425_v16 = vadd.f32 %v815_v11, %v424_v15  ;;  %v889_v17 = vpop.f32.mrb[2].mxu0 }
  0xec   : > { %v472_v18 = vmul.f32 %v828_v13, %v433_v14  ;;  %v436_v19 = vadd.f32 %v889_v17, %v815_v11  ;;  %v427_v20 = vpop.f32.mrb[3].mxu0  ;;  %vm457_vm2 = vcmp.ge.f32.partialorder %v433_v14, 0.0 }
  0xed   : > { %v470_v21 = vmul.f32 %v828_v13, %v425_v16  ;;  %v428_v22 = vadd.f32 %v815_v11, %v427_v20  ;;  %vm455_vm4 = vcmp.ge.f32.partialorder %v425_v16, 0.0 }
  0xee   : > { %vm458_vm3 = vcmp.ge.f32.partialorder %v436_v19, 0.0  ;;  %v473_v23 = vmul.f32 %v828_v13, %v436_v19  ;;  %v480_v25 = vsel %vm457_vm2, %v433_v14, %v472_v18 }
  0xef   : > { %v471_v24 = vmul.f32 %v828_v13, %v428_v22  ;;  %vm456_vm5 = vcmp.ge.f32.partialorder %v428_v22, 0.0  ;;  %v478_v29 = vsel %vm455_vm4, %v425_v16, %v470_v21  ;;  %vm741_vm4 = vcmask 257024  }
  0xf0   : > { %v481_v26 = vsel %vm458_vm3, %v436_v19, %v473_v23 }
  0xf1   : > { %v487_v27 = vpack.c.bf16 %v481_v26, %v480_v25  ;;  %v892_v28 = vpop.f32.mrb[4].mxu0  ;;  %v479_v30 = vsel %vm456_vm5, %v428_v22, %v471_v24 }
  0xf2   : > { %v449_v31 = vadd.f32 %v892_v28, %v815_v11  ;;  %v440_v32 = vpop.f32.mrb[5].mxu0  ;;  %v486_v33 = vpack.c.bf16 %v479_v30, %v478_v29 }
  0xf3   : > { %v441_v34 = vadd.f32 %v815_v11, %v440_v32  ;;  %v893_v35 = vpop.f32.mrb[6].mxu0 }
  0xf4   : > { %v476_v36 = vmul.f32 %v828_v13, %v449_v31  ;;  %v452_v37 = vadd.f32 %v893_v35, %v815_v11  ;;  %v443_v38 = vpop.f32.mrb[7].mxu0  ;;  %896 = vmatprep.mubr.msk.bf16.mxu1 %vm498_vm6, %v486_v33  ;;  %vm461_vm7 = vcmp.ge.f32.partialorder %v449_v31, 0.0 }
  0xf5   : > { %v474_v39 = vmul.f32 %v828_v13, %v441_v34  ;;  %v444_v40 = vadd.f32 %v815_v11, %v443_v38  ;;  %897 = vmatmul.mubr.msk.bf16.vlgmr.msra.gmra.mrb[0].mxu1 %vm498_vm6, %v487_v27  ;;  %vm459_vm8 = vcmp.ge.f32.partialorder %v441_v34, 0.0 }
  0xf6   : > { %vm462_vm9 = vcmp.ge.f32.partialorder %v452_v37, 0.0  ;;  %v477_v41 = vmul.f32 %v828_v13, %v452_v37  ;;  %905 = vmatpush3.bf16.msra.mxu1 %v933_v10  ;;  %v484_v43 = vsel %vm461_vm7, %v449_v31, %v476_v36 }
  0xf7   : > { %vm460_vm10 = vcmp.ge.f32.partialorder %v444_v40, 0.0  ;;  %v475_v42 = vmul.f32 %v828_v13, %v444_v40  ;;  %v482_v45 = vsel %vm459_vm8, %v441_v34, %v474_v39  ;;  %906 = vmatprep.subr.bf16.mxu1 %v934_v49 }
  0xf8   : > { %v485_v44 = vsel %vm462_vm9, %v452_v37, %v477_v41 }
  0xf9   : > { %v489_v46 = vpack.c.bf16 %v485_v44, %v484_v43  ;;  %v483_v47 = vsel %vm460_vm10, %v444_v40, %v475_v42 }
  0xfa   : > { %v488_v48 = vpack.c.bf16 %v483_v47, %v482_v45  ;;  %907 = vmatpush3.bf16.msra.mxu1 %v934_v49 }
  0xfc   : > { %900 = vmatprep.mubr.msk.bf16.mxu1 %vm498_vm6, %v488_v48 }
  0xfd   : > { %901 = vmatmul.mubr.msk.bf16.gmra.mrb[4].mxu1 %vm498_vm6, %v489_v46 }
 0x1c8   : > { %v898_v51 = vpop.f32.mrb[0].mxu1 }
 0x1c9   : > { %v558_v53 = vadd.f32 %v898_v51, %v829_v50  ;;  %v549_v54 = vpop.f32.mrb[1].mxu1 }
 0x1ca   : > { %v550_v55 = vadd.f32 %v829_v50, %v549_v54  ;;  %v899_v56 = vpop.f32.mrb[2].mxu1 }
 0x1cb   : > { %v597_v57 = vmul.f32 %v834_v52, %v558_v53  ;;  %v561_v58 = vadd.f32 %v899_v56, %v829_v50  ;;  %v552_v59 = vpop.f32.mrb[3].mxu1  ;;  %vm582_vm11 = vcmp.ge.f32.partialorder %v558_v53, 0.0 }
 0x1cc   : > { %v595_v60 = vmul.f32 %v834_v52, %v550_v55  ;;  %v553_v61 = vadd.f32 %v829_v50, %v552_v59  ;;  %vm580_vm12 = vcmp.ge.f32.partialorder %v550_v55, 0.0 }
 0x1cd   : > { %vm583_vm13 = vcmp.ge.f32.partialorder %v561_v58, 0.0  ;;  %v598_v62 = vmul.f32 %v834_v52, %v561_v58  ;;  %v605_v0 = vsel %vm582_vm11, %v558_v53, %v597_v57 }
 0x1ce   : > { %vm581_vm14 = vcmp.ge.f32.partialorder %v553_v61, 0.0  ;;  %v596_v63 = vmul.f32 %v834_v52, %v553_v61  ;;  %v603_v2 = vsel %vm580_vm12, %v550_v55, %v595_v60 }
 0x1cf   : > { %v606_v1 = vsel %vm583_vm13, %v561_v58, %v598_v62 }
 0x1d0   : > { %v612_v3 = vpack.c.bf16 %v606_v1, %v605_v0  ;;  %v604_v4 = vsel %vm581_vm14, %v553_v61, %v596_v63  ;;  %v902_v5 = vpop.f32.mrb[4].mxu1 }
 0x1d1   : > { %v611_v6 = vpack.c.bf16 %v604_v4, %v603_v2  ;;  %v574_v7 = vadd.f32 %v902_v5, %v829_v50  ;;  %v565_v8 = vpop.f32.mrb[5].mxu1 }
 0x1d2   : > { %v566_v9 = vadd.f32 %v829_v50, %v565_v8  ;;  %v903_v10 = vpop.f32.mrb[6].mxu1 }
 0x1d3   : > { %v601_v11 = vmul.f32 %v834_v52, %v574_v7  ;;  %v577_v12 = vadd.f32 %v903_v10, %v829_v50  ;;  %v568_v13 = vpop.f32.mrb[7].mxu1  ;;  %908 = vmatprep.mubr.msk.bf16.mxu1 %vm631_vm15, %v611_v6  ;;  %vm586_vm0 = vcmp.ge.f32.partialorder %v574_v7, 0.0 }
 0x1d4   : > { %v599_v14 = vmul.f32 %v834_v52, %v566_v9  ;;  %v569_v15 = vadd.f32 %v829_v50, %v568_v13  ;;  %909 = vmatmul.mubr.msk.bf16.vlgmr.msra.gmra.mrb[8].mxu1 %vm631_vm15, %v612_v3  ;;  %vm584_vm1 = vcmp.ge.f32.partialorder %v566_v9, 0.0 }
 0x1d5   : > { %vm587_vm2 = vcmp.ge.f32.partialorder %v577_v12, 0.0  ;;  %v602_v16 = vmul.f32 %v834_v52, %v577_v12  ;;  %v609_v18 = vsel %vm586_vm0, %v574_v7, %v601_v11 }
 0x1d6   : > { %vm585_vm3 = vcmp.ge.f32.partialorder %v569_v15, 0.0  ;;  %v600_v17 = vmul.f32 %v834_v52, %v569_v15  ;;  %v607_v20 = vsel %vm584_vm1, %v566_v9, %v599_v14 }
 0x1d7   : > { %v610_v19 = vsel %vm587_vm2, %v577_v12, %v602_v16 }
 0x1d8   : > { %v614_v21 = vpack.c.bf16 %v610_v19, %v609_v18  ;;  %v608_v22 = vsel %vm585_vm3, %v569_v15, %v600_v17 }
 0x1d9   : > { %v613_v23 = vpack.c.bf16 %v608_v22, %v607_v20 }
 0x1db   : > { %912 = vmatprep.mubr.msk.bf16.mxu1 %vm631_vm15, %v613_v23 }
 0x1dc   : > { %913 = vmatmul.mubr.msk.bf16.gmra.mrb[12].mxu1 %vm631_vm15, %v614_v21 }
 0x2a7   : > { %v910_v24 = vpop.f32.mrb[8].mxu1 }
 0x2a8   : > { %v853_v25 = vpack.c.bf16 %v910_v24, %v910_v24  ;;  %v678_v26 = vpop.f32.mrb[9].mxu1 }
 0x2a9   : > { %v851_v27 = vpack.c.bf16 %v678_v26, %v678_v26  ;;  %v911_v28 = vpop.f32.mrb[10].mxu1 }
 0x2aa   : > { %744 = vst.msk [vmem:[%s307_s17 + $0x8] sm:$0xf] %vm741_vm4, %v853_v25  ;;  %v854_v29 = vpack.c.bf16 %v911_v28, %v911_v28  ;;  %v681_v30 = vpop.f32.mrb[11].mxu1 }
 0x2ab   : > { %742 = vst.msk [vmem:[%s307_s17] sm:$0xf] %vm741_vm4, %v851_v27  ;;  %v852_v31 = vpack.c.bf16 %v681_v30, %v681_v30 }
 0x2ac   : > { %745 = vst.msk [vmem:[%s307_s17 + $0xc] sm:$0xf] %vm741_vm4, %v854_v29 }
 0x2ad   : > { %743 = vst.msk [vmem:[%s307_s17 + $0x4] sm:$0xf] %vm741_vm4, %v852_v31 }
 0x2af   : > { %v914_v32 = vpop.f32.mrb[12].mxu1 }
 0x2b0   : > { %v857_v33 = vpack.c.bf16 %v914_v32, %v914_v32  ;;  %v694_v34 = vpop.f32.mrb[13].mxu1 }
 0x2b1   : > { %v855_v35 = vpack.c.bf16 %v694_v34, %v694_v34  ;;  %v915_v36 = vpop.f32.mrb[14].mxu1 }
 0x2b2   : > { %748 = vst.msk [vmem:[%s307_s17 + $0x18] sm:$0xf] %vm741_vm4, %v857_v33  ;;  %v858_v37 = vpack.c.bf16 %v915_v36, %v915_v36  ;;  %v697_v38 = vpop.f32.mrb[15].mxu1 }
 0x2b3   : > { %746 = vst.msk [vmem:[%s307_s17 + $0x10] sm:$0xf] %vm741_vm4, %v855_v35  ;;  %v856_v39 = vpack.c.bf16 %v697_v38, %v697_v38 }
 0x2b4   : > { %749 = vst.msk [vmem:[%s307_s17 + $0x1c] sm:$0xf] %vm741_vm4, %v858_v37 }
 0x2b5   : > { %747 = vst.msk [vmem:[%s307_s17 + $0x14] sm:$0xf] %vm741_vm4, %v856_v39 }
 0x2b6 PF: > { %s18_s27 = sadd.s32 1, %s941_s27  }
 0x2b7   : > { %p15_p4 = scmp.ge.s32.totalorder %s18_s27, 4  }
 0x2b9   :  { %17 = sbr.rel (!%p15_p4) target bundleno = 1 (0x1), region = 82 }

// kernel: enet_stage5.5
= control target key start
LH: loop header
LB: loop body
LE: loop exit
PB: predicated region body
PF: predicated region fallthrough
CT: control target
= control target key end

     0   :  { %s2331_s13 = smov 0   ;;  %s2333_s14 = smov 0   ;;  %s2755_s0 = inlined_call_operand.vmem [shape: bf16[2,17,24,16], index: 0, kind: input, shape index: {}]   ;;  %s2756_s1 = inlined_call_operand.vmem [shape: bf16[16,8], index: 1, kind: input, shape index: {}]   ;;  %s2757_s2 = inlined_call_operand.vmem [shape: f32[1,8], index: 2, kind: input, shape index: {}]   ;;  %s2758_s3 = inlined_call_operand.vmem [shape: f32[1,8], index: 3, kind: input, shape index: {}]   ;;  %s2759_s4 = inlined_call_operand.vmem [shape: bf16[4,8,8], index: 4, kind: input, shape index: {}]   ;;  %s2760_s5 = inlined_call_operand.vmem [shape: f32[1,8], index: 5, kind: input, shape index: {}]   ;;  %s2761_s6 = inlined_call_operand.vmem [shape: f32[1,8], index: 6, kind: input, shape index: {}]   ;;  %s2762_s7 = inlined_call_operand.vmem [shape: bf16[8,16], index: 7, kind: input, shape index: {}]   ;;  %s2763_s8 = inlined_call_operand.vmem [shape: f32[1,16], index: 8, kind: input, shape index: {}]   ;;  %s2764_s9 = inlined_call_operand.vmem [shape: f32[1,16], index: 9, kind: input, shape index: {}]   ;;  %s2765_s10 = inlined_call_operand.vmem [shape: f32[2,16,16,16], index: 10, kind: output, shape index: {}]  }
   0x1   :  { %s2335_s15 = smov 0   ;;  %s2337_s16 = smov 0  }
   0x2   :  { %s2339_s17 = smov 0  }
   0x3 LB: > { %s29_s18 = sadd.s32 1, %s2265_s15  ;;  %s32_s19 = sadd.s32 1, %s2269_s16  ;;  %s2273_s17 = sphi %s2339_s17, %s20_s17   ;;  %s2269_s16 = sphi %s2337_s16, %s2769_s16   ;;  %s2265_s15 = sphi %s2335_s15, %s2768_s15   ;;  %s2261_s14 = sphi %s2333_s14, %s2767_s14   ;;  %s2257_s13 = sphi %s2331_s13, %s2766_s13  }
   0x4   : > { %p30_p0 = scmp.ge.s32.totalorder %s29_s18, 2  ;;  %p1852_p1 = scmp.ge.s32.totalorder %s2273_s17, 1 }
   0x5   : > { %p326_p2 = scmp.lt.s32.totalorder %s2273_s17, 5 }
   0x6   : > { %s2771_s18 = smov (%p30_p0, %s29_s18), 0  ;;  %s2773_s19 = smov (!%p30_p0, %s32_s19), %s2269_s16 }
   0x7   : > { %p327_p3 = pnand %p1852_p1, %p326_p2  ;;  %p34_p4 = scmp.ge.s32.totalorder %s2773_s19, 2 }
   0x8   : > { %v2220_v0 = vld [vmem:[%s2756_s1] sm:$0xff] (!%p327_p3)   ;;  %p369_p5 = scmp.lt.s32.totalorder (!%p327_p3), %s2261_s14, 1  ;;  %s1941_s22 = smul.u32 (!%p327_p3), 96, %s2257_s13  ;;  %vm500_vm0 = vcmask (!%p327_p3), 130048   ;;  %vm997_vm1 = vcmask (!%p327_p3), 1043456   ;;  %v2275_v51 = vmov (!%p327_p3), 0  }
   0x9   : > { %s2775_s19 = smov (%p34_p4, %s2773_s19), 0  ;;  %330 = sbr.rel (%p327_p3) target bundleno = 835 (0x343), region = 60 }
   0xa   : > { %2002 = vmatprep.subr.bf16.mxu0 (!%p327_p3), %v2220_v0  ;;  %v1892_v15 = vld [vmem:[%s2759_s4 + $0x4] sm:$0xf] (!%p327_p3)  ;;  %v2396_v17 = vld [vmem:[%s2759_s4] sm:$0xf] (!%p327_p3)  ;;  %s2401_s12 = sshll.u32 (!%p327_p3), %s2257_s13, 3  ;;  %v2434_v52 = vrot.slane (!%p327_p3), %v2275_v51, 1 }
   0xb   : > { %2003 = vmatpush3.bf16.msra.mxu0 (!%p327_p3), %v2220_v0  ;;  %v999_v16 = vsel (!%p327_p3), %vm997_vm1, %v1892_v15, 0  ;;  %2173 = vmatprep.subr.msk.bf16.mxu1 (!%p327_p3), %vm997_vm1, %v1892_v15  ;;  %v2406_v18 = vld [vmem:[%s2757_s2] ss:$0 sm:$0xff] (!%p327_p3)  ;;  %v2415_v23 = vstv (!%p327_p3), %s2401_s12  ;;  %vm873_vm11 = vsmask.f32 (!%p327_p3), 7424  ;;  %vm972_vm12 = vcmask (!%p327_p3), 64512  }
   0xc   : > { %2172 = vmatprep.subr.msk.bf16.mxu0 (!%p327_p3), %vm997_vm1, %v1892_v15  ;;  %2123 = vmatpush3.bf16.msra.mxu1 (!%p327_p3), %v999_v16  ;;  %v2411_v21 = vld [vmem:[%s2758_s3] ss:$0 sm:$0xff] (!%p327_p3)  ;;  %v776_v29 = vadd.s32 (!%p327_p3), 1, %v2415_v23  ;;  %vm788_vm3 = vcmp.lt.s32.totalorder (!%p327_p3), %v2415_v23, 16  ;;  %v777_v32 = vadd.s32 (!%p327_p3), 2, %v2415_v23  ;;  %p377_p6 = scmp.lt.s32.totalorder (!%p327_p3), %s2401_s12, 15 }
   0xd   : > { %2174 = vmatprep.subr.msk.bf16.mxu1 (!%p327_p3), %vm997_vm1, %v2396_v17 }
   0xe   : > { %vm789_vm6 = vcmp.lt.s32.totalorder (!%p327_p3), %v776_v29, 16  ;;  %vm790_vm8 = vcmp.lt.s32.totalorder (!%p327_p3), %v777_v32, 16  ;;  %v779_v32 = vadd.s32 (!%p327_p3), 4, %v2415_v23 }
  0x10   : > { %s2777_s14 = smov (!%p369_p5, %s2261_s14), 1  ;;  %s2779_s12 = smov (!%p377_p6, %s2401_s12), 15 }
  0x11   : > { %s2178_s23 = smul.u32 204, %s2777_s14  ;;  %s1855_s21 = sshll.u32 %s2779_s12, 1 }
  0x13   : > { %s373_s26 = scalar_lea.vmem %s2755_s0, %s2178_s23 }
  0x14   : > { %s389_s27 = scalar_lea.vmem %s373_s26, %s1941_s22  ;;  %s1856_s22 = sshll.u32 %s2777_s14, 5 }
  0x15   : > { %v2221_v1 = vld [vmem:[%s389_s27] sm:$0xff]   ;;  %v2222_v2 = vld [vmem:[%s389_s27 + $0x8] sm:$0xff]   ;;  %v2223_v3 = vld [vmem:[%s389_s27 + $0x10] sm:$0xff]   ;;  %s381_s23 = sadd.s32 %s1856_s22, %s1855_s21 }
  0x16   : > { %2004 = vmatprep.mubr.msk.bf16.mxu0 %vm500_vm0, %v2221_v1  ;;  %v2224_v4 = vld [vmem:[%s389_s27 + $0x18] sm:$0xff]   ;;  %v2225_v5 = vld [vmem:[%s389_s27 + $0x20] sm:$0xff]   ;;  %v2226_v6 = vld [vmem:[%s389_s27 + $0x28] sm:$0xff]   ;;  %s1857_s25 = sshll.u32 %s381_s23, 3 }
  0x17   : > { %2005 = vmatmul.mubr.msk.bf16.vlgmr.msra.gmra.mrb[0].mxu0 %vm500_vm0, %v2222_v2  ;;  %v2227_v7 = vld [vmem:[%s389_s27 + $0x30] sm:$0xff]   ;;  %v2228_v8 = vld [vmem:[%s389_s27 + $0x38] sm:$0xff]   ;;  %v2229_v9 = vld [vmem:[%s389_s27 + $0x40] sm:$0xff]   ;;  %v778_v2 = vadd.s32 3, %v2415_v23  ;;  %s2676_s28 = scalar_lea.vmem %s2765_s10, %s1857_s25 }
  0x18   : > { %2008 = vmatprep.mubr.msk.bf16.mxu0 %vm500_vm0, %v2223_v3  ;;  %v2230_v10 = vld [vmem:[%s389_s27 + $0x48] sm:$0xff]   ;;  %v2231_v11 = vld [vmem:[%s389_s27 + $0x50] sm:$0xff]   ;;  %v2232_v12 = vld [vmem:[%s389_s27 + $0x58] sm:$0xff]   ;;  %2033 = vmatpush3.bf16.msra.mxu0 %v999_v16 }
  0x19   : > { %v2233_v13 = vld [vmem:[%s389_s27 + $0x60] sm:$0xff]   ;;  %v2234_v14 = vld [vmem:[%s389_s27 + $0x68] ss:$0 sps:$4 sm:$0xff]   ;;  %vm791_vm14 = vcmp.lt.s32.totalorder %v778_v2, 16 }
  0x1f   : > { %2009 = vmatmul.mubr.msk.bf16.gmra.mrb[4].mxu0 %vm500_vm0, %v2224_v4 }
  0x20   : > { %2012 = vmatprep.mubr.msk.bf16.mxu0 %vm500_vm0, %v2225_v5 }
  0x27   : > { %2013 = vmatmul.mubr.msk.bf16.gmra.mrb[8].mxu0 %vm500_vm0, %v2226_v6 }
  0x28   : > { %2016 = vmatprep.mubr.msk.bf16.mxu0 %vm500_vm0, %v2227_v7 }
  0x2f   : > { %2017 = vmatmul.mubr.msk.bf16.gmra.mrb[12].mxu0 %vm500_vm0, %v2228_v8 }
  0x30   : > { %2020 = vmatprep.mubr.msk.bf16.mxu0 %vm500_vm0, %v2229_v9 }
  0x37   : > { %2021 = vmatmul.mubr.msk.bf16.gmra.mrb[16].mxu0 %vm500_vm0, %v2230_v10 }
  0x38   : > { %2024 = vmatprep.mubr.msk.bf16.mxu0 %vm500_vm0, %v2231_v11 }
  0x3f   : > { %2025 = vmatmul.mubr.msk.bf16.gmra.mrb[20].mxu0 %vm500_vm0, %v2232_v12 }
  0x40   : > { %2028 = vmatprep.mubr.msk.bf16.mxu0 %vm500_vm0, %v2233_v13 }
  0x47   : > { %2029 = vmatmul.mubr.msk.bf16.gmra.mrb[24].mxu0 %vm500_vm0, %v2234_v14 }
  0xea   : > { %v2006_v19 = vpop.f32.mrb[0].mxu0 }
  0xeb   : > { %v577_v20 = vpop.f32.mrb[1].mxu0 }
  0xec   : > { %v578_v22 = vadd.f32 %v2406_v18, %v577_v20  ;;  %v2007_v24 = vpop.f32.mrb[2].mxu0 }
  0xed   : > { %v580_v25 = vpop.f32.mrb[3].mxu0  ;;  %v589_v27 = vadd.f32 %v2007_v24, %v2406_v18 }
  0xee   : > { %vm687_vm2 = vcmp.ge.f32.partialorder %v578_v22, 0.0  ;;  %v721_v26 = vmul.f32 %v2411_v21, %v578_v22  ;;  %v581_v28 = vadd.f32 %v2406_v18, %v580_v25 }
  0xef   : > { %v724_v33 = vmul.f32 %v2411_v21, %v589_v27  ;;  %vm690_vm5 = vcmp.ge.f32.partialorder %v589_v27, 0.0 }
  0xf0   : > { %v748_v30 = vsel %vm687_vm2, %v578_v22, %v721_v26  ;;  %vm688_vm4 = vcmp.ge.f32.partialorder %v581_v28, 0.0  ;;  %v722_v31 = vmul.f32 %v2411_v21, %v581_v28 }
  0xf1   : > { %v827_v36 = vsel %vm788_vm3, %v748_v30, 0.0  ;;  %v751_v46 = vsel %vm690_vm5, %v589_v27, %v724_v33 }
  0xf2   : > { %v749_v34 = vsel %vm688_vm4, %v581_v28, %v722_v31  ;;  %v2010_v35 = vpop.f32.mrb[4].mxu0  ;;  %v830_v56 = vsel %vm789_vm6, %v751_v46, 0.0 }
  0xf3   : > { %v828_v37 = vsel %vm788_vm3, %v749_v34, 0.0  ;;  %v602_v38 = vadd.f32 %v2010_v35, %v2406_v18  ;;  %v593_v39 = vpop.f32.mrb[5].mxu0  ;;  %vm792_vm3 = vcmp.lt.s32.totalorder %v779_v32, 16 }
  0xf4   : > { %v2426_v40 = vpack.c.bf16 %v828_v37, %v827_v36  ;;  %v594_v41 = vadd.f32 %v2406_v18, %v593_v39  ;;  %v2011_v42 = vpop.f32.mrb[6].mxu0 }
  0xf5   : > { %vm693_vm7 = vcmp.ge.f32.partialorder %v602_v38, 0.0  ;;  %v727_v43 = vmul.f32 %v2411_v21, %v602_v38  ;;  %v605_v44 = vadd.f32 %v2011_v42, %v2406_v18  ;;  %v596_v45 = vpop.f32.mrb[7].mxu0 }
  0xf6   : > { %vm691_vm9 = vcmp.ge.f32.partialorder %v594_v41, 0.0  ;;  %v725_v47 = vmul.f32 %v2411_v21, %v594_v41  ;;  %v877_v48 = vshll.u32 %v2426_v40, 16  ;;  %v875_v54 = vshrl.u32 %v2426_v40, 16 }
  0xf7   : > { %v754_v49 = vsel %vm693_vm7, %v602_v38, %v727_v43  ;;  %vm694_vm10 = vcmp.ge.f32.partialorder %v605_v44, 0.0  ;;  %v728_v50 = vmul.f32 %v2411_v21, %v605_v44  ;;  %v780_v38 = vadd.s32 5, %v2415_v23 }
  0xf8   : > { %v752_v53 = vsel %vm691_vm9, %v594_v41, %v725_v47  ;;  %v879_v55 = vrot.slane %v877_v48, 1  ;;  %v833_v59 = vsel %vm790_vm8, %v754_v49, 0.0  ;;  %v781_v48 = vadd.s32 6, %v2415_v23 }
  0xf9   : > { %v831_v57 = vsel %vm789_vm6, %v752_v53, 0.0  ;;  %v755_v58 = vsel %vm694_vm10, %v605_v44, %v728_v50  ;;  %vm793_vm6 = vcmp.lt.s32.totalorder %v780_v38, 16 }
  0xfa   : > { %v2440_v60 = vpack.c.bf16 %v831_v57, %v830_v56  ;;  %v834_v61 = vsel %vm790_vm8, %v755_v58, 0.0  ;;  %v2014_v62 = vpop.f32.mrb[8].mxu0  ;;  %v880_v63 = vor.u32 %v879_v55, %v875_v54  ;;  %vm794_vm9 = vcmp.lt.s32.totalorder %v781_v48, 16 }
  0xfb   : > { %v2443_v0 = vpack.c.bf16 %v834_v61, %v833_v59  ;;  %v618_v1 = vadd.f32 %v2014_v62, %v2406_v18  ;;  %v609_v3 = vpop.f32.mrb[9].mxu0 }
  0xfc   : > { %v889_v4 = vshll.u32 %v2440_v60, 16  ;;  %v2015_v5 = vpop.f32.mrb[10].mxu0  ;;  %v885_v6 = vsel %vm873_vm11, %v880_v63, %v2434_v52  ;;  %v887_v11 = vshrl.u32 %v2440_v60, 16 }
  0xfd   : > { %vm697_vm13 = vcmp.ge.f32.partialorder %v618_v1, 0.0  ;;  %v731_v7 = vmul.f32 %v2411_v21, %v618_v1  ;;  %v612_v8 = vpop.f32.mrb[11].mxu0  ;;  %2034 = vmatprep.mubr.msk.bf16.mxu0 %vm972_vm12, %v885_v6  ;;  %v901_v9 = vshll.u32 %v2443_v0, 16  ;;  %v899_v13 = vshrl.u32 %v2443_v0, 16 }
  0xfe   : > { %v613_v10 = vadd.f32 %v2406_v18, %v612_v8  ;;  %v891_v12 = vrot.slane %v889_v4, 1 }
  0xff   : > { %v903_v14 = vrot.slane %v901_v9, 1  ;;  %v758_v15 = vsel %vm697_vm13, %v618_v1, %v731_v7 }
 0x100   : > { %vm696_vm15 = vcmp.ge.f32.partialorder %v613_v10, 0.0  ;;  %v730_v16 = vmul.f32 %v2411_v21, %v613_v10  ;;  %v892_v19 = vor.u32 %v891_v12, %v887_v11  ;;  %v837_v26 = vsel %vm791_vm14, %v758_v15, 0.0 }
 0x101   : > { %v904_v20 = vor.u32 %v903_v14, %v899_v13 }
 0x102   : > { %v757_v22 = vsel %vm696_vm15, %v613_v10, %v730_v16  ;;  %v2018_v24 = vpop.f32.mrb[12].mxu0  ;;  %v2459_v25 = vsel %vm873_vm11, %v892_v19, %v2434_v52 }
 0x103   : > { %v836_v27 = vsel %vm791_vm14, %v757_v22, 0.0  ;;  %v625_v28 = vpop.f32.mrb[13].mxu0  ;;  %2035 = vmatmul.mubr.msk.bf16.vlgmr.msra.gmra.mrb[28].mxu0 %vm972_vm12, %v2459_v25  ;;  %v2465_v29 = vsel %vm873_vm11, %v904_v20, %v2434_v52  ;;  %v782_v20 = vadd.s32 7, %v2415_v23 }
 0x104   : > { %v2467_v30 = vpack.c.bf16 %v837_v26, %v836_v27  ;;  %v626_v31 = vadd.f32 %v2406_v18, %v625_v28  ;;  %v2019_v33 = vpop.f32.mrb[14].mxu0  ;;  %2038 = vmatprep.mubr.msk.bf16.mxu0 %vm972_vm12, %v2465_v29 }
 0x105   : > { %v628_v34 = vpop.f32.mrb[15].mxu0  ;;  %v637_v36 = vadd.f32 %v2019_v33, %v2406_v18  ;;  %vm795_vm14 = vcmp.lt.s32.totalorder %v782_v20, 16 }
 0x106   : > { %vm699_vm2 = vcmp.ge.f32.partialorder %v626_v31, 0.0  ;;  %v733_v35 = vmul.f32 %v2411_v21, %v626_v31  ;;  %v629_v37 = vadd.f32 %v2406_v18, %v628_v34  ;;  %v913_v39 = vshll.u32 %v2467_v30, 16 }
 0x107   : > { %v911_v43 = vshrl.u32 %v2467_v30, 16  ;;  %vm702_vm5 = vcmp.ge.f32.partialorder %v637_v36, 0.0  ;;  %v736_v45 = vmul.f32 %v2411_v21, %v637_v36 }
 0x108   : > { %v760_v41 = vsel %vm699_vm2, %v626_v31, %v733_v35  ;;  %vm700_vm4 = vcmp.ge.f32.partialorder %v629_v37, 0.0  ;;  %v734_v42 = vmul.f32 %v2411_v21, %v629_v37  ;;  %v915_v44 = vrot.slane %v913_v39, 1 }
 0x109   : > { %v839_v49 = vsel %vm792_vm3, %v760_v41, 0.0  ;;  %v763_v63 = vsel %vm702_vm5, %v637_v36, %v736_v45 }
 0x10a   : > { %v761_v46 = vsel %vm700_vm4, %v629_v37, %v734_v42  ;;  %v2022_v47 = vpop.f32.mrb[16].mxu0  ;;  %v916_v54 = vor.u32 %v915_v44, %v911_v43  ;;  %v842_v8 = vsel %vm793_vm6, %v763_v63, 0.0 }
 0x10b   : > { %v840_v50 = vsel %vm792_vm3, %v761_v46, 0.0  ;;  %v650_v51 = vadd.f32 %v2022_v47, %v2406_v18  ;;  %v641_v53 = vpop.f32.mrb[17].mxu0 }
 0x10c   : > { %v2483_v55 = vpack.c.bf16 %v840_v50, %v839_v49  ;;  %v642_v56 = vadd.f32 %v2406_v18, %v641_v53  ;;  %v2023_v57 = vpop.f32.mrb[18].mxu0  ;;  %v2490_v62 = vsel %vm873_vm11, %v916_v54, %v2434_v52  ;;  %v783_v50 = vadd.s32 8, %v2415_v23 }
 0x10d   : > { %vm705_vm7 = vcmp.ge.f32.partialorder %v650_v51, 0.0  ;;  %v739_v58 = vmul.f32 %v2411_v21, %v650_v51  ;;  %v653_v59 = vadd.f32 %v2023_v57, %v2406_v18  ;;  %v644_v61 = vpop.f32.mrb[19].mxu0  ;;  %2039 = vmatmul.mubr.msk.bf16.gmra.mrb[32].mxu0 %vm972_vm12, %v2490_v62 }
 0x10e   : > { %vm703_vm8 = vcmp.ge.f32.partialorder %v642_v56, 0.0  ;;  %v737_v1 = vmul.f32 %v2411_v21, %v642_v56  ;;  %v925_v2 = vshll.u32 %v2483_v55, 16  ;;  %v923_v6 = vshrl.u32 %v2483_v55, 16 }
 0x10f   : > { %v766_v3 = vsel %vm705_vm7, %v650_v51, %v739_v58  ;;  %vm706_vm10 = vcmp.ge.f32.partialorder %v653_v59, 0.0  ;;  %v740_v4 = vmul.f32 %v2411_v21, %v653_v59  ;;  %vm796_vm3 = vcmp.lt.s32.totalorder %v783_v50, 16 }
 0x110   : > { %v764_v5 = vsel %vm703_vm8, %v642_v56, %v737_v1  ;;  %v927_v7 = vrot.slane %v925_v2, 1  ;;  %v845_v11 = vsel %vm794_vm9, %v766_v3, 0.0 }
 0x111   : > { %v843_v9 = vsel %vm793_vm6, %v764_v5, 0.0  ;;  %v767_v10 = vsel %vm706_vm10, %v653_v59, %v740_v4  ;;  %v1115_v4 = vsel %vm997_vm1, %v2396_v17, 0 }
 0x112   : > { %v2501_v12 = vpack.c.bf16 %v843_v9, %v842_v8  ;;  %v846_v13 = vsel %vm794_vm9, %v767_v10, 0.0  ;;  %v2026_v14 = vpop.f32.mrb[20].mxu0  ;;  %v928_v15 = vor.u32 %v927_v7, %v923_v6  ;;  %v1909_v7 = vld [vmem:[%s2759_s4 + $0x8] sm:$0xf] }
 0x113   : > { %v2503_v16 = vpack.c.bf16 %v846_v13, %v845_v11  ;;  %v666_v19 = vadd.f32 %v2026_v14, %v2406_v18  ;;  %v657_v22 = vpop.f32.mrb[21].mxu0  ;;  %v1220_v10 = vsel %vm997_vm1, %v1909_v7, 0  ;;  %v1918_v13 = vld [vmem:[%s2759_s4 + $0xc] sm:$0xf] }
 0x114   : > { %v2027_v24 = vpop.f32.mrb[22].mxu0  ;;  %v2509_v26 = vsel %vm873_vm11, %v928_v15, %v2434_v52  ;;  %v937_v27 = vshll.u32 %v2501_v12, 16  ;;  %v935_v34 = vshrl.u32 %v2501_v12, 16 }
 0x115   : > { %vm709_vm13 = vcmp.ge.f32.partialorder %v666_v19, 0.0  ;;  %v743_v28 = vmul.f32 %v2411_v21, %v666_v19  ;;  %v660_v31 = vpop.f32.mrb[23].mxu0  ;;  %2042 = vmatprep.mubr.msk.bf16.mxu0 %vm972_vm12, %v2509_v26  ;;  %v949_v32 = vshll.u32 %v2503_v16, 16  ;;  %v947_v36 = vshrl.u32 %v2503_v16, 16 }
 0x116   : > { %v661_v33 = vadd.f32 %v2406_v18, %v660_v31  ;;  %v939_v35 = vrot.slane %v937_v27, 1  ;;  %v2614_v31 = vld [vmem:[%s2761_s6] ss:$0 sm:$0xff] }
 0x117   : > { %v951_v37 = vrot.slane %v949_v32, 1  ;;  %v770_v38 = vsel %vm709_vm13, %v666_v19, %v743_v28 }
 0x118   : > { %vm708_vm15 = vcmp.ge.f32.partialorder %v661_v33, 0.0  ;;  %v742_v39 = vmul.f32 %v2411_v21, %v661_v33  ;;  %v940_v41 = vor.u32 %v939_v35, %v935_v34  ;;  %v849_v46 = vsel %vm795_vm14, %v770_v38, 0.0 }
 0x119   : > { %v952_v42 = vor.u32 %v951_v37, %v947_v36 }
 0x11a   : > { %v769_v43 = vsel %vm708_vm15, %v661_v33, %v742_v39  ;;  %v2522_v44 = vsel %vm873_vm11, %v940_v41, %v2434_v52  ;;  %v2030_v45 = vpop.f32.mrb[24].mxu0 }
 0x11b   : > { %v848_v47 = vsel %vm795_vm14, %v769_v43, 0.0  ;;  %2043 = vmatmul.mubr.msk.bf16.gmra.mrb[36].mxu0 %vm972_vm12, %v2522_v44  ;;  %v2528_v48 = vsel %vm873_vm11, %v952_v42, %v2434_v52  ;;  %v673_v49 = vpop.f32.mrb[25].mxu0 }
 0x11c   : > { %v868_v51 = vpack.c.bf16 %v849_v46, %v848_v47  ;;  %2046 = vmatprep.mubr.msk.bf16.mxu1 %vm972_vm12, %v2528_v48  ;;  %v674_v53 = vadd.f32 %v2406_v18, %v673_v49  ;;  %v2031_v54 = vpop.f32.mrb[26].mxu0 }
 0x11d   : > { %v676_v56 = vpop.f32.mrb[27].mxu0 }
 0x11e   : > { %v961_v57 = vshll.u32 %v868_v51, 16  ;;  %vm711_vm2 = vcmp.ge.f32.partialorder %v674_v53, 0.0  ;;  %v745_v58 = vmul.f32 %v2411_v21, %v674_v53  ;;  %v677_v59 = vadd.f32 %v2406_v18, %v676_v56 }
 0x11f   : > { %v959_v61 = vshrl.u32 %v868_v51, 16 }
 0x120   : > { %v963_v63 = vrot.slane %v961_v57, 1  ;;  %v772_v1 = vsel %vm711_vm2, %v674_v53, %v745_v58  ;;  %vm712_vm4 = vcmp.ge.f32.partialorder %v677_v59, 0.0  ;;  %v746_v23 = vmul.f32 %v2411_v21, %v677_v59 }
 0x121   : > { %v851_v3 = vsel %vm796_vm3, %v772_v1, 0.0 }
 0x122   : > { %v964_v2 = vor.u32 %v963_v63, %v959_v61  ;;  %v773_v5 = vsel %vm712_vm4, %v677_v59, %v746_v23 }
 0x123   : > { %v852_v18 = vsel %vm796_vm3, %v773_v5, 0.0 }
 0x124   : > { %v969_v6 = vsel %vm873_vm11, %v964_v2, %v2434_v52  ;;  %v870_v8 = vpack.c.bf16 %v852_v18, %v851_v3 }
 0x125   : > { %2047 = vmatmul.mubr.msk.bf16.vlgmr.msra.gmra.mrb[0].mxu1 %vm972_vm12, %v969_v6 }
 0x126   : > { %2051 = vmatpush3.bf16.msra.mxu1 %v1115_v4  ;;  %2052 = vmatprep.mubr.msk.bf16.mxu1 %vm972_vm12, %v2426_v40  ;;  %v1335_v21 = vshrl.u32 %v870_v8, 16  ;;  %v1337_v17 = vshll.u32 %v870_v8, 16  ;;  %v1352_v40 = vsel %vm997_vm1, %v1918_v13, 0 }
 0x127   : > { %2175 = vmatprep.subr.msk.bf16.mxu1 %vm997_vm1, %v1909_v7 }
 0x128   : > { %v1339_v9 = vrot.slane %v1337_v17, 1 }
 0x12a   : > { %v1340_v11 = vor.u32 %v1339_v9, %v1335_v21 }
 0x12c   : > { %v1345_v14 = vsel %vm873_vm11, %v1340_v11, %v2434_v52  ;;  %v1553_v52 = vld [vmem:[%s2762_s7] sm:$0xf] }
 0x12d   : > { %2053 = vmatmul.mubr.msk.bf16.vlgmr.msra.gmra.mrb[4].mxu1 %vm972_vm12, %v2440_v60  ;;  %2177 = vmatprep.subr.msk.bf16.mxu0 %vm997_vm1, %v1553_v52 }
 0x12e   : > { %2069 = vmatpush3.bf16.msra.mxu1 %v1220_v10  ;;  %2056 = vmatprep.mubr.msk.bf16.mxu1 %vm972_vm12, %v2443_v0 }
 0x12f   : > { %2176 = vmatprep.subr.msk.bf16.mxu1 %vm997_vm1, %v1918_v13 }
 0x135   : > { %2057 = vmatmul.mubr.msk.bf16.gmra.mrb[8].mxu1 %vm972_vm12, %v2467_v30 }
 0x136   : > { %2060 = vmatprep.mubr.msk.bf16.mxu1 %vm972_vm12, %v2483_v55 }
 0x13d   : > { %2061 = vmatmul.mubr.msk.bf16.gmra.mrb[12].mxu1 %vm972_vm12, %v2501_v12 }
 0x13e   : > { %2064 = vmatprep.mubr.msk.bf16.mxu1 %vm972_vm12, %v2503_v16 }
 0x145   : > { %2065 = vmatmul.mubr.msk.bf16.gmra.mrb[0].mxu1 %vm972_vm12, %v868_v51 }
 0x146   : > { %2070 = vmatprep.mubr.msk.bf16.mxu1 %vm972_vm12, %v2440_v60  ;;  %v1586_v60 = vsel %vm997_vm1, %v1553_v52, 0 }
 0x147   : > { %2105 = vmatpush3.bf16.msra.mxu0 %v1586_v60 }
 0x14d   : > { %2071 = vmatmul.mubr.msk.bf16.vlgmr.msra.gmra.mrb[4].mxu1 %vm972_vm12, %v2443_v0 }
 0x14e   : > { %2087 = vmatpush3.bf16.msra.mxu1 %v1352_v40  ;;  %2074 = vmatprep.mubr.msk.bf16.mxu1 %vm972_vm12, %v2467_v30 }
 0x155   : > { %2075 = vmatmul.mubr.msk.bf16.gmra.mrb[8].mxu1 %vm972_vm12, %v2483_v55 }
 0x156   : > { %2078 = vmatprep.mubr.msk.bf16.mxu1 %vm972_vm12, %v2501_v12 }
 0x15d   : > { %2079 = vmatmul.mubr.msk.bf16.gmra.mrb[12].mxu1 %vm972_vm12, %v2503_v16 }
 0x15e   : > { %2082 = vmatprep.mubr.msk.bf16.mxu1 %vm972_vm12, %v868_v51 }
 0x165   : > { %2083 = vmatmul.mubr.msk.bf16.gmra.mrb[0].mxu1 %vm972_vm12, %v870_v8 }
 0x166   : > { %2088 = vmatprep.mubr.msk.bf16.mxu1 %vm972_vm12, %v2459_v25 }
 0x16d   : > { %2089 = vmatmul.mubr.msk.bf16.vlgmr.msra.gmra.mrb[4].mxu1 %vm972_vm12, %v2465_v29 }
 0x16e   : > { %2092 = vmatprep.mubr.msk.bf16.mxu1 %vm972_vm12, %v2490_v62 }
 0x175   : > { %2093 = vmatmul.mubr.msk.bf16.gmra.mrb[8].mxu1 %vm972_vm12, %v2509_v26  ;;  %v2609_v26 = vld [vmem:[%s2760_s5] ss:$0 sm:$0xff] }
 0x176   : > { %2096 = vmatprep.mubr.msk.bf16.mxu1 %vm972_vm12, %v2522_v44 }
 0x17d   : > { %2097 = vmatmul.mubr.msk.bf16.gmra.mrb[12].mxu1 %vm972_vm12, %v2528_v48 }
 0x17e   : > { %2100 = vmatprep.mubr.msk.bf16.mxu1 %vm972_vm12, %v969_v6 }
 0x185   : > { %2101 = vmatmul.mubr.msk.bf16.gmra.mrb[0].mxu1 %vm972_vm12, %v1345_v14 }
 0x1d6   : > { %v2036_v0 = vpop.f32.mrb[28].mxu0 }
 0x1d7   : > { %v1035_v25 = vpop.f32.mrb[29].mxu0 }
 0x1d8   : > { %v2037_v29 = vpop.f32.mrb[30].mxu0 }
 0x1d9   : > { %v1038_v30 = vpop.f32.mrb[31].mxu0 }
 0x1e0   : > { %v2040_v55 = vpop.f32.mrb[32].mxu0 }
 0x1e1   : > { %v1051_v62 = vpop.f32.mrb[33].mxu0 }
 0x1e2   : > { %v2041_v12 = vpop.f32.mrb[34].mxu0 }
 0x1e3   : > { %v1054_v15 = vpop.f32.mrb[35].mxu0 }
 0x1ee   : > { %v2044_v16 = vpop.f32.mrb[36].mxu0 }
 0x1ef   : > { %v1067_v19 = vpop.f32.mrb[37].mxu0 }
 0x1f0   : > { %v2602_v20 = vpop.f32.mrb[38].mxu0 }
 0x1f1   : > { %v2604_v22 = vpop.f32.mrb[39].mxu0 }
 0x240   : > { %v2090_v24 = vpop.f32.mrb[4].mxu1 }
 0x241   : > { %v2124_v27 = vadd.f32 %v2090_v24, %v2036_v0  ;;  %v1388_v28 = vpop.f32.mrb[5].mxu1 }
 0x242   : > { %v2125_v32 = vadd.f32 %v1388_v28, %v1035_v25  ;;  %v2091_v33 = vpop.f32.mrb[6].mxu1 }
 0x243   : > { %v1476_v34 = vadd.f32 %v2124_v27, %v2609_v26  ;;  %v2126_v35 = vadd.f32 %v2091_v33, %v2037_v29  ;;  %v1391_v36 = vpop.f32.mrb[7].mxu1 }
 0x244   : > { %v1474_v37 = vadd.f32 %v2125_v32, %v2609_v26  ;;  %v2127_v38 = vadd.f32 %v1391_v36, %v1038_v30 }
 0x245   : > { %v1515_v39 = vmul.f32 %v2614_v31, %v1476_v34  ;;  %v1477_v41 = vadd.f32 %v2126_v35, %v2609_v26  ;;  %vm1492_vm1 = vcmp.ge.f32.partialorder %v1476_v34, 0.0 }
 0x246   : > { %v1513_v42 = vmul.f32 %v2614_v31, %v1474_v37  ;;  %v1475_v43 = vadd.f32 %v2127_v38, %v2609_v26  ;;  %vm1490_vm11 = vcmp.ge.f32.partialorder %v1474_v37, 0.0 }
 0x247   : > { %vm1493_vm5 = vcmp.ge.f32.partialorder %v1477_v41, 0.0  ;;  %v1516_v44 = vmul.f32 %v2614_v31, %v1477_v41  ;;  %v1531_v47 = vsel %vm1492_vm1, %v1476_v34, %v1515_v39 }
 0x248   : > { %vm1491_vm6 = vcmp.ge.f32.partialorder %v1475_v43, 0.0  ;;  %v1514_v45 = vmul.f32 %v2614_v31, %v1475_v43  ;;  %v2094_v46 = vpop.f32.mrb[8].mxu1  ;;  %v1529_v51 = vsel %vm1490_vm11, %v1474_v37, %v1513_v42 }
 0x249   : > { %v1532_v48 = vsel %vm1493_vm5, %v1477_v41, %v1516_v44  ;;  %v2128_v49 = vadd.f32 %v2094_v46, %v2040_v55  ;;  %v1404_v50 = vpop.f32.mrb[9].mxu1 }
 0x24a   : > { %v1546_v53 = vpack.c.bf16 %v1532_v48, %v1531_v47  ;;  %v1530_v54 = vsel %vm1491_vm6, %v1475_v43, %v1514_v45  ;;  %v2129_v56 = vadd.f32 %v1404_v50, %v1051_v62  ;;  %v2095_v57 = vpop.f32.mrb[10].mxu1 }
 0x24b   : > { %v1480_v58 = vadd.f32 %v2128_v49, %v2609_v26  ;;  %v2130_v59 = vadd.f32 %v2095_v57, %v2041_v12  ;;  %v1407_v61 = vpop.f32.mrb[11].mxu1  ;;  %v1545_v63 = vpack.c.bf16 %v1530_v54, %v1529_v51 }
 0x24c   : > { %v1478_v1 = vadd.f32 %v2129_v56, %v2609_v26  ;;  %v2131_v23 = vadd.f32 %v1407_v61, %v1054_v15 }
 0x24d   : > { %v1519_v2 = vmul.f32 %v2614_v31, %v1480_v58  ;;  %v1481_v3 = vadd.f32 %v2130_v59, %v2609_v26  ;;  %2106 = vmatprep.mubr.msk.bf16.mxu0 %vm972_vm12, %v1545_v63  ;;  %vm1496_vm7 = vcmp.ge.f32.partialorder %v1480_v58, 0.0 }
 0x24e   : > { %v1517_v4 = vmul.f32 %v2614_v31, %v1478_v1  ;;  %v1479_v5 = vadd.f32 %v2131_v23, %v2609_v26  ;;  %2107 = vmatmul.mubr.msk.bf16.vlgmr.msra.gmra.mrb[40].mxu0 %vm972_vm12, %v1546_v53  ;;  %vm1494_vm8 = vcmp.ge.f32.partialorder %v1478_v1, 0.0  ;;  %v2669_v53 = vld [vmem:[%s2764_s9] ss:$0 sm:$0xff] }
 0x24f   : > { %vm1497_vm9 = vcmp.ge.f32.partialorder %v1481_v3, 0.0  ;;  %v1520_v6 = vmul.f32 %v2614_v31, %v1481_v3  ;;  %v1535_v8 = vsel %vm1496_vm7, %v1480_v58, %v1519_v2 }
 0x250   : > { %vm1495_vm10 = vcmp.ge.f32.partialorder %v1479_v5, 0.0  ;;  %v1518_v7 = vmul.f32 %v2614_v31, %v1479_v5  ;;  %v2098_v18 = vpop.f32.mrb[12].mxu1  ;;  %v1533_v10 = vsel %vm1494_vm8, %v1478_v1, %v1517_v4 }
 0x251   : > { %v1536_v21 = vsel %vm1497_vm9, %v1481_v3, %v1520_v6  ;;  %v2132_v17 = vadd.f32 %v2098_v18, %v2044_v16  ;;  %v1420_v9 = vpop.f32.mrb[13].mxu1 }
 0x252   : > { %v1534_v11 = vsel %vm1495_vm10, %v1479_v5, %v1518_v7  ;;  %v2133_v13 = vadd.f32 %v1420_v9, %v1067_v19  ;;  %v2099_v14 = vpop.f32.mrb[14].mxu1  ;;  %v1548_v40 = vpack.c.bf16 %v1536_v21, %v1535_v8 }
 0x253   : > { %v1484_v52 = vadd.f32 %v2132_v17, %v2609_v26  ;;  %v2134_v60 = vadd.f32 %v2099_v14, %v2602_v20  ;;  %v1423_v0 = vpop.f32.mrb[15].mxu1  ;;  %v1547_v25 = vpack.c.bf16 %v1534_v11, %v1533_v10 }
 0x254   : > { %v1482_v29 = vadd.f32 %v2133_v13, %v2609_v26  ;;  %v2135_v30 = vadd.f32 %v1423_v0, %v2604_v22 }
 0x255   : > { %v1523_v55 = vmul.f32 %v2614_v31, %v1484_v52  ;;  %v1485_v62 = vadd.f32 %v2134_v60, %v2609_v26  ;;  %2110 = vmatprep.mubr.msk.bf16.mxu0 %vm972_vm12, %v1547_v25  ;;  %vm1500_vm13 = vcmp.ge.f32.partialorder %v1484_v52, 0.0 }
 0x256   : > { %v1521_v12 = vmul.f32 %v2614_v31, %v1482_v29  ;;  %v1483_v15 = vadd.f32 %v2135_v30, %v2609_v26  ;;  %2111 = vmatmul.mubr.msk.bf16.gmra.mrb[44].mxu0 %vm972_vm12, %v1548_v40  ;;  %vm1498_vm14 = vcmp.ge.f32.partialorder %v1482_v29, 0.0 }
 0x257   : > { %vm1501_vm15 = vcmp.ge.f32.partialorder %v1485_v62, 0.0  ;;  %v1524_v16 = vmul.f32 %v2614_v31, %v1485_v62  ;;  %v1539_v22 = vsel %vm1500_vm13, %v1484_v52, %v1523_v55 }
 0x258   : > { %vm1499_vm2 = vcmp.ge.f32.partialorder %v1483_v15, 0.0  ;;  %v1522_v19 = vmul.f32 %v2614_v31, %v1483_v15  ;;  %v2102_v20 = vpop.f32.mrb[0].mxu1  ;;  %v1537_v32 = vsel %vm1498_vm14, %v1482_v29, %v1521_v12 }
 0x259   : > { %v1540_v24 = vsel %vm1501_vm15, %v1485_v62, %v1524_v16  ;;  %v1488_v27 = vadd.f32 %v2102_v20, %v2609_v26  ;;  %v1436_v28 = vpop.f32.mrb[1].mxu1 }
 0x25a   : > { %v1538_v33 = vsel %vm1499_vm2, %v1483_v15, %v1522_v19  ;;  %v1486_v34 = vadd.f32 %v2609_v26, %v1436_v28  ;;  %v2103_v35 = vpop.f32.mrb[2].mxu1  ;;  %v1550_v36 = vpack.c.bf16 %v1540_v24, %v1539_v22 }
 0x25b   : > { %v1527_v37 = vmul.f32 %v2614_v31, %v1488_v27  ;;  %v1489_v38 = vadd.f32 %v2103_v35, %v2609_v26  ;;  %v1439_v39 = vpop.f32.mrb[3].mxu1  ;;  %v1549_v41 = vpack.c.bf16 %v1538_v33, %v1537_v32  ;;  %vm1504_vm3 = vcmp.ge.f32.partialorder %v1488_v27, 0.0 }
 0x25c   : > { %v1525_v42 = vmul.f32 %v2614_v31, %v1486_v34  ;;  %v1487_v43 = vadd.f32 %v2609_v26, %v1439_v39  ;;  %vm1502_vm4 = vcmp.ge.f32.partialorder %v1486_v34, 0.0 }
 0x25d   : > { %vm1505_vm1 = vcmp.ge.f32.partialorder %v1489_v38, 0.0  ;;  %v1528_v44 = vmul.f32 %v2614_v31, %v1489_v38  ;;  %2114 = vmatprep.mubr.msk.bf16.mxu0 %vm972_vm12, %v1549_v41  ;;  %v1543_v46 = vsel %vm1504_vm3, %v1488_v27, %v1527_v37 }
 0x25e   : > { %vm1503_vm11 = vcmp.ge.f32.partialorder %v1487_v43, 0.0  ;;  %v1526_v45 = vmul.f32 %v2614_v31, %v1487_v43  ;;  %2115 = vmatmul.mubr.msk.bf16.gmra.mrb[48].mxu0 %vm972_vm12, %v1550_v36  ;;  %v1541_v48 = vsel %vm1502_vm4, %v1486_v34, %v1525_v42  ;;  %v2664_v31 = vld [vmem:[%s2763_s8] ss:$0 sm:$0xff] }
 0x25f   : > { %v1544_v47 = vsel %vm1505_vm1, %v1489_v38, %v1528_v44 }
 0x260   : > { %v1552_v49 = vpack.c.bf16 %v1544_v47, %v1543_v46  ;;  %v1542_v50 = vsel %vm1503_vm11, %v1487_v43, %v1526_v45 }
 0x261   : > { %v1551_v26 = vpack.c.bf16 %v1542_v50, %v1541_v48 }
 0x263   : > { %2118 = vmatprep.mubr.msk.bf16.mxu0 %vm972_vm12, %v1551_v26 }
 0x266   : > { %2119 = vmatmul.mubr.msk.bf16.gmra.mrb[52].mxu0 %vm972_vm12, %v1552_v49 }
 0x321   : > { %v2108_v51 = vpop.f32.mrb[40].mxu0 }
 0x322   : > { %v1631_v54 = vadd.f32 %v2108_v51, %v2664_v31  ;;  %v1622_v56 = vpop.f32.mrb[41].mxu0 }
 0x323   : > { %v1623_v57 = vadd.f32 %v2664_v31, %v1622_v56  ;;  %v2109_v58 = vpop.f32.mrb[42].mxu0 }
 0x324   : > { %vm1687_vm12 = vcmp.ge.f32.partialorder %v1631_v54, 0.0  ;;  %v1710_v59 = vmul.f32 %v2669_v53, %v1631_v54  ;;  %v1634_v61 = vadd.f32 %v2109_v58, %v2664_v31  ;;  %v1625_v63 = vpop.f32.mrb[43].mxu0 }
 0x325   : > { %vm1685_vm5 = vcmp.ge.f32.partialorder %v1623_v57, 0.0  ;;  %v1708_v1 = vmul.f32 %v2669_v53, %v1623_v57  ;;  %v1626_v23 = vadd.f32 %v2664_v31, %v1625_v63 }
 0x326   : > { %v1726_v2 = vsel %vm1687_vm12, %v1631_v54, %v1710_v59  ;;  %vm1688_vm6 = vcmp.ge.f32.partialorder %v1634_v61, 0.0  ;;  %v1711_v3 = vmul.f32 %v2669_v53, %v1634_v61 }
 0x327   : > { %1742 = vst.msk [vmem:[%s2676_s28 + $0x10] sm:$0xff] %vm500_vm0, %v1726_v2  ;;  %v1724_v4 = vsel %vm1685_vm5, %v1623_v57, %v1708_v1  ;;  %vm1686_vm7 = vcmp.ge.f32.partialorder %v1626_v23, 0.0  ;;  %v1709_v5 = vmul.f32 %v2669_v53, %v1626_v23 }
 0x328   : > { %1740 = vst.msk [vmem:[%s2676_s28] sm:$0xff] %vm500_vm0, %v1724_v4  ;;  %v1727_v6 = vsel %vm1688_vm6, %v1634_v61, %v1711_v3 }
 0x329   : > { %1743 = vst.msk [vmem:[%s2676_s28 + $0x18] sm:$0xff] %vm500_vm0, %v1727_v6  ;;  %v1725_v7 = vsel %vm1686_vm7, %v1626_v23, %v1709_v5  ;;  %v2112_v18 = vpop.f32.mrb[44].mxu0 }
 0x32a   : > { %1741 = vst.msk [vmem:[%s2676_s28 + $0x8] sm:$0xff] %vm500_vm0, %v1725_v7  ;;  %v1647_v8 = vadd.f32 %v2112_v18, %v2664_v31  ;;  %v1638_v21 = vpop.f32.mrb[45].mxu0 }
 0x32b   : > { %v1639_v17 = vadd.f32 %v2664_v31, %v1638_v21  ;;  %v2113_v9 = vpop.f32.mrb[46].mxu0 }
 0x32c   : > { %vm1691_vm8 = vcmp.ge.f32.partialorder %v1647_v8, 0.0  ;;  %v1714_v10 = vmul.f32 %v2669_v53, %v1647_v8  ;;  %v1650_v11 = vadd.f32 %v2113_v9, %v2664_v31  ;;  %v1641_v13 = vpop.f32.mrb[47].mxu0 }
 0x32d   : > { %vm1689_vm9 = vcmp.ge.f32.partialorder %v1639_v17, 0.0  ;;  %v1712_v14 = vmul.f32 %v2669_v53, %v1639_v17  ;;  %v1642_v40 = vadd.f32 %v2664_v31, %v1641_v13 }
 0x32e   : > { %v1730_v52 = vsel %vm1691_vm8, %v1647_v8, %v1714_v10  ;;  %vm1692_vm10 = vcmp.ge.f32.partialorder %v1650_v11, 0.0  ;;  %v1715_v60 = vmul.f32 %v2669_v53, %v1650_v11 }
 0x32f   : > { %1746 = vst.msk [vmem:[%s2676_s28 + $0x30] sm:$0xff] %vm500_vm0, %v1730_v52  ;;  %v1728_v0 = vsel %vm1689_vm9, %v1639_v17, %v1712_v14  ;;  %vm1690_vm13 = vcmp.ge.f32.partialorder %v1642_v40, 0.0  ;;  %v1713_v25 = vmul.f32 %v2669_v53, %v1642_v40 }
 0x330   : > { %1744 = vst.msk [vmem:[%s2676_s28 + $0x20] sm:$0xff] %vm500_vm0, %v1728_v0  ;;  %v1731_v29 = vsel %vm1692_vm10, %v1650_v11, %v1715_v60 }
 0x331   : > { %1747 = vst.msk [vmem:[%s2676_s28 + $0x38] sm:$0xff] %vm500_vm0, %v1731_v29  ;;  %v1729_v30 = vsel %vm1690_vm13, %v1642_v40, %v1713_v25  ;;  %v2116_v55 = vpop.f32.mrb[48].mxu0 }
 0x332   : > { %1745 = vst.msk [vmem:[%s2676_s28 + $0x28] sm:$0xff] %vm500_vm0, %v1729_v30  ;;  %v1663_v62 = vadd.f32 %v2116_v55, %v2664_v31  ;;  %v1654_v12 = vpop.f32.mrb[49].mxu0 }
 0x333   : > { %v1655_v15 = vadd.f32 %v2664_v31, %v1654_v12  ;;  %v2117_v16 = vpop.f32.mrb[50].mxu0 }
 0x334   : > { %vm1695_vm14 = vcmp.ge.f32.partialorder %v1663_v62, 0.0  ;;  %v1718_v19 = vmul.f32 %v2669_v53, %v1663_v62  ;;  %v1666_v20 = vadd.f32 %v2117_v16, %v2664_v31  ;;  %v1657_v22 = vpop.f32.mrb[51].mxu0 }
 0x335   : > { %vm1693_vm15 = vcmp.ge.f32.partialorder %v1655_v15, 0.0  ;;  %v1716_v24 = vmul.f32 %v2669_v53, %v1655_v15  ;;  %v1658_v27 = vadd.f32 %v2664_v31, %v1657_v22 }
 0x336   : > { %v1734_v28 = vsel %vm1695_vm14, %v1663_v62, %v1718_v19  ;;  %vm1696_vm2 = vcmp.ge.f32.partialorder %v1666_v20, 0.0  ;;  %v1719_v32 = vmul.f32 %v2669_v53, %v1666_v20 }
 0x337   : > { %1750 = vst.msk [vmem:[%s2676_s28 + $0x50] sm:$0xff] %vm500_vm0, %v1734_v28  ;;  %v1732_v33 = vsel %vm1693_vm15, %v1655_v15, %v1716_v24  ;;  %vm1694_vm3 = vcmp.ge.f32.partialorder %v1658_v27, 0.0  ;;  %v1717_v34 = vmul.f32 %v2669_v53, %v1658_v27 }
 0x338   : > { %1748 = vst.msk [vmem:[%s2676_s28 + $0x40] sm:$0xff] %vm500_vm0, %v1732_v33  ;;  %v1735_v35 = vsel %vm1696_vm2, %v1666_v20, %v1719_v32 }
 0x339   : > { %1751 = vst.msk [vmem:[%s2676_s28 + $0x58] sm:$0xff] %vm500_vm0, %v1735_v35  ;;  %v1733_v36 = vsel %vm1694_vm3, %v1658_v27, %v1717_v34  ;;  %v2120_v37 = vpop.f32.mrb[52].mxu0 }
 0x33a   : > { %1749 = vst.msk [vmem:[%s2676_s28 + $0x48] sm:$0xff] %vm500_vm0, %v1733_v36  ;;  %v1679_v38 = vadd.f32 %v2120_v37, %v2664_v31  ;;  %v1670_v39 = vpop.f32.mrb[53].mxu0 }
 0x33b   : > { %v1671_v41 = vadd.f32 %v2664_v31, %v1670_v39  ;;  %v2121_v42 = vpop.f32.mrb[54].mxu0 }
 0x33c   : > { %vm1699_vm4 = vcmp.ge.f32.partialorder %v1679_v38, 0.0  ;;  %v1722_v43 = vmul.f32 %v2669_v53, %v1679_v38  ;;  %v1682_v44 = vadd.f32 %v2121_v42, %v2664_v31  ;;  %v1673_v45 = vpop.f32.mrb[55].mxu0 }
 0x33d   : > { %vm1697_vm1 = vcmp.ge.f32.partialorder %v1671_v41, 0.0  ;;  %v1720_v46 = vmul.f32 %v2669_v53, %v1671_v41  ;;  %v1674_v47 = vadd.f32 %v2664_v31, %v1673_v45 }
 0x33e   : > { %v1738_v48 = vsel %vm1699_vm4, %v1679_v38, %v1722_v43  ;;  %vm1700_vm11 = vcmp.ge.f32.partialorder %v1682_v44, 0.0  ;;  %v1723_v49 = vmul.f32 %v2669_v53, %v1682_v44 }
 0x33f   : > { %1754 = vst.msk [vmem:[%s2676_s28 + $0x70] sm:$0xff] %vm500_vm0, %v1738_v48  ;;  %v1736_v50 = vsel %vm1697_vm1, %v1671_v41, %v1720_v46  ;;  %vm1698_vm12 = vcmp.ge.f32.partialorder %v1674_v47, 0.0  ;;  %v1721_v26 = vmul.f32 %v2669_v53, %v1674_v47 }
 0x340   : > { %1752 = vst.msk [vmem:[%s2676_s28 + $0x60] sm:$0xff] %vm500_vm0, %v1736_v50  ;;  %v1739_v51 = vsel %vm1700_vm11, %v1682_v44, %v1723_v49 }
 0x341   : > { %1755 = vst.msk [vmem:[%s2676_s28 + $0x78] sm:$0xff] %vm500_vm0, %v1739_v51  ;;  %v1737_v54 = vsel %vm1698_vm12, %v1674_v47, %v1721_v26 }
 0x342   : > { %1753 = vst.msk [vmem:[%s2676_s28 + $0x68] sm:$0xff] %vm500_vm0, %v1737_v54 }
 0x343 PF: > { %s20_s17 = sadd.s32 1, %s2273_s17   ;;  %s2766_s13 = smov %s2265_s15 }
 0x344   : > { %p17_p7 = scmp.ge.s32.totalorder %s20_s17, 6   ;;  %s2767_s14 = smov %s2269_s16 }
 0x345   : > { %s2768_s15 = smov %s2771_s18  ;;  %s2769_s16 = smov %s2775_s19 }
 0x346   :  { %19 = sbr.rel (!%p17_p7) target bundleno = 3 (0x3), region = 94 }

// kernel: enet_stage5.4
= control target key start
LH: loop header
LB: loop body
LE: loop exit
PB: predicated region body
PF: predicated region fallthrough
CT: control target
= control target key end

     0   :  { %s4361_s18 = smov 0   ;;  %s4363_s19 = smov 0   ;;  %s5562_s0 = inlined_call_operand.vmem [shape: bf16[2,18,18,64], index: 0, kind: input, shape index: {}]   ;;  %s5563_s1 = inlined_call_operand.vmem [shape: bf16[2,16,16,8], index: 1, kind: input, shape index: {}]   ;;  %s5564_s2 = inlined_call_operand.vmem [shape: bf16[9,64,8], index: 2, kind: input, shape index: {}]   ;;  %s5565_s3 = inlined_call_operand.vmem [shape: f32[1,16], index: 3, kind: input, shape index: {}]   ;;  %s5566_s4 = inlined_call_operand.vmem [shape: f32[1,16], index: 4, kind: input, shape index: {}]   ;;  %s5567_s5 = inlined_call_operand.vmem [shape: bf16[2,16,16,16], index: 5, kind: output, shape index: {}]  }
   0x1   :  { %s4365_s20 = smov 0   ;;  %s4367_s21 = smov 0  }
   0x2   :  { %s4369_s22 = smov 0  }
   0x3 LB: > { %s24_s23 = sadd.s32 1, %s4320_s20  ;;  %s27_s24 = sadd.s32 1, %s4324_s21  ;;  %s4328_s22 = sphi %s4369_s22, %s15_s22   ;;  %s4324_s21 = sphi %s4367_s21, %s5642_s21   ;;  %s4320_s20 = sphi %s4365_s20, %s5641_s20   ;;  %s4316_s19 = sphi %s4363_s19, %s5640_s19   ;;  %s4312_s18 = sphi %s4361_s18, %s5639_s18  }
   0x4   : > { %p25_p0 = scmp.ge.s32.totalorder %s24_s23, 2  ;;  %p3307_p1 = scmp.ge.s32.totalorder %s4328_s22, 1 }
   0x5   : > { %p219_p2 = scmp.lt.s32.totalorder %s4328_s22, 5 }
   0x6   : > { %s5644_s23 = smov (%p25_p0, %s24_s23), 0  ;;  %s5646_s24 = smov (!%p25_p0, %s27_s24), %s4324_s21 }
   0x7   : > { %p220_p3 = pnand %p3307_p1, %p219_p2  ;;  %p29_p4 = scmp.ge.s32.totalorder %s5646_s24, 2 }
   0x9   : > { %s5648_s24 = smov (%p29_p4, %s5646_s24), 0  ;;  %223 = sbr.rel (%p220_p3) target bundleno = 544 (0x220), region = 40 }
  0x10   : > { %v4218_v0 = vld [vmem:[%s5564_s2 + $0x20] sm:$0xff]   ;;  %p262_p5 = scmp.lt.s32.totalorder %s4316_s19, 1  ;;  %v4220_v2 = vld [vmem:[%s5564_s2 + $0x28] sm:$0xff]   ;;  %s3660_s8 = smul.u32 96, %s4312_s18  ;;  %v4222_v4 = vld [vmem:[%s5564_s2 + $0x30] sm:$0xff]   ;;  %vm578_vm3 = vcmask 523264  }
  0x11   : > { %v4219_v1 = vld [vmem:[%s5564_s2 + $0x80] sm:$0xff]   ;;  %3824 = vmatprep.subr.bf16.mxu1 %v4218_v0  ;;  %v4221_v3 = vld [vmem:[%s5564_s2 + $0x88] sm:$0xff]   ;;  %v4223_v5 = vld [vmem:[%s5564_s2 + $0x90] sm:$0xff]   ;;  %vm326_vm0 = vsmask.f32 3328  ;;  %vm893_vm4 = vcmask 1042432  }
  0x12   : > { %s5650_s19 = smov (!%p262_p5, %s4316_s19), 1  ;;  %3920 = vmatprep.subr.bf16.mxu0 %v4219_v1  ;;  %3825 = vmatpush3.bf16.msra.mxu1 %v4218_v0  ;;  %v4224_v6 = vld [vmem:[%s5564_s2 + $0x38] sm:$0xff]   ;;  %vm327_vm1 = vsmask.f32 7440  ;;  %v4443_v18 = vld [vmem:[%s5564_s2] sm:$0xff]   ;;  %vm894_vm5 = vcmask 1046532  }
  0x13   : > { %3921 = vmatpush3.bf16.msra.mxu0 %v4219_v1  ;;  %3826 = vmatprep.subr.bf16.mxu1 %v4220_v2  ;;  %s4176_s11 = smul.u32 216, %s5650_s19  ;;  %v4225_v7 = vld [vmem:[%s5564_s2 + $0x98] sm:$0xff]   ;;  %v4451_v23 = vld [vmem:[%s5564_s2 + $0xa0] sm:$0xff]   ;;  %vm4463_vm2 = vmor %vm326_vm0, %vm327_vm1  ;;  %s4330_s16 = smov 8   ;;  %vm3006_vm7 = vcmask 64512   ;;  %vm3165_vm9 = vcmask 125952  }
  0x14   : > { %3922 = vmatprep.subr.bf16.mxu0 %v4221_v3  ;;  %vm4648_vm6 = vmor %vm893_vm4, %vm894_vm5  ;;  %s3309_s17 = sshll.u32 %s4312_s18, 3  ;;  %s3311_s26 = sshll.u32 %s5650_s19, 5 }
  0x15   : > { %s266_s25 = scalar_lea.vmem %s5562_s0, %s4176_s11  ;;  %p270_p6 = scmp.lt.s32.totalorder %s3309_s17, 15 }
  0x16   : > { %3827 = vmatpush3.bf16.msra.mxu1 %v4220_v2  ;;  %s4424_s28 = scalar_lea.vmem %s266_s25, %s3660_s8 }
  0x17   : > { %3923 = vmatpush3.bf16.msra.mxu0 %v4221_v3  ;;  %3828 = vmatprep.subr.bf16.mxu1 %v4222_v4  ;;  %v4427_v8 = vld [vmem:[%s4424_s28] sm:$0xf]  ;;  %v4430_v9 = vld [vmem:[%s4424_s28 + $0x4] sm:$0xf]  ;;  %v4433_v10 = vld [vmem:[%s4424_s28 + $0x8] sm:$0x1] }
  0x18   : > { %3924 = vmatprep.subr.bf16.mxu0 %v4223_v5  ;;  %v330_v11 = vshrl.u32 %v4427_v8, 16  ;;  %v333_v12 = vshll.u32 %v4427_v8, 16  ;;  %v339_v13 = vshll.u32 %v4430_v9, 16  ;;  %v343_v14 = vshrl.u32 %v4430_v9, 16  ;;  %v4446_v22 = vld [vmem:[%s4424_s28 + $0xc] sm:$0xf] }
  0x19   : > { %v349_v15 = vshll.u32 %v4433_v10, 16  ;;  %v4454_v25 = vld [vmem:[%s4424_s28 + $0x10] sm:$0xf]  ;;  %v4457_v26 = vld [vmem:[%s4424_s28 + $0x14] sm:$0x1]  ;;  %v1385_v27 = vshrl.u32 %v4446_v22, 16 }
  0x1a   : > { %3829 = vmatpush3.bf16.msra.mxu1 %v4222_v4  ;;  %v332_v16 = vrot.slane %v330_v11, 4  ;;  %v335_v17 = vrot.slane %v333_v12, 5  ;;  %v341_v19 = vrot.slane %v339_v13, 5  ;;  %v345_v20 = vrot.slane %v343_v14, 4  ;;  %v4472_v41 = vld [vmem:[%s4424_s28 + $0xc] sm:$0xf] }
  0x1b   : > { %3925 = vmatpush3.bf16.msra.mxu0 %v4223_v5  ;;  %3830 = vmatprep.subr.bf16.mxu1 %v4224_v6  ;;  %v351_v21 = vrot.slane %v349_v15, 5  ;;  %v1388_v28 = vshll.u32 %v4446_v22, 16  ;;  %v1394_v31 = vshll.u32 %v4454_v25, 16  ;;  %v1398_v32 = vshrl.u32 %v4454_v25, 16  ;;  %v4478_v44 = vld [vmem:[%s4424_s28 + $0x10] sm:$0xf] }
  0x1c   : > { %3926 = vmatprep.subr.bf16.mxu0 %v4225_v7  ;;  %v336_v24 = vor.u32 %v335_v17, %v332_v16  ;;  %v346_v30 = vor.u32 %v345_v20, %v341_v19  ;;  %v1404_v33 = vshll.u32 %v4457_v26, 16  ;;  %v1387_v35 = vrot.slane %v1385_v27, 4  ;;  %v4481_v45 = vld [vmem:[%s4424_s28 + $0x14] sm:$0x1]  ;;  %v4490_v52 = vld [vmem:[%s4424_s28 + $0x18] sm:$0xf] }
  0x1d   : > { %v1390_v36 = vrot.slane %v1388_v28, 5  ;;  %v1396_v38 = vrot.slane %v1394_v31, 5  ;;  %v1400_v39 = vrot.slane %v1398_v32, 4  ;;  %v354_v46 = vshrl.u32 %v4472_v41, 16  ;;  %v4493_v57 = vld [vmem:[%s4424_s28 + $0x1c] sm:$0xf] }
  0x1e   : > { %3831 = vmatpush3.bf16.msra.mxu1 %v4224_v6  ;;  %v337_v34 = vrot.slane %v336_v24, 4  ;;  %v347_v37 = vrot.slane %v346_v30, 4  ;;  %v1406_v40 = vrot.slane %v1404_v33, 5  ;;  %v357_v47 = vshll.u32 %v4472_v41, 16  ;;  %v4501_v1 = vld [vmem:[%s4424_s28 + $0x20] sm:$0x1] }
  0x1f   : > { %3927 = vmatpush3.bf16.msra.mxu0 %v4225_v7  ;;  %3848 = vmatprep.subr.bf16.mxu1 %v4443_v18  ;;  %v1391_v43 = vor.u32 %v1390_v36, %v1387_v35  ;;  %v1401_v49 = vor.u32 %v1400_v39, %v1396_v38  ;;  %v363_v50 = vshll.u32 %v4478_v44, 16  ;;  %v367_v51 = vshrl.u32 %v4478_v44, 16  ;;  %v4507_v6 = vld [vmem:[%s4424_s28 + $0x18] sm:$0xf]  ;;  %v4512_v14 = vld [vmem:[%s4424_s28 + $0x1c] sm:$0xf] }
  0x20   : > { %v342_v42 = vsel %vm4463_vm2, %v337_v34, %v341_v19  ;;  %3944 = vmatprep.subr.bf16.mxu0 %v4451_v23  ;;  %v352_v48 = vsel %vm4463_vm2, %v347_v37, %v351_v21  ;;  %v356_v55 = vrot.slane %v354_v46, 4  ;;  %v359_v56 = vrot.slane %v357_v47, 5  ;;  %v4521_v28 = vld [vmem:[%s4424_s28 + $0x20] sm:$0x1]  ;;  %v4527_v34 = vld [vmem:[%s4424_s28 + $0x24] sm:$0xf] }
  0x21   : > { %v3328_v53 = vcombine.low %v342_v42, %v352_v48  ;;  %v1392_v54 = vrot.slane %v1391_v43, 4  ;;  %v1402_v58 = vrot.slane %v1401_v49, 4  ;;  %v365_v59 = vrot.slane %v363_v50, 5  ;;  %v4229_v39 = vld [vmem:[%s5564_s2 + $0x8] sm:$0xff]   ;;  %s5652_s17 = smov (!%p270_p6, %s3309_s17), 15 }
  0x22   : > { %v369_v60 = vrot.slane %v367_v51, 4  ;;  %v373_v61 = vshll.u32 %v4481_v45, 16  ;;  %v1783_v63 = vrot.slane %v4457_v26, 5  ;;  %v360_v0 = vor.u32 %v359_v56, %v356_v55  ;;  %v4539_v50 = vld [vmem:[%s4424_s28 + $0x28] sm:$0xf]  ;;  %s3310_s25 = sshll.u32 %s5652_s17, 1 }
  0x23   : > { %3832 = vmatprep.mubr.msk.bf16.mxu1 %vm578_vm3, %v3328_v53  ;;  %v1397_v62 = vsel %vm4463_vm2, %v1392_v54, %v1396_v38  ;;  %v1407_v2 = vsel %vm4463_vm2, %v1402_v58, %v1406_v40  ;;  %v1409_v5 = vshrl.u32 %v4490_v52, 16  ;;  %v1412_v12 = vshll.u32 %v4490_v52, 16  ;;  %v4544_v58 = vld [vmem:[%s4424_s28 + $0x2c] sm:$0x1]  ;;  %s274_s27 = sadd.s32 %s3311_s26, %s3310_s25 }
  0x24   : > { %v370_v3 = vor.u32 %v369_v60, %v365_v59  ;;  %v375_v4 = vrot.slane %v373_v61, 5  ;;  %v3466_v7 = vcombine.low %v1397_v62, %v1407_v2  ;;  %v361_v11 = vrot.slane %v360_v0, 4  ;;  %v4550_v0 = vld [vmem:[%s4424_s28 + $0x24] sm:$0xf]  ;;  %s3312_s29 = sshll.u32 %s274_s27, 2 }
  0x25   : > { %v1418_v13 = vshll.u32 %v4493_v57, 16  ;;  %v1411_v16 = vrot.slane %v1409_v5, 4  ;;  %v1422_v17 = vshrl.u32 %v4493_v57, 16  ;;  %v1428_v19 = vshll.u32 %v4501_v1, 16  ;;  %s5442_s7 = scalar_lea.vmem %s5563_s1, %s3312_s29  ;;  %s5467_s12 = scalar_lea.vmem %s5567_s5, %s3312_s29 }
  0x26   : > { %v371_v15 = vrot.slane %v370_v3, 4  ;;  %3928 = vmatprep.mubr.msk.bf16.mxu0 %vm578_vm3, %v3466_v7  ;;  %v366_v20 = vsel %vm4463_vm2, %v361_v11, %v365_v59  ;;  %v1414_v21 = vrot.slane %v1412_v12, 5  ;;  %v1787_v27 = vrot.slane %v4493_v57, 5  ;;  %v4228_v3 = vld [vmem:[%s5564_s2 + $0xa8] sm:$0xff]  }
  0x27   : > { %v1420_v24 = vrot.slane %v1418_v13, 5  ;;  %v1424_v31 = vrot.slane %v1422_v17, 4  ;;  %v1430_v32 = vrot.slane %v1428_v19, 5  ;;  %v1790_v33 = vrot.slane %v4501_v1, 5  ;;  %v4563_v11 = vld [vmem:[%s4424_s28 + $0x28] sm:$0xf] }
  0x28   : > { %v376_v30 = vsel %vm4463_vm2, %v371_v15, %v375_v4  ;;  %v1415_v36 = vor.u32 %v1414_v21, %v1411_v16  ;;  %v378_v37 = vshrl.u32 %v4507_v6, 16  ;;  %v381_v38 = vshll.u32 %v4507_v6, 16  ;;  %v4234_v17 = vld [vmem:[%s5564_s2 + $0x18] sm:$0xff]  }
  0x29   : > { %v3329_v35 = vcombine.low %v366_v20, %v376_v30  ;;  %v1425_v40 = vor.u32 %v1424_v31, %v1420_v24  ;;  %v387_v42 = vshll.u32 %v4512_v14, 16  ;;  %v391_v43 = vshrl.u32 %v4512_v14, 16 }
  0x2a   : > { %v397_v46 = vshll.u32 %v4521_v28, 16  ;;  %v1416_v47 = vrot.slane %v1415_v36, 4  ;;  %v380_v48 = vrot.slane %v378_v37, 4  ;;  %v383_v49 = vrot.slane %v381_v38, 5  ;;  %v4578_v37 = vld [vmem:[%s4424_s28 + $0x30] sm:$0xf] }
  0x2b   : > { %3833 = vmatmul.mubr.msk.bf16.vlgmr.msra.gmra.mrb[0].mxu1 %vm578_vm3, %v3329_v35  ;;  %v1433_v51 = vshrl.u32 %v4527_v34, 16  ;;  %v1426_v53 = vrot.slane %v1425_v40, 4  ;;  %v389_v54 = vrot.slane %v387_v42, 5  ;;  %v393_v55 = vrot.slane %v391_v43, 4  ;;  %v4574_v35 = vld [vmem:[%s4424_s28 + $0x2c] sm:$0x1] }
  0x2c   : > { %3849 = vmatpush3.bf16.msra.mxu1 %v4443_v18  ;;  %v399_v56 = vrot.slane %v397_v46, 5  ;;  %v1421_v59 = vsel %vm4463_vm2, %v1416_v47, %v1420_v24  ;;  %v384_v60 = vor.u32 %v383_v49, %v380_v48  ;;  %v1436_v62 = vshll.u32 %v4527_v34, 16  ;;  %v4232_v18 = vld [vmem:[%s5564_s2 + $0x10] sm:$0xff]  }
  0x2d   : > { %3850 = vmatprep.subr.bf16.mxu1 %v4229_v39  ;;  %v1435_v61 = vrot.slane %v1433_v51, 4  ;;  %v1431_v2 = vsel %vm4463_vm2, %v1426_v53, %v1430_v32  ;;  %v394_v4 = vor.u32 %v393_v55, %v389_v54  ;;  %v1442_v5 = vshll.u32 %v4539_v50, 16  ;;  %v4585_v43 = vld [vmem:[%s4424_s28 + $0x34] sm:$0xf]  ;;  %v4592_v51 = vld [vmem:[%s4424_s28 + $0x38] sm:$0x1] }
  0x2e   : > { %v1446_v7 = vshrl.u32 %v4539_v50, 16  ;;  %v3467_v12 = vcombine.low %v1421_v59, %v1431_v2  ;;  %v385_v13 = vrot.slane %v384_v60, 4  ;;  %v1438_v15 = vrot.slane %v1436_v62, 5  ;;  %v4230_v48 = vld [vmem:[%s5564_s2 + $0xb0] sm:$0xff]  }
  0x2f   : > { %v1452_v16 = vshll.u32 %v4544_v58, 16  ;;  %v395_v19 = vrot.slane %v394_v4, 4  ;;  %v1444_v20 = vrot.slane %v1442_v5, 5  ;;  %v402_v24 = vshrl.u32 %v4550_v0, 16  ;;  %v4595_v53 = vld [vmem:[%s4424_s28 + $0x30] sm:$0xf] }
  0x30   : > { %v1448_v21 = vrot.slane %v1446_v7, 4  ;;  %3851 = vmatpush3.bf16.msra.mxu1 %v4229_v39  ;;  %3929 = vmatmul.mubr.msk.bf16.vlgmr.msra.gmra.mrb[0].mxu0 %vm578_vm3, %v3467_v12  ;;  %v390_v30 = vsel %vm4463_vm2, %v385_v13, %v389_v54  ;;  %v1439_v31 = vor.u32 %v1438_v15, %v1435_v61  ;;  %v405_v36 = vshll.u32 %v4550_v0, 16  ;;  %v4606_v4 = vld [vmem:[%s5564_s2 + $0x40] sm:$0xff]  }
  0x31   : > { %v1454_v32 = vrot.slane %v1452_v16, 5  ;;  %3852 = vmatprep.subr.bf16.mxu1 %v4232_v18  ;;  %3945 = vmatpush3.bf16.msra.mxu0 %v4451_v23  ;;  %v400_v38 = vsel %vm4463_vm2, %v395_v19, %v399_v56  ;;  %v404_v40 = vrot.slane %v402_v24, 4  ;;  %v411_v42 = vshll.u32 %v4563_v11, 16 }
  0x32   : > { %v1449_v39 = vor.u32 %v1448_v21, %v1444_v20  ;;  %3946 = vmatprep.subr.bf16.mxu0 %v4228_v3  ;;  %v3330_v46 = vcombine.low %v390_v30, %v400_v38  ;;  %v1440_v47 = vrot.slane %v1439_v31, 4  ;;  %v407_v49 = vrot.slane %v405_v36, 5  ;;  %v4615_v21 = vld [vmem:[%s4424_s28 + $0x34] sm:$0xf]  ;;  %v4620_v31 = vld [vmem:[%s4424_s28 + $0x38] sm:$0x1] }
  0x33   : > { %v415_v23 = vshrl.u32 %v4563_v11, 16  ;;  %v413_v55 = vrot.slane %v411_v42, 5  ;;  %v421_v56 = vshll.u32 %v4574_v35, 16  ;;  %v1457_v59 = vshrl.u32 %v4578_v37, 16  ;;  %v4628_v42 = vld [vmem:[%s4424_s28 + $0x3c] sm:$0xf] }
  0x34   : > { %v1450_v54 = vrot.slane %v1449_v39, 4  ;;  %3853 = vmatpush3.bf16.msra.mxu1 %v4232_v18  ;;  %3836 = vmatprep.mubr.msk.bf16.mxu1 %vm578_vm3, %v3330_v46  ;;  %v1445_v60 = vsel %vm4463_vm2, %v1440_v47, %v1444_v20  ;;  %v408_v61 = vor.u32 %v407_v49, %v404_v40  ;;  %v1460_v2 = vshll.u32 %v4578_v37, 16  ;;  %v4231_v20 = vld [vmem:[%s5564_s2 + $0xb8] sm:$0xff]  }
  0x35   : > { %v417_v62 = vrot.slane %v415_v23, 4  ;;  %3854 = vmatprep.subr.bf16.mxu1 %v4234_v17  ;;  %3947 = vmatpush3.bf16.msra.mxu0 %v4228_v3  ;;  %v423_v5 = vrot.slane %v421_v56, 5  ;;  %v1459_v7 = vrot.slane %v1457_v59, 4  ;;  %v1466_v12 = vshll.u32 %v4585_v43, 16  ;;  %v4638_v59 = vld [vmem:[%s5564_s2 + $0xc0] sm:$0xff]  }
  0x36   : > { %v1455_v18 = vsel %vm4463_vm2, %v1450_v54, %v1454_v32  ;;  %3948 = vmatprep.subr.bf16.mxu0 %v4230_v48  ;;  %v409_v15 = vrot.slane %v408_v61, 4  ;;  %v1462_v19 = vrot.slane %v1460_v2, 5  ;;  %v1470_v24 = vshrl.u32 %v4585_v43, 16  ;;  %v4642_v2 = vld [vmem:[%s4424_s28 + $0x40] sm:$0xf] }
  0x37   : > { %v3468_v13 = vcombine.low %v1445_v60, %v1455_v18  ;;  %v418_v16 = vor.u32 %v417_v62, %v413_v55  ;;  %v1468_v3 = vrot.slane %v1466_v12, 5  ;;  %v1476_v30 = vshll.u32 %v4592_v51, 16 }
  0x38   : > { %v426_v32 = vshrl.u32 %v4595_v53, 16  ;;  %3855 = vmatpush3.bf16.msra.mxu1 %v4234_v17  ;;  %v414_v36 = vsel %vm4463_vm2, %v409_v15, %v413_v55  ;;  %v1463_v39 = vor.u32 %v1462_v19, %v1459_v7  ;;  %v429_v40 = vshll.u32 %v4595_v53, 16  ;;  %v4654_v15 = vld [vmem:[%s4424_s28 + $0x44] sm:$0x1] }
  0x39   : > { %3932 = vmatprep.mubr.msk.bf16.mxu0 %vm578_vm3, %v3468_v13  ;;  %v419_v38 = vrot.slane %v418_v16, 4  ;;  %3872 = vmatprep.subr.bf16.mxu1 %v4606_v4  ;;  %v1472_v46 = vrot.slane %v1470_v24, 4  ;;  %v1478_v47 = vrot.slane %v1476_v30, 5  ;;  %v435_v17 = vshll.u32 %v4615_v21, 16 }
  0x3a   : > { %3949 = vmatpush3.bf16.msra.mxu0 %v4230_v48  ;;  %v428_v49 = vrot.slane %v426_v32, 4  ;;  %v1464_v54 = vrot.slane %v1463_v39, 4  ;;  %v431_v55 = vrot.slane %v429_v40, 5  ;;  %v439_v56 = vshrl.u32 %v4615_v21, 16 }
  0x3b   : > { %v424_v23 = vsel %vm4463_vm2, %v419_v38, %v423_v5  ;;  %3950 = vmatprep.subr.bf16.mxu0 %v4231_v20  ;;  %v1473_v61 = vor.u32 %v1472_v46, %v1468_v3  ;;  %v437_v48 = vrot.slane %v435_v17, 5  ;;  %v445_v62 = vshll.u32 %v4620_v31, 16 }
  0x3c   : > { %v3331_v60 = vcombine.low %v414_v36, %v424_v23  ;;  %v1469_v18 = vsel %vm4463_vm2, %v1464_v54, %v1468_v3  ;;  %v432_v5 = vor.u32 %v431_v55, %v428_v49  ;;  %v441_v7 = vrot.slane %v439_v56, 4  ;;  %v4669_v23 = vld [vmem:[%s4424_s28 + $0x48] sm:$0xf] }
  0x3d   : > { %v3486_v13 = vrot.slane %v4446_v22, 9  ;;  %v1474_v16 = vrot.slane %v1473_v61, 4  ;;  %v447_v19 = vrot.slane %v445_v62, 5  ;;  %v1780_v3 = vrot.slane %v4454_v25, 5 }
  0x3e   : > { %3837 = vmatmul.mubr.msk.bf16.gmra.mrb[4].mxu1 %vm578_vm3, %v3331_v60  ;;  %3951 = vmatpush3.bf16.msra.mxu0 %v4231_v20  ;;  %v450_v24 = vshrl.u32 %v4628_v42, 16  ;;  %v433_v30 = vrot.slane %v432_v5, 4  ;;  %v442_v32 = vor.u32 %v441_v7, %v437_v48  ;;  %v453_v36 = vshll.u32 %v4628_v42, 16 }
  0x3f   : > { %3968 = vmatprep.subr.bf16.mxu0 %v4638_v59  ;;  %v459_v22 = vshll.u32 %v4642_v2, 16  ;;  %v1479_v38 = vsel %vm4463_vm2, %v1474_v16, %v1478_v47  ;;  %v1781_v20 = vsel %vm4648_vm6, %v3486_v13, %v1780_v3  ;;  %v1782_v39 = vrot.slane %v1780_v3, 4  ;;  %v4687_v13 = vld [vmem:[%s4424_s28 + $0x50] sm:$0x1] }
  0x40   : > { %v452_v40 = vrot.slane %v450_v24, 4  ;;  %v3469_v25 = vcombine.low %v1469_v18, %v1479_v38  ;;  %v438_v46 = vsel %vm4463_vm2, %v433_v30, %v437_v48  ;;  %v443_v49 = vrot.slane %v442_v32, 4  ;;  %v4682_v18 = vld [vmem:[%s4424_s28 + $0x4c] sm:$0xf] }
  0x41   : > { %v455_v17 = vrot.slane %v453_v36, 5  ;;  %v1784_v47 = vsel %vm4648_vm6, %v1782_v39, %v1783_v63  ;;  %v461_v54 = vrot.slane %v459_v22, 5  ;;  %v463_v55 = vshrl.u32 %v4642_v2, 16  ;;  %v4709_v39 = vld [vmem:[%s4424_s28 + $0x58] sm:$0xf] }
  0x42   : > { %v469_v56 = vshll.u32 %v4654_v15, 16  ;;  %3933 = vmatmul.mubr.msk.bf16.gmra.mrb[4].mxu0 %vm578_vm3, %v3469_v25  ;;  %v448_v60 = vsel %vm4463_vm2, %v443_v49, %v447_v19  ;;  %v3502_v61 = vcombine.low %v1781_v20, %v1784_v47  ;;  %v3487_v62 = vrot.slane %v4490_v52, 9  ;;  %v4706_v20 = vld [vmem:[%s4424_s28 + $0x54] sm:$0xf] }
  0x43   : > { %v456_v48 = vor.u32 %v455_v17, %v452_v40  ;;  %v3332_v26 = vcombine.low %v438_v46, %v448_v60  ;;  %v465_v5 = vrot.slane %v463_v55, 4  ;;  %v1789_v63 = vrot.slane %v1787_v27, 4 }
  0x44   : > { %v471_v7 = vrot.slane %v469_v56, 5  ;;  %3952 = vmatprep.mubr.msk.bf16.mxu0 %vm578_vm3, %v3502_v61  ;;  %v1788_v52 = vsel %vm4648_vm6, %v3487_v62, %v1787_v27  ;;  %v474_v19 = vshrl.u32 %v4669_v23, 16  ;;  %v477_v3 = vshll.u32 %v4669_v23, 16  ;;  %v4721_v61 = vld [vmem:[%s4424_s28 + $0x5c] sm:$0x1] }
  0x45   : > { %v457_v16 = vrot.slane %v456_v48, 4  ;;  %3840 = vmatprep.mubr.msk.bf16.mxu1 %vm578_vm3, %v3332_v26  ;;  %v466_v24 = vor.u32 %v465_v5, %v461_v54  ;;  %v1791_v30 = vsel %vm4648_vm6, %v1789_v63, %v1790_v33  ;;  %v483_v32 = vshll.u32 %v4682_v18, 16  ;;  %v4728_v26 = vld [vmem:[%s4424_s28 + $0x3c] sm:$0xf]  ;;  %v4238_v5 = vld [vmem:[%s5564_s2 + $0xd0] sm:$0xff]  }
  0x46   : > { %v487_v36 = vshrl.u32 %v4682_v18, 16  ;;  %v3503_v27 = vcombine.low %v1788_v52, %v1791_v30  ;;  %v476_v22 = vrot.slane %v474_v19, 4  ;;  %v479_v38 = vrot.slane %v477_v3, 5 }
  0x47   : > { %v462_v57 = vsel %vm4463_vm2, %v457_v16, %v461_v54  ;;  %v467_v40 = vrot.slane %v466_v24, 4  ;;  %v485_v1 = vrot.slane %v483_v32, 5  ;;  %v493_v33 = vshll.u32 %v4687_v13, 16  ;;  %v4235_v54 = vld [vmem:[%s5564_s2 + $0xc8] sm:$0xff]   ;;  %v4747_v32 = vld [vmem:[%s4424_s28 + $0x44] sm:$0x1] }
  0x48   : > { %v489_v25 = vrot.slane %v487_v36, 4  ;;  %v480_v46 = vor.u32 %v479_v38, %v476_v22  ;;  %v3488_v49 = vrot.slane %v4527_v34, 9  ;;  %v1794_v17 = vrot.slane %v4539_v50, 5  ;;  %5594 = vst [vmem:[#allocation3_spill] sm:$0xff] %v4747_v32 }
  0x49   : > { %v1797_v47 = vrot.slane %v4544_v58, 5  ;;  %v472_v55 = vsel %vm4463_vm2, %v467_v40, %v471_v7  ;;  %v495_v60 = vrot.slane %v493_v33, 5  ;;  %v498_v48 = vshrl.u32 %v4706_v20, 16 }
  0x4a   : > { %v490_v56 = vor.u32 %v489_v25, %v485_v1  ;;  %v3333_v62 = vcombine.low %v462_v57, %v472_v55  ;;  %3953 = vmatmul.mubr.msk.bf16.vlgmr.msra.gmra.mrb[0].mxu0 %vm578_vm3, %v3503_v27  ;;  %v481_v34 = vrot.slane %v480_v46, 4  ;;  %v1795_v50 = vsel %vm4648_vm6, %v3488_v49, %v1794_v17 }
  0x4b   : > { %v1796_v58 = vrot.slane %v1794_v17, 4  ;;  %3969 = vmatpush3.bf16.msra.mxu0 %v4638_v59  ;;  %v500_v63 = vrot.slane %v498_v48, 4  ;;  %v501_v16 = vshll.u32 %v4706_v20, 16  ;;  %v507_v52 = vshll.u32 %v4709_v39, 16  ;;  %v4744_v59 = vld [vmem:[%s4424_s28 + $0x40] sm:$0xf] }
  0x4c   : > { %v491_v7 = vrot.slane %v490_v56, 4  ;;  %3841 = vmatmul.mubr.msk.bf16.gmra.mrb[8].mxu1 %vm578_vm3, %v3333_v62  ;;  %v486_v19 = vsel %vm4463_vm2, %v481_v34, %v485_v1  ;;  %3970 = vmatprep.subr.bf16.mxu0 %v4235_v54  ;;  %v511_v24 = vshrl.u32 %v4709_v39, 16  ;;  %v517_v30 = vshll.u32 %v4721_v61, 16  ;;  %5593 = vst [vmem:[#allocation2_spill] sm:$0xff] %v4744_v59  ;;  %v4767_v34 = vld [vmem:[%s4424_s28 + $0x48] sm:$0xf] }
  0x4d   : > { %v1798_v3 = vsel %vm4648_vm6, %v1796_v58, %v1797_v47  ;;  %v503_v27 = vrot.slane %v501_v16, 5  ;;  %v509_v22 = vrot.slane %v507_v52, 5  ;;  %v3489_v25 = vrot.slane %v4578_v37, 9  ;;  %v4242_v47 = vld [vmem:[%s5564_s2 + $0xd8] sm:$0xff]  }
  0x4e   : > { %v496_v36 = vsel %vm4463_vm2, %v491_v7, %v495_v60  ;;  %v3504_v57 = vcombine.low %v1795_v50, %v1798_v3  ;;  %v513_v40 = vrot.slane %v511_v24, 4  ;;  %v519_v1 = vrot.slane %v517_v30, 5  ;;  %v4770_v50 = vld [vmem:[%s4424_s28 + $0x4c] sm:$0xf]  ;;  %v4786_v24 = vld [vmem:[%s4424_s28 + $0x54] sm:$0xf] }
  0x4f   : > { %v3334_v38 = vcombine.low %v486_v19, %v496_v36  ;;  %v504_v33 = vor.u32 %v503_v27, %v500_v63  ;;  %v1801_v46 = vrot.slane %v4585_v43, 5  ;;  %v1804_v49 = vrot.slane %v4592_v51, 5  ;;  %3971 = vmatpush3.bf16.msra.mxu0 %v4235_v54  ;;  %v4777_v63 = vld [vmem:[%s4424_s28 + $0x50] sm:$0x1]  ;;  %5595 = vst [vmem:[#allocation4_spill] sm:$0xff] %v4786_v24 }
  0x50   : > { %3956 = vmatprep.mubr.msk.bf16.mxu0 %vm578_vm3, %v3504_v57  ;;  %v3490_v17 = vrot.slane %v4728_v26, 9  ;;  %v514_v37 = vor.u32 %v513_v40, %v509_v22  ;;  %v1808_v55 = vrot.slane %v4744_v59, 5  ;;  %v1811_v56 = vrot.slane %v4747_v32, 5  ;;  %3972 = vmatprep.subr.bf16.mxu0 %v4238_v5  ;;  %v4789_v30 = vld [vmem:[%s4424_s28 + $0x58] sm:$0xf] }
  0x51   : > { %3844 = vmatprep.mubr.msk.bf16.mxu1 %vm578_vm3, %v3334_v38  ;;  %v505_v43 = vrot.slane %v504_v33, 4  ;;  %v1802_v51 = vsel %vm4648_vm6, %v3489_v25, %v1801_v46  ;;  %v1803_v54 = vrot.slane %v1801_v46, 4  ;;  %v3348_v19 = vcombine.low %v4427_v8, %v4430_v9  ;;  %5596 = vst [vmem:[#allocation5_spill] sm:$0xff] %v4789_v30  ;;  %v4797_v27 = vld [vmem:[%s4424_s28 + $0x5c] sm:$0x1] }
  0x52   : > { %v515_v60 = vrot.slane %v514_v37, 4  ;;  %v1809_v48 = vsel %vm4648_vm6, %v3490_v17, %v1808_v55  ;;  %v1810_v62 = vrot.slane %v1808_v55, 4  ;;  %5597 = vst [vmem:[#allocation6_spill] sm:$0xff] %v4797_v27  ;;  %v1815_v38 = vrot.slane %v4770_v50, 5  ;;  %v4808_v33 = vld [vmem:[%s4424_s28 + $0x60] sm:$0xf] }
  0x53   : > { %v510_v58 = vsel %vm4463_vm2, %v505_v43, %v509_v22  ;;  %v1805_v7 = vsel %vm4648_vm6, %v1803_v54, %v1804_v49  ;;  %3973 = vmatpush3.bf16.msra.mxu0 %v4238_v5  ;;  %v4794_v5 = vld [vmem:[%s5564_s2 + $0xe0] sm:$0xff]   ;;  %v3491_v22 = vrot.slane %v4767_v34, 9  ;;  %v1818_v40 = vrot.slane %v4777_v63, 5  ;;  %5598 = vst [vmem:[#allocation7_spill] sm:$0xff] %v4808_v33  ;;  %v4818_v55 = vld [vmem:[%s4424_s28 + $0x68] sm:$0x1] }
  0x54   : > { %v520_v16 = vsel %vm4463_vm2, %v515_v60, %v519_v1  ;;  %v3505_v52 = vcombine.low %v1802_v51, %v1805_v7  ;;  %v1812_v3 = vsel %vm4648_vm6, %v1810_v62, %v1811_v56  ;;  %3974 = vmatprep.subr.bf16.mxu0 %v4242_v47  ;;  %v3492_v1 = vrot.slane %v4786_v24, 9  ;;  %v4811_v46 = vld [vmem:[%s4424_s28 + $0x64] sm:$0xf]  ;;  %5600 = vst [vmem:[#allocation9_spill] sm:$0xff] %v4818_v55  ;;  %v5092_v59 = vld [vmem:[%s4424_s28 + $0x6c] sm:$0xf] }
  0x55   : > { %v3335_v36 = vcombine.low %v510_v58, %v520_v16  ;;  %v3506_v57 = vcombine.low %v1809_v48, %v1812_v3  ;;  %v1822_v25 = vrot.slane %v4789_v30, 5  ;;  %5599 = vst [vmem:[#allocation8_spill] sm:$0xff] %v4811_v46  ;;  %v1816_v49 = vsel %vm4648_vm6, %v3491_v22, %v1815_v38  ;;  %v4846_v22 = vld [vmem:[%s4424_s28 + $0x18] sm:$0xf]  ;;  %5612 = vst [vmem:[#allocation17_spill] sm:$0xff] %v5092_v59 }
  0x56   : > { %3957 = vmatmul.mubr.msk.bf16.gmra.mrb[4].mxu0 %vm578_vm3, %v3505_v52  ;;  %v1817_v17 = vrot.slane %v1815_v38, 4  ;;  %v1825_v37 = vrot.slane %v4797_v27, 5  ;;  %v3349_v51 = vcombine.low %v4472_v41, %v4478_v44  ;;  %v1829_v60 = vrot.slane %v4811_v46, 5  ;;  %v4851_v38 = vld [vmem:[%s4424_s28 + $0x1c] sm:$0xf] }
  0x57   : > { %3845 = vmatmul.mubr.msk.bf16.gmra.mrb[12].mxu1 %vm578_vm3, %v3335_v36  ;;  %3960 = vmatprep.mubr.msk.bf16.mxu0 %vm578_vm3, %v3506_v57  ;;  %v1823_v56 = vsel %vm4648_vm6, %v3492_v1, %v1822_v25  ;;  %v1824_v43 = vrot.slane %v1822_v25, 4  ;;  %v1832_v58 = vrot.slane %v4818_v55, 5  ;;  %v3350_v7 = vcombine.low %v4507_v6, %v4512_v14 }
  0x58   : > { %3856 = vmatprep.mubr.msk.bf16.mxu1 %vm578_vm3, %v3348_v19  ;;  %3975 = vmatpush3.bf16.msra.mxu0 %v4242_v47  ;;  %v1819_v54 = vsel %vm4648_vm6, %v1817_v17, %v1818_v40  ;;  %v3493_v47 = vrot.slane %v4808_v33, 9  ;;  %v1831_v52 = vrot.slane %v1829_v60, 4  ;;  %v4241_v19 = vld [vmem:[%s5564_s2 + $0x48] sm:$0xff]   ;;  %v905_v3 = vrot.slane %v4478_v44, 5  ;;  %v4245_v40 = vld [vmem:[%s5564_s2 + $0x50] sm:$0xff]  }
  0x59   : > { %3992 = vmatprep.subr.bf16.mxu0 %v4794_v5  ;;  %v3507_v48 = vcombine.low %v1816_v49, %v1819_v54  ;;  %v1826_v62 = vsel %vm4648_vm6, %v1824_v43, %v1825_v37  ;;  %v908_v44 = vrot.slane %v4481_v45, 5  ;;  %v3351_v25 = vcombine.low %v4550_v0, %v4563_v11  ;;  %v4251_v43 = vld [vmem:[%s5564_s2 + $0x58] sm:$0xff]  }
  0x5a   : > { %v3508_v16 = vcombine.low %v1823_v56, %v1826_v62  ;;  %v1830_v36 = vsel %vm4648_vm6, %v3493_v47, %v1829_v60  ;;  %v1833_v57 = vsel %vm4648_vm6, %v1831_v52, %v1832_v58  ;;  %v3556_v49 = vcombine.low %v4846_v22, %v4851_v38  ;;  %v4866_v56 = vld [vmem:[%s4424_s28 + $0x24] sm:$0xf]  ;;  %v4896_v52 = vld [vmem:[%s4424_s28 + $0x30] sm:$0xf] }
  0x5b   : > { %v3509_v1 = vcombine.low %v1830_v36, %v1833_v57  ;;  %v907_v17 = vrot.slane %v905_v3, 4  ;;  %v901_v37 = vrot.slane %v4433_v10, 5  ;;  %v3352_v45 = vcombine.low %v4595_v53, %v4615_v21  ;;  %5601 = vst [vmem:[#allocation10_spill] sm:$0xff] %v4866_v56  ;;  %5602 = vst [vmem:[#allocation11_spill] sm:$0xff] %v4896_v52 }
  0x5c   : > { %v3370_v54 = vrot.slane %v4507_v6, 9  ;;  %v2267_v60 = vshrl.u32 %v4846_v22, 16  ;;  %v912_v47 = vrot.slane %v4512_v14, 5  ;;  %v915_v58 = vrot.slane %v4521_v28, 5 }
  0x5d   : > { %v2270_v6 = vshll.u32 %v4846_v22, 16  ;;  %v919_v36 = vrot.slane %v4563_v11, 5  ;;  %v933_v62 = vrot.slane %v4642_v2, 5  ;;  %v950_v30 = vrot.slane %v4721_v61, 5 }
  0x5e   : > { %3961 = vmatmul.mubr.msk.bf16.gmra.mrb[8].mxu0 %vm578_vm3, %v3507_v48  ;;  %v4883_v48 = vld [vmem:[%s4424_s28 + $0x28] sm:$0xf]  ;;  %v4902_v14 = vsel %vm4648_vm6, %v3370_v54, %v912_v47  ;;  %v914_v28 = vrot.slane %v912_v47, 4  ;;  %v926_v54 = vrot.slane %v4615_v21, 5 }
  0x5f   : > { %3857 = vmatmul.mubr.msk.bf16.vlgmr.msra.gmra.mrb[0].mxu1 %vm578_vm3, %v3349_v51  ;;  %3964 = vmatprep.mubr.msk.bf16.mxu0 %vm578_vm3, %v3508_v16  ;;  %v3353_v16 = vcombine.low %v4628_v42, %v4642_v2  ;;  %v3557_v57 = vcombine.low %v4866_v56, %v4883_v48  ;;  %v4986_v2 = vld [vmem:[%s4424_s28 + $0x4c] sm:$0xf] }
  0x60   : > { %3873 = vmatpush3.bf16.msra.mxu1 %v4606_v4  ;;  %3860 = vmatprep.mubr.msk.bf16.mxu1 %vm578_vm3, %v3350_v7  ;;  %v3369_v4 = vrot.slane %v4472_v41, 9  ;;  %v4877_v41 = vsel %vm4648_vm6, %v907_v17, %v908_v44  ;;  %v2280_v7 = vshrl.u32 %v4851_v38, 16  ;;  %v2291_v44 = vshrl.u32 %v4866_v56, 16  ;;  %5606 = vst [vmem:[#allocation15_spill] sm:$0xff] %v4986_v2 }
  0x61   : > { %3874 = vmatprep.subr.bf16.mxu1 %v4241_v19  ;;  %v4923_v11 = vsel %vm4648_vm6, %v914_v28, %v915_v58  ;;  %v3368_v58 = vrot.slane %v4427_v8, 9  ;;  %v3373_v17 = vrot.slane %v4628_v42, 9 }
  0x62   : > { %v4873_v51 = vsel %vm4648_vm6, %v3369_v4, %v905_v3  ;;  %v3371_v3 = vrot.slane %v4550_v0, 9  ;;  %v3354_v0 = vcombine.low %v4669_v23, %v4682_v18  ;;  %v921_v4 = vrot.slane %v919_v36, 4 }
  0x63   : > { %v4997_v10 = vsel %vm4648_vm6, %v3373_v17, %v933_v62  ;;  %v2300_v17 = vshll.u32 %v4883_v48, 16 }
  0x64   : > { %3875 = vmatpush3.bf16.msra.mxu1 %v4241_v19  ;;  %v898_v19 = vrot.slane %v4430_v9, 5  ;;  %v4911_v9 = vld [vmem:[%s4424_s28 + $0x34] sm:$0xf] }
  0x65   : > { %3876 = vmatprep.subr.bf16.mxu1 %v4245_v40  ;;  %v3558_v47 = vcombine.low %v4896_v52, %v4911_v9  ;;  %v2328_v42 = vshrl.u32 %v4911_v9, 16 }
  0x66   : > { %3965 = vmatmul.mubr.msk.bf16.gmra.mrb[12].mxu0 %vm578_vm3, %v3509_v1  ;;  %v900_v28 = vrot.slane %v898_v19, 4  ;;  %v4262_v1 = vld [vmem:[%s5564_s2 + $0xf8] sm:$0xff]  }
  0x67   : > { %3861 = vmatmul.mubr.msk.bf16.gmra.mrb[4].mxu1 %vm578_vm3, %v3351_v25  ;;  %3976 = vmatprep.mubr.msk.bf16.mxu0 %vm578_vm3, %v3556_v49  ;;  %v922_v25 = vrot.slane %v4574_v35, 5  ;;  %v4927_v49 = vsel %vm4648_vm6, %v3371_v3, %v919_v36  ;;  %v929_v35 = vrot.slane %v4620_v31, 5  ;;  %v928_v31 = vrot.slane %v926_v54, 4  ;;  %v5019_v36 = vld [vmem:[%s4424_s28 + $0x54] sm:$0xf] }
  0x68   : > { %3864 = vmatprep.mubr.msk.bf16.mxu1 %vm578_vm3, %v3352_v45  ;;  %3877 = vmatpush3.bf16.msra.mxu1 %v4245_v40  ;;  %v4916_v40 = vld [vmem:[%s5564_s2 + $0x60] sm:$0xff]   ;;  %v3372_v45 = vrot.slane %v4595_v53, 9  ;;  %v4253_v53 = vld [vmem:[%s5564_s2 + $0xe8] sm:$0xff]   ;;  %v2330_v46 = vrot.slane %v2328_v42, 4 }
  0x69   : > { %3878 = vmatprep.subr.bf16.mxu1 %v4251_v43  ;;  %v4939_v3 = vsel %vm4648_vm6, %v921_v4, %v922_v25  ;;  %v2276_v4 = vshll.u32 %v4851_v38, 16  ;;  %v4969_v21 = vsel %vm4648_vm6, %v928_v31, %v929_v35  ;;  %v936_v25 = vrot.slane %v4654_v15, 5  ;;  %v4983_v35 = vld [vmem:[%s4424_s28 + $0x48] sm:$0xf]  ;;  %v4258_v15 = vld [vmem:[%s5564_s2 + $0xf0] sm:$0xff]  }
  0x6a   : > { %v4950_v8 = vsel %vm4648_vm6, %v3372_v45, %v926_v54  ;;  %v3355_v45 = vcombine.low %v4706_v20, %v4709_v39  ;;  %v4962_v54 = vld [vmem:[%s4424_s28 + $0x3c] sm:$0xf]  ;;  %5605 = vst [vmem:[#allocation14_spill] sm:$0xff] %v4983_v35  ;;  %v5003_v31 = vld [vmem:[%s4424_s28 + $0x20] sm:$0x1]  ;;  %v2363_v61 = vshrl.u32 %v4983_v35, 16 }
  0x6b   : > { %5603 = vst [vmem:[#allocation12_spill] sm:$0xff] %v4962_v54 }
  0x6c   : > { %3879 = vmatpush3.bf16.msra.mxu1 %v4251_v43 }
  0x6d   : > { %3896 = vmatprep.subr.bf16.mxu1 %v4916_v40 }
  0x6e   : > { %3977 = vmatmul.mubr.msk.bf16.vlgmr.msra.gmra.mrb[0].mxu0 %vm578_vm3, %v3557_v57  ;;  %v4965_v57 = vld [vmem:[%s4424_s28 + $0x40] sm:$0xf] }
  0x6f   : > { %3865 = vmatmul.mubr.msk.bf16.gmra.mrb[8].mxu1 %vm578_vm3, %v3353_v16  ;;  %3993 = vmatpush3.bf16.msra.mxu0 %v4794_v5  ;;  %5604 = vst [vmem:[#allocation13_spill] sm:$0xff] %v4965_v57  ;;  %v899_v5 = vsel %vm4648_vm6, %v3368_v58, %v898_v19  ;;  %v902_v16 = vsel %vm4648_vm6, %v900_v28, %v901_v37  ;;  %v2269_v19 = vrot.slane %v2267_v60, 4  ;;  %v935_v37 = vrot.slane %v933_v62, 4 }
  0x70   : > { %3868 = vmatprep.mubr.msk.bf16.mxu1 %vm578_vm3, %v3354_v0  ;;  %3980 = vmatprep.mubr.msk.bf16.mxu0 %vm578_vm3, %v3558_v47  ;;  %v2272_v47 = vrot.slane %v2270_v6, 5  ;;  %v3559_v58 = vcombine.low %v4962_v54, %v4965_v57  ;;  %v5005_v0 = vrot.slane %v2276_v4, 5  ;;  %v2282_v60 = vrot.slane %v2280_v7, 4  ;;  %v5038_v7 = vld [vmem:[%s4424_s28 + $0x64] sm:$0xf] }
  0x71   : > { %3994 = vmatprep.subr.bf16.mxu0 %v4253_v53  ;;  %v3560_v6 = vcombine.low %v4983_v35, %v4986_v2  ;;  %v5013_v62 = vsel %vm4648_vm6, %v935_v37, %v936_v25  ;;  %v3374_v28 = vrot.slane %v4669_v23, 9  ;;  %v3384_v43 = vcombine.low %v899_v5, %v902_v16  ;;  %v5026_v37 = vld [vmem:[%s4424_s28 + $0x58] sm:$0xf]  ;;  %v5035_v16 = vld [vmem:[%s4424_s28 + $0x60] sm:$0xf] }
  0x72   : > { %v2273_v23 = vor.u32 %v2272_v47, %v2269_v19  ;;  %v2286_v4 = vshll.u32 %v5003_v31, 16  ;;  %v943_v5 = vrot.slane %v4687_v13, 5  ;;  %5607 = vst [vmem:[#allocation16_spill] sm:$0xff] %v5035_v16  ;;  %v2293_v25 = vrot.slane %v2291_v44, 4 }
  0x73   : > { %3995 = vmatpush3.bf16.msra.mxu0 %v4253_v53  ;;  %v940_v53 = vrot.slane %v4682_v18, 5  ;;  %v2283_v18 = vor.u32 %v2282_v60, %v5005_v0  ;;  %v5608_v13 = vshll.u32 %v4866_v56, 16  ;;  %v5609_v60 = vshrl.u32 %v4883_v48, 16 }
  0x74   : > { %3996 = vmatprep.subr.bf16.mxu0 %v4258_v15  ;;  %v2324_v44 = vshll.u32 %v4911_v9, 16  ;;  %v2288_v32 = vrot.slane %v2286_v4, 5  ;;  %v2366_v4 = vshll.u32 %v4983_v35, 16 }
  0x75   : > { %v5045_v55 = vsel %vm4648_vm6, %v3374_v28, %v940_v53  ;;  %v942_v19 = vrot.slane %v940_v53, 4  ;;  %v2296_v47 = vrot.slane %v5608_v13, 5  ;;  %v2306_v27 = vrot.slane %v5609_v60, 4 }
  0x76   : > { %3981 = vmatmul.mubr.msk.bf16.gmra.mrb[4].mxu0 %vm578_vm3, %v3559_v58  ;;  %v5051_v58 = vrot.slane %v2300_v17, 5  ;;  %v5610_v28 = vshrl.u32 %v4896_v52, 16  ;;  %v5611_v53 = vshll.u32 %v4896_v52, 16  ;;  %v3375_v13 = vrot.slane %v4706_v20, 9 }
  0x77   : > { %3869 = vmatmul.mubr.msk.bf16.gmra.mrb[12].mxu1 %vm578_vm3, %v3355_v45  ;;  %3984 = vmatprep.mubr.msk.bf16.mxu0 %vm578_vm3, %v3560_v6  ;;  %v5059_v45 = vsel %vm4648_vm6, %v942_v19, %v943_v5  ;;  %v3561_v60 = vcombine.low %v5019_v36, %v5026_v37  ;;  %v5076_v5 = vld [vmem:[%s4424_s28 + $0x2c] sm:$0x1]  ;;  %v947_v20 = vrot.slane %v4709_v39, 5  ;;  %v5084_v33 = vrot.slane %v2324_v44, 5  ;;  %v5095_v19 = vld [vmem:[%s4424_s28 + $0x70] sm:$0xf] }
  0x78   : > { %3880 = vmatprep.mubr.msk.bf16.mxu1 %vm578_vm3, %v3384_v43  ;;  %3997 = vmatpush3.bf16.msra.mxu0 %v4258_v15  ;;  %v2317_v6 = vrot.slane %v5610_v28, 4  ;;  %v2320_v17 = vrot.slane %v5611_v53, 5  ;;  %v3562_v43 = vcombine.low %v5035_v16, %v5038_v7  ;;  %v5073_v15 = vld [vmem:[%s5564_s2 + $0x100] sm:$0xff]   ;;  %v2274_v28 = vrot.slane %v2273_v23, 4  ;;  %v5082_v53 = vld [vmem:[%s4424_s28 + $0x38] sm:$0x1] }
  0x79   : > { %3998 = vmatprep.subr.bf16.mxu0 %v4262_v1  ;;  %v2284_v24 = vrot.slane %v2283_v18, 4  ;;  %v5089_v52 = vsel %vm4648_vm6, %v3375_v13, %v947_v20  ;;  %v949_v56 = vrot.slane %v947_v20, 4  ;;  %v2297_v39 = vor.u32 %v2296_v47, %v2293_v25  ;;  %v4260_v18 = vld [vmem:[%s5564_s2 + $0x68] sm:$0xff]  }
  0x7a   : > { %v2307_v23 = vor.u32 %v2306_v27, %v5051_v58  ;;  %v2310_v44 = vshll.u32 %v5076_v5, 16  ;;  %v2321_v42 = vor.u32 %v2320_v17, %v2317_v6  ;;  %v2334_v13 = vshll.u32 %v5082_v53, 16 }
  0x7b   : > { %v2376_v27 = vshrl.u32 %v4986_v2, 16  ;;  %v2331_v25 = vor.u32 %v2330_v46, %v5084_v33  ;;  %v2348_v6 = vshll.u32 %v4965_v57, 16  ;;  %v5613_v17 = vcombine.low %v4873_v51, %v4877_v41 }
  0x7c   : > { %3999 = vmatpush3.bf16.msra.mxu0 %v4262_v1  ;;  %v5108_v1 = vsel %vm4648_vm6, %v949_v56, %v950_v30  ;;  %v3563_v30 = vcombine.low %v5092_v59, %v5095_v19  ;;  %v2279_v56 = vsel %vm4463_vm2, %v2274_v28, %v5005_v0  ;;  %v2289_v46 = vsel %vm4463_vm2, %v2284_v24, %v2288_v32  ;;  %v4264_v0 = vld [vmem:[%s5564_s2 + $0x70] sm:$0xff]  }
  0x7d   : > { %4016 = vmatprep.subr.bf16.mxu0 %v5073_v15  ;;  %v5614_v51 = vcombine.low %v4902_v14, %v4923_v11  ;;  %v2298_v41 = vrot.slane %v2297_v39, 4  ;;  %v2312_v20 = vrot.slane %v2310_v44, 5  ;;  %v2336_v28 = vrot.slane %v2334_v13, 5 }
  0x7e   : > { %3985 = vmatmul.mubr.msk.bf16.gmra.mrb[8].mxu0 %vm578_vm3, %v3561_v60  ;;  %v2372_v60 = vshll.u32 %v4986_v2, 16  ;;  %v5615_v32 = vshrl.u32 %v4962_v54, 16  ;;  %v5617_v14 = vshrl.u32 %v4965_v57, 16  ;;  %v2332_v39 = vrot.slane %v2331_v25, 4  ;;  %v5155_v25 = vld [vmem:[%s4424_s28 + $0x50] sm:$0x1] }
  0x7f   : > { %3881 = vmatmul.mubr.msk.bf16.vlgmr.msra.gmra.mrb[0].mxu1 %vm578_vm3, %v5613_v17  ;;  %3988 = vmatprep.mubr.msk.bf16.mxu0 %vm578_vm3, %v3562_v43  ;;  %v2308_v43 = vrot.slane %v2307_v23, 4  ;;  %v2322_v17 = vrot.slane %v2321_v42, 4  ;;  %v5144_v23 = vld [vmem:[%s4424_s28 + $0x44] sm:$0x1]  ;;  %v5146_v44 = vrot.slane %v2348_v6, 5  ;;  %v2365_v42 = vrot.slane %v2363_v61, 4 }
  0x80   : > { %3897 = vmatpush3.bf16.msra.mxu1 %v4916_v40  ;;  %3884 = vmatprep.mubr.msk.bf16.mxu1 %vm578_vm3, %v5614_v51  ;;  %v2341_v24 = vrot.slane %v5615_v32, 4  ;;  %v5616_v40 = vshll.u32 %v4962_v54, 16  ;;  %v2354_v11 = vrot.slane %v5617_v14, 4  ;;  %v2368_v51 = vrot.slane %v2366_v4, 5 }
  0x81   : > { %3898 = vmatprep.subr.bf16.mxu1 %v4260_v18  ;;  %v3584_v35 = vcombine.low %v2279_v56, %v2289_v46  ;;  %v5148_v2 = vrot.slane %v2372_v60, 5  ;;  %v2378_v13 = vrot.slane %v2376_v27, 4  ;;  %v2387_v32 = vshrl.u32 %v5019_v36, 16  ;;  %v4266_v27 = vld [vmem:[%s5564_s2 + $0x78] sm:$0xff]  }
  0x82   : > { %v2344_v47 = vrot.slane %v5616_v40, 5  ;;  %v2390_v54 = vshll.u32 %v5019_v36, 16  ;;  %v2400_v40 = vshrl.u32 %v5026_v37, 16  ;;  %v2411_v57 = vshrl.u32 %v5035_v16, 16 }
  0x83   : > { %v2303_v61 = vsel %vm4463_vm2, %v2298_v41, %v5051_v58  ;;  %v2313_v4 = vsel %vm4463_vm2, %v2308_v43, %v2312_v20  ;;  %v2358_v56 = vshll.u32 %v5144_v23, 16  ;;  %v2337_v46 = vsel %vm4463_vm2, %v2332_v39, %v2336_v28 }
  0x84   : > { %3899 = vmatpush3.bf16.msra.mxu1 %v4260_v18  ;;  %v2345_v6 = vor.u32 %v2344_v47, %v2341_v24  ;;  %v2327_v18 = vsel %vm4463_vm2, %v2322_v17, %v5084_v33  ;;  %v2355_v58 = vor.u32 %v2354_v11, %v5146_v44  ;;  %v2369_v60 = vor.u32 %v2368_v51, %v2365_v42 }
  0x85   : > { %3900 = vmatprep.subr.bf16.mxu1 %v4264_v0  ;;  %v2414_v41 = vshll.u32 %v5035_v16, 16  ;;  %v5618_v43 = vcombine.low %v4927_v49, %v4939_v3  ;;  %v2379_v47 = vor.u32 %v2378_v13, %v5148_v2  ;;  %v2396_v33 = vshll.u32 %v5026_v37, 16  ;;  %v5191_v16 = vld [vmem:[%s4424_s28 + $0x5c] sm:$0x1] }
  0x86   : > { %3989 = vmatmul.mubr.msk.bf16.gmra.mrb[12].mxu0 %vm578_vm3, %v3563_v30  ;;  %v2382_v30 = vshll.u32 %v5155_v25, 16  ;;  %v2424_v20 = vshrl.u32 %v5038_v7, 16  ;;  %v2435_v17 = vshrl.u32 %v5092_v59, 16  ;;  %v2438_v28 = vshll.u32 %v5092_v59, 16 }
  0x87   : > { %3885 = vmatmul.mubr.msk.bf16.gmra.mrb[4].mxu1 %vm578_vm3, %v5618_v43  ;;  %4000 = vmatprep.mubr.msk.bf16.mxu0 %vm578_vm3, %v3584_v35  ;;  %v5619_v49 = vcombine.low %v4950_v8, %v4969_v21  ;;  %v2420_v3 = vshll.u32 %v5038_v7, 16  ;;  %v3585_v35 = vcombine.low %v2303_v61, %v2313_v4  ;;  %v3586_v24 = vcombine.low %v2327_v18, %v2337_v46 }
  0x88   : > { %3901 = vmatpush3.bf16.msra.mxu1 %v4264_v0  ;;  %v2346_v14 = vrot.slane %v2345_v6, 4  ;;  %v2360_v11 = vrot.slane %v2358_v56, 5  ;;  %v2356_v39 = vrot.slane %v2355_v58, 4  ;;  %v2370_v42 = vrot.slane %v2369_v60, 4  ;;  %v5196_v0 = vld [vmem:[%s4424_s28 + $0x68] sm:$0x1] }
  0x89   : > { %3888 = vmatprep.mubr.msk.bf16.mxu1 %vm578_vm3, %v5619_v49  ;;  %3902 = vmatprep.subr.bf16.mxu1 %v4266_v27  ;;  %v2389_v51 = vrot.slane %v2387_v32, 4  ;;  %v2392_v13 = vrot.slane %v2390_v54, 5  ;;  %v2380_v43 = vrot.slane %v2379_v47, 4  ;;  %v2384_v59 = vrot.slane %v2382_v30, 5  ;;  %v4267_v54 = vld [vmem:[%s5564_s2 + $0x108] sm:$0xff]  }
  0x8a   : > { %v5193_v21 = vrot.slane %v2396_v33, 5  ;;  %v2402_v8 = vrot.slane %v2400_v40, 4  ;;  %v2413_v49 = vrot.slane %v2411_v57, 4  ;;  %v2416_v61 = vrot.slane %v2414_v41, 5  ;;  %v5210_v40 = vld [vmem:[%s5564_s2 + $0x80] sm:$0xff]  }
  0x8b   : > { %v5198_v4 = vrot.slane %v2420_v3, 5  ;;  %v2426_v6 = vrot.slane %v2424_v20, 4  ;;  %v2448_v56 = vshrl.u32 %v5095_v19, 16  ;;  %v2351_v32 = vsel %vm4463_vm2, %v2346_v14, %v5146_v44 }
  0x8c   : > { %3903 = vmatpush3.bf16.msra.mxu1 %v4266_v27  ;;  %v2444_v57 = vshll.u32 %v5095_v19, 16  ;;  %v2361_v27 = vsel %vm4463_vm2, %v2356_v39, %v2360_v11  ;;  %v2375_v18 = vsel %vm4463_vm2, %v2370_v42, %v5148_v2  ;;  %v2393_v46 = vor.u32 %v2392_v13, %v2389_v51  ;;  %v4279_v11 = vld [vmem:[%s4424_s28 + $0xc] sm:$0xf]  ;;  %v4280_v39 = vld [vmem:[%s4424_s28 + $0x10] sm:$0xf] }
  0x8d   : > { %4040 = vmatprep.subr.bf16.mxu1 %v5210_v40  ;;  %v2406_v44 = vshll.u32 %v5191_v16, 16  ;;  %v5620_v58 = vcombine.low %v4997_v10, %v5013_v62  ;;  %v2385_v60 = vsel %vm4463_vm2, %v2380_v43, %v2384_v59  ;;  %v2403_v41 = vor.u32 %v2402_v8, %v5193_v21  ;;  %v4269_v59 = vld [vmem:[%s5564_s2 + $0x110] sm:$0xff]  }
  0x8e   : > { %4001 = vmatmul.mubr.msk.bf16.vlgmr.msra.gmra.mrb[0].mxu0 %vm578_vm3, %v3585_v35  ;;  %v2430_v47 = vshll.u32 %v5196_v0, 16  ;;  %v3443_v2 = vcombine.low %v4767_v34, %v4770_v50  ;;  %v5621_v30 = vcombine.low %v5045_v55, %v5059_v45  ;;  %v2417_v10 = vor.u32 %v2416_v61, %v2413_v49  ;;  %v5250_v51 = vld [vmem:[%s4424_s28 + $0x74] sm:$0x1] }
  0x8f   : > { %3889 = vmatmul.mubr.msk.bf16.gmra.mrb[8].mxu1 %vm578_vm3, %v5620_v58  ;;  %4017 = vmatpush3.bf16.msra.mxu0 %v5073_v15  ;;  %v2427_v62 = vor.u32 %v2426_v6, %v5198_v4  ;;  %v2437_v15 = vrot.slane %v2435_v17, 4  ;;  %v2440_v33 = vrot.slane %v2438_v28, 5  ;;  %v1505_v20 = vshrl.u32 %v4767_v34, 16 }
  0x90   : > { %3892 = vmatprep.mubr.msk.bf16.mxu1 %vm578_vm3, %v5621_v30  ;;  %4004 = vmatprep.mubr.msk.bf16.mxu0 %vm578_vm3, %v3586_v24  ;;  %v1508_v55 = vshll.u32 %v4767_v34, 16  ;;  %v5243_v45 = vrot.slane %v2444_v57, 5  ;;  %v2450_v3 = vrot.slane %v2448_v56, 4  ;;  %v1514_v35 = vshll.u32 %v4770_v50, 16  ;;  %v4272_v56 = vld [vmem:[%s5564_s2 + $0x118] sm:$0xff]  }
  0x91   : > { %4018 = vmatprep.subr.bf16.mxu0 %v4267_v54  ;;  %v1518_v24 = vshrl.u32 %v4770_v50, 16  ;;  %v3587_v14 = vcombine.low %v2351_v32, %v2361_v27  ;;  %v3438_v42 = vcombine.low %v4279_v11, %v4280_v39  ;;  %v3588_v17 = vcombine.low %v2375_v18, %v2385_v60 }
  0x92   : > { %v2394_v28 = vrot.slane %v2393_v46, 4  ;;  %v2404_v13 = vrot.slane %v2403_v41, 4  ;;  %v2408_v43 = vrot.slane %v2406_v44, 5  ;;  %v2418_v8 = vrot.slane %v2417_v10, 4 }
  0x93   : > { %4019 = vmatpush3.bf16.msra.mxu0 %v4267_v54  ;;  %v2428_v49 = vrot.slane %v2427_v62, 4  ;;  %v2432_v61 = vrot.slane %v2430_v47, 5  ;;  %v2441_v6 = vor.u32 %v2440_v33, %v2437_v15  ;;  %v2451_v32 = vor.u32 %v2450_v3, %v5243_v45  ;;  %v4282_v33 = vld [vmem:[%s4424_s28 + $0x1c] sm:$0xf] }
  0x94   : > { %4020 = vmatprep.subr.bf16.mxu0 %v4269_v59  ;;  %v2454_v57 = vshll.u32 %v5250_v51, 16  ;;  %v1507_v27 = vrot.slane %v1505_v20, 4  ;;  %v1510_v58 = vrot.slane %v1508_v55, 5  ;;  %v2662_v54 = vrot.slane %v4851_v38, 5 }
  0x95   : > { %v1516_v18 = vrot.slane %v1514_v35, 5  ;;  %v1524_v46 = vshll.u32 %v4777_v63, 16  ;;  %v5622_v44 = vcombine.low %v5089_v52, %v5108_v1  ;;  %v2399_v60 = vsel %vm4463_vm2, %v2394_v28, %v5193_v21  ;;  %v4283_v35 = vld [vmem:[%s4424_s28 + $0x24] sm:$0xf] }
  0x96   : > { %4005 = vmatmul.mubr.msk.bf16.gmra.mrb[4].mxu0 %vm578_vm3, %v3587_v14  ;;  %v2409_v41 = vsel %vm4463_vm2, %v2404_v13, %v2408_v43  ;;  %v1520_v38 = vrot.slane %v1518_v24, 4  ;;  %v2423_v63 = vsel %vm4463_vm2, %v2418_v8, %v5198_v4  ;;  %v2433_v52 = vsel %vm4463_vm2, %v2428_v49, %v2432_v61  ;;  %v4284_v24 = vld [vmem:[%s4424_s28 + $0x28] sm:$0xf]  ;;  %v5623_v49 = vld [vmem:[#allocation2_spill] sm:$0xff] }
  0x97   : > { %3893 = vmatmul.mubr.msk.bf16.gmra.mrb[12].mxu1 %vm578_vm3, %v5622_v44  ;;  %4008 = vmatprep.mubr.msk.bf16.mxu0 %vm578_vm3, %v3588_v17  ;;  %v2442_v1 = vrot.slane %v2441_v6, 4  ;;  %v2452_v21 = vrot.slane %v2451_v32, 4  ;;  %v2456_v47 = vrot.slane %v2454_v57, 5  ;;  %v3604_v30 = vrot.slane %v4846_v22, 9  ;;  %v5624_v57 = vld [vmem:[#allocation10_spill] sm:$0xff]  ;;  %v5625_v44 = vld [vmem:[#allocation11_spill] sm:$0xff] }
  0x98   : > { %3904 = vmatprep.mubr.msk.bf16.mxu1 %vm578_vm3, %v3438_v42  ;;  %4021 = vmatpush3.bf16.msra.mxu0 %v4269_v59  ;;  %v3589_v10 = vcombine.low %v2399_v60, %v2409_v41  ;;  %v2664_v62 = vrot.slane %v2662_v54, 4  ;;  %v2665_v15 = vrot.slane %v5003_v31, 5  ;;  %v4281_v59 = vld [vmem:[%s4424_s28 + $0x18] sm:$0xf]  ;;  %v3590_v55 = vcombine.low %v2423_v63, %v2433_v52 }
  0x99   : > { %4022 = vmatprep.subr.bf16.mxu0 %v4272_v56  ;;  %v3439_v20 = vcombine.low %v4281_v59, %v4282_v33  ;;  %v1511_v4 = vor.u32 %v1510_v58, %v1507_v27  ;;  %v1526_v3 = vrot.slane %v1524_v46, 5  ;;  %v3440_v14 = vcombine.low %v4283_v35, %v4284_v24  ;;  %v5626_v59 = vld [vmem:[#allocation13_spill] sm:$0xff]  ;;  %v5628_v35 = vld [vmem:[#allocation15_spill] sm:$0xff] }
  0x9a   : > { %v2447_v11 = vsel %vm4463_vm2, %v2442_v1, %v5243_v45  ;;  %v1521_v39 = vor.u32 %v1520_v38, %v1516_v18  ;;  %v2457_v22 = vsel %vm4463_vm2, %v2452_v21, %v2456_v47  ;;  %v2663_v31 = vsel %vm4648_vm6, %v3604_v30, %v2662_v54  ;;  %v4287_v54 = vld [vmem:[%s5564_s2 + $0x88] sm:$0xff]  }
  0x9b   : > { %v2669_v42 = vrot.slane %v4883_v48, 5  ;;  %v1512_v17 = vrot.slane %v1511_v4, 4  ;;  %v2666_v28 = vsel %vm4648_vm6, %v2664_v62, %v2665_v15  ;;  %v2676_v45 = vrot.slane %v4911_v9, 5  ;;  %v4285_v9 = vld [vmem:[%s4424_s28 + $0x30] sm:$0xf] }
  0x9c   : > { %4023 = vmatpush3.bf16.msra.mxu0 %v4272_v56  ;;  %v1481_v13 = vshrl.u32 %v4728_v26, 16  ;;  %v1522_v43 = vrot.slane %v1521_v39, 4  ;;  %v1484_v8 = vshll.u32 %v4728_v26, 16  ;;  %v1490_v48 = vshll.u32 %v5623_v49, 16  ;;  %v4286_v56 = vld [vmem:[%s4424_s28 + $0x34] sm:$0xf] }
  0x9d   : > { %v1494_v61 = vshrl.u32 %v5623_v49, 16  ;;  %v1517_v6 = vsel %vm4463_vm2, %v1512_v17, %v1516_v18  ;;  %v3441_v32 = vcombine.low %v4285_v9, %v4286_v56  ;;  %v3605_v27 = vrot.slane %v5624_v57, 9 }
  0x9e   : > { %4009 = vmatmul.mubr.msk.bf16.gmra.mrb[8].mxu0 %vm578_vm3, %v3589_v10  ;;  %v1527_v58 = vsel %vm4463_vm2, %v1522_v43, %v1526_v3  ;;  %v2671_v46 = vrot.slane %v2669_v42, 4  ;;  %v2672_v18 = vrot.slane %v5076_v5, 5  ;;  %v3591_v41 = vcombine.low %v2447_v11, %v2457_v22  ;;  %v4288_v5 = vld [vmem:[%s5564_s2 + $0x90] sm:$0xff]  }
  0x9f   : > { %3905 = vmatmul.mubr.msk.bf16.vlgmr.msra.gmra.mrb[0].mxu1 %vm578_vm3, %v3439_v20  ;;  %4012 = vmatprep.mubr.msk.bf16.mxu0 %vm578_vm3, %v3590_v55  ;;  %v5314_v60 = vcombine.low %v1517_v6, %v1527_v58  ;;  %v3620_v38 = vcombine.low %v2663_v31, %v2666_v28  ;;  %v2678_v63 = vrot.slane %v2676_v45, 4  ;;  %v2679_v52 = vrot.slane %v5082_v53, 5  ;;  %v5627_v20 = vld [vmem:[#allocation3_spill] sm:$0xff]  ;;  %v5629_v11 = vld [vmem:[#allocation12_spill] sm:$0xff]  ;;  %v4289_v31 = vld [vmem:[%s5564_s2 + $0x98] sm:$0xff]  }
  0xa0   : > { %4044 = vmatpush3.bf16.msra.mxu1 %v5210_v40  ;;  %3908 = vmatprep.mubr.msk.bf16.mxu1 %vm578_vm3, %v3440_v14  ;;  %v3606_v40 = vrot.slane %v5625_v44, 9  ;;  %v1483_v1 = vrot.slane %v1481_v13, 4  ;;  %v1486_v21 = vrot.slane %v1484_v8, 5  ;;  %v5317_v47 = vrot.slane %v1490_v48, 5  ;;  %v5634_v58 = vld [vmem:[#allocation7_spill] sm:$0xff] }
  0xa1   : > { %4041 = vmatprep.subr.bf16.mxu1 %v4287_v54  ;;  %v1496_v30 = vrot.slane %v1494_v61, 4  ;;  %v3442_v10 = vcombine.low %v4728_v26, %v5623_v49  ;;  %v2670_v62 = vsel %vm4648_vm6, %v3605_v27, %v2669_v42  ;;  %v2673_v53 = vsel %vm4648_vm6, %v2671_v46, %v2672_v18  ;;  %v5630_v42 = vld [vmem:[#allocation4_spill] sm:$0xff]  ;;  %v5632_v61 = vld [vmem:[#allocation14_spill] sm:$0xff] }
  0xa2   : > { %v2677_v15 = vsel %vm4648_vm6, %v3606_v40, %v2676_v45  ;;  %v2683_v33 = vrot.slane %v5626_v59, 5  ;;  %v1500_v26 = vshll.u32 %v5627_v20, 16  ;;  %v2680_v55 = vsel %vm4648_vm6, %v2678_v63, %v2679_v52  ;;  %v5631_v45 = vld [vmem:[#allocation5_spill] sm:$0xff]  ;;  %v5633_v27 = vld [vmem:[#allocation8_spill] sm:$0xff] }
  0xa3   : > { %v1487_v4 = vor.u32 %v1486_v21, %v1483_v1  ;;  %v1497_v3 = vor.u32 %v1496_v30, %v5317_v47  ;;  %v2690_v24 = vrot.slane %v5628_v35, 5  ;;  %v3621_v14 = vcombine.low %v2670_v62, %v2673_v53  ;;  %v5635_v62 = vld [vmem:[#allocation6_spill] sm:$0xff] }
  0xa4   : > { %4045 = vmatpush3.bf16.msra.mxu1 %v4287_v54  ;;  %v3607_v39 = vrot.slane %v5629_v11, 9  ;;  %v2686_v22 = vrot.slane %v5144_v23, 5  ;;  %v1529_v17 = vshrl.u32 %v5630_v42, 16  ;;  %v1532_v28 = vshll.u32 %v5630_v42, 16 }
  0xa5   : > { %4042 = vmatprep.subr.bf16.mxu1 %v4288_v5  ;;  %v1538_v13 = vshll.u32 %v5631_v45, 16  ;;  %v1542_v43 = vshrl.u32 %v5631_v45, 16  ;;  %v3622_v8 = vcombine.low %v2677_v15, %v2680_v55  ;;  %v2685_v49 = vrot.slane %v2683_v33, 4 }
  0xa6   : > { %4013 = vmatmul.mubr.msk.bf16.gmra.mrb[12].mxu0 %vm578_vm3, %v3591_v41  ;;  %v1502_v48 = vrot.slane %v1500_v26, 5  ;;  %v3608_v6 = vrot.slane %v5632_v61, 9  ;;  %v1488_v9 = vrot.slane %v1487_v4, 4  ;;  %v1498_v23 = vrot.slane %v1497_v3, 4  ;;  %v5636_v26 = vld [vmem:[#allocation16_spill] sm:$0xff] }
  0xa7   : > { %3909 = vmatmul.mubr.msk.bf16.gmra.mrb[4].mxu1 %vm578_vm3, %v3441_v32  ;;  %4024 = vmatprep.mubr.msk.bf16.mxu0 %vm578_vm3, %v3620_v38  ;;  %v2692_v56 = vrot.slane %v2690_v24, 4  ;;  %v2693_v32 = vrot.slane %v5155_v25, 5  ;;  %v3444_v57 = vcombine.low %v5630_v42, %v5631_v45  ;;  %v3445_v54 = vcombine.low %v5634_v58, %v5633_v27 }
  0xa8   : > { %3912 = vmatprep.mubr.msk.bf16.mxu1 %vm578_vm3, %v3442_v10  ;;  %4046 = vmatpush3.bf16.msra.mxu1 %v4288_v5  ;;  %v1531_v46 = vrot.slane %v1529_v17, 4  ;;  %v1534_v18 = vrot.slane %v1532_v28, 5  ;;  %v1540_v44 = vrot.slane %v1538_v13, 5  ;;  %v1544_v40 = vrot.slane %v1542_v43, 4  ;;  %v5637_v13 = vld [vmem:[#allocation9_spill] sm:$0xff] }
  0xa9   : > { %4043 = vmatprep.subr.bf16.mxu1 %v4289_v31  ;;  %v2684_v41 = vsel %vm4648_vm6, %v3607_v39, %v2683_v33  ;;  %v2687_v38 = vsel %vm4648_vm6, %v2685_v49, %v2686_v22  ;;  %v2691_v25 = vsel %vm4648_vm6, %v3608_v6, %v2690_v24  ;;  %v2697_v63 = vrot.slane %v5026_v37, 5  ;;  %v5638_v6 = vld [vmem:[#allocation17_spill] sm:$0xff] }
  0xaa   : > { %v1493_v52 = vsel %vm4463_vm2, %v1488_v9, %v5317_v47  ;;  %v1503_v1 = vsel %vm4463_vm2, %v1498_v23, %v1502_v48  ;;  %v2694_v21 = vsel %vm4648_vm6, %v2692_v56, %v2693_v32  ;;  %v2704_v30 = vrot.slane %v5038_v7, 5 }
  0xab   : > { %v1553_v34 = vshrl.u32 %v5634_v58, 16  ;;  %v1556_v50 = vshll.u32 %v5634_v58, 16  ;;  %v1562_v37 = vshll.u32 %v5633_v27, 16  ;;  %v3623_v10 = vcombine.low %v2684_v41, %v2687_v38 }
  0xac   : > { %4047 = vmatpush3.bf16.msra.mxu1 %v4289_v31  ;;  %v1535_v47 = vor.u32 %v1534_v18, %v1531_v46  ;;  %v1545_v5 = vor.u32 %v1544_v40, %v1540_v44  ;;  %v1548_v53 = vshll.u32 %v5635_v62, 16  ;;  %v3624_v15 = vcombine.low %v2691_v25, %v2694_v21 }
  0xad   : > { %v3609_v59 = vrot.slane %v5019_v36, 9  ;;  %v2699_v33 = vrot.slane %v2697_v63, 4  ;;  %v2700_v7 = vrot.slane %v5191_v16, 5  ;;  %v3470_v20 = vcombine.low %v1493_v52, %v1503_v1 }
  0xae   : > { %4025 = vmatmul.mubr.msk.bf16.vlgmr.msra.gmra.mrb[0].mxu0 %vm578_vm3, %v3621_v14  ;;  %v3610_v55 = vrot.slane %v5636_v26, 9  ;;  %v2706_v4 = vrot.slane %v2704_v30, 4  ;;  %v2707_v3 = vrot.slane %v5196_v0, 5  ;;  %v1555_v35 = vrot.slane %v1553_v34, 4 }
  0xaf   : > { %3913 = vmatmul.mubr.msk.bf16.gmra.mrb[8].mxu1 %vm578_vm3, %v3443_v2  ;;  %4028 = vmatprep.mubr.msk.bf16.mxu0 %vm578_vm3, %v3622_v8  ;;  %v1566_v2 = vshrl.u32 %v5633_v27, 16  ;;  %v1558_v24 = vrot.slane %v1556_v50, 5  ;;  %v1564_v14 = vrot.slane %v1562_v37, 5  ;;  %v1536_v39 = vrot.slane %v1535_v47, 4 }
  0xb0   : > { %3916 = vmatprep.mubr.msk.bf16.mxu1 %vm578_vm3, %v3444_v57  ;;  %v1546_v22 = vrot.slane %v1545_v5, 4  ;;  %v1550_v31 = vrot.slane %v1548_v53, 5  ;;  %v2698_v36 = vsel %vm4648_vm6, %v3609_v59, %v2697_v63  ;;  %v2701_v16 = vsel %vm4648_vm6, %v2699_v33, %v2700_v7 }
  0xb1   : > { %v1568_v11 = vrot.slane %v1566_v2, 4  ;;  %v2705_v0 = vsel %vm4648_vm6, %v3610_v55, %v2704_v30  ;;  %v2711_v42 = vrot.slane %v5095_v19, 5  ;;  %v2708_v17 = vsel %vm4648_vm6, %v2706_v4, %v2707_v3 }
  0xb2   : > { %v1559_v28 = vor.u32 %v1558_v24, %v1555_v35  ;;  %v1572_v43 = vshll.u32 %v5637_v13, 16  ;;  %v1541_v8 = vsel %vm4463_vm2, %v1536_v39, %v1540_v44  ;;  %v1551_v49 = vsel %vm4463_vm2, %v1546_v22, %v1550_v31 }
  0xb3   : > { %v1569_v45 = vor.u32 %v1568_v11, %v1564_v14  ;;  %v3625_v48 = vcombine.low %v2698_v36, %v2701_v16  ;;  %v3626_v61 = vcombine.low %v2705_v0, %v2708_v17  ;;  %v3611_v9 = vrot.slane %v5638_v6, 9 }
  0xb4   : > { %v2713_v19 = vrot.slane %v2711_v42, 4  ;;  %v2714_v23 = vrot.slane %v5250_v51, 5  ;;  %v3472_v56 = vcombine.low %v1541_v8, %v1551_v49  ;;  %v1560_v32 = vrot.slane %v1559_v28, 4 }
  0xb5   : > { %v1570_v57 = vrot.slane %v1569_v45, 4  ;;  %v1574_v27 = vrot.slane %v1572_v43, 5  ;;  %v2712_v58 = vsel %vm4648_vm6, %v3611_v9, %v2711_v42 }
  0xb6   : > { %4029 = vmatmul.mubr.msk.bf16.gmra.mrb[4].mxu0 %vm578_vm3, %v3623_v10  ;;  %v1565_v51 = vsel %vm4463_vm2, %v1560_v32, %v1564_v14 }
  0xb7   : > { %3917 = vmatmul.mubr.msk.bf16.gmra.mrb[12].mxu1 %vm578_vm3, %v3445_v54  ;;  %4032 = vmatprep.mubr.msk.bf16.mxu0 %vm578_vm3, %v3624_v15  ;;  %v2715_v54 = vsel %vm4648_vm6, %v2713_v19, %v2714_v23  ;;  %v1575_v46 = vsel %vm4463_vm2, %v1570_v57, %v1574_v27  ;;  %v5449_v19 = vld [vmem:[%s5565_s3] ss:$0 sm:$0xff] }
  0xb8   : > { %3936 = vmatprep.mubr.msk.bf16.mxu1 %vm578_vm3, %v3470_v20  ;;  %v3627_v18 = vcombine.low %v2712_v58, %v2715_v54  ;;  %v3473_v44 = vcombine.low %v1565_v51, %v1575_v46 }
  0xbe   : > { %4033 = vmatmul.mubr.msk.bf16.gmra.mrb[8].mxu0 %vm578_vm3, %v3625_v48  ;;  %v3709_v48 = vld [vmem:[%s5442_s7 + $0x8] sm:$0xff]  }
  0xbf   : > { %3937 = vmatmul.mubr.msk.bf16.vlgmr.msra.gmra.mrb[8].mxu1 %vm578_vm3, %v5314_v60  ;;  %4036 = vmatprep.mubr.msk.bf16.mxu0 %vm578_vm3, %v3626_v61  ;;  %v3678_v61 = vld [vmem:[%s5442_s7] sm:$0xff]   ;;  %v3683_v6 = vunpack.c.l.bf16 %v3709_v48  ;;  %v3684_v27 = vunpack.c.h.bf16 %v3709_v48 }
  0xc0   : > { %3940 = vmatprep.mubr.msk.bf16.mxu1 %vm578_vm3, %v3472_v56  ;;  %v3679_v9 = vunpack.c.l.bf16 %v3678_v61  ;;  %v5454_v56 = vld [vmem:[%s5566_s4] ss:$0 sm:$0xff]  ;;  %v3680_v51 = vunpack.c.h.bf16 %v3678_v61 }
  0xc6   : > { %4037 = vmatmul.mubr.msk.bf16.gmra.mrb[12].mxu0 %vm578_vm3, %v3627_v18  ;;  %v3711_v18 = vld [vmem:[%s5442_s7 + $0x18] sm:$0xff]  }
  0xc7   : > { %3941 = vmatmul.mubr.msk.bf16.gmra.mrb[12].mxu1 %vm578_vm3, %v3473_v44 }
 0x172   : > { %v3906_v60 = vpop.f32.mrb[0].mxu1 }
 0x173   : > { %v1305_v40 = vpop.f32.mrb[1].mxu1 }
 0x174   : > { %v3907_v41 = vpop.f32.mrb[2].mxu1 }
 0x175   : > { %v1308_v38 = vpop.f32.mrb[3].mxu1 }
 0x17a   : > { %v3910_v12 = vpop.f32.mrb[4].mxu1 }
 0x17b   : > { %v1321_v25 = vpop.f32.mrb[5].mxu1 }
 0x17c   : > { %v3911_v63 = vpop.f32.mrb[6].mxu1 }
 0x17d   : > { %v1324_v52 = vpop.f32.mrb[7].mxu1 }
 0x181   : > { %v4026_v1 = vpop.f32.mrb[0].mxu0 }
 0x182   : > { %v4048_v21 = vadd.f32 %v4026_v1, %v3906_v60  ;;  %v2831_v30 = vpop.f32.mrb[1].mxu0 }
 0x183   : > { %v4049_v34 = vadd.f32 %v2831_v30, %v1305_v40  ;;  %v4027_v29 = vpop.f32.mrb[2].mxu0 }
 0x184   : > { %v4050_v50 = vadd.f32 %v4027_v29, %v3907_v41  ;;  %v2834_v37 = vpop.f32.mrb[3].mxu0  ;;  %2962 = vrot.lane.b32.xlu1 %v4048_v21, %s4330_s16  ;;  %v3710_v29 = vld [vmem:[%s5442_s7 + $0x10] sm:$0xff]  }
 0x185   : > { %v4051_v2 = vadd.f32 %v2834_v37, %v1308_v38  ;;  %2958 = vrot.lane.b32.xlu0 %v4049_v34, %s4330_s16  ;;  %v3692_v34 = vunpack.c.h.bf16 %v3711_v18 }
 0x188   : > { %2964 = vrot.lane.b32.xlu1 %v4050_v50, %s4330_s16 }
 0x189   : > { %v4030_v10 = vpop.f32.mrb[4].mxu0  ;;  %2960 = vrot.lane.b32.xlu0 %v4051_v2, %s4330_s16 }
 0x18a   : > { %v4052_v47 = vadd.f32 %v4030_v10, %v3910_v12  ;;  %v2847_v5 = vpop.f32.mrb[5].mxu0 }
 0x18b   : > { %v4053_v62 = vadd.f32 %v2847_v5, %v1321_v25  ;;  %v4031_v53 = vpop.f32.mrb[6].mxu0 }
 0x18c   : > { %v4054_v15 = vadd.f32 %v4031_v53, %v3911_v63  ;;  %v2850_v59 = vpop.f32.mrb[7].mxu0  ;;  %v3687_v53 = vunpack.c.l.bf16 %v3710_v29 }
 0x18d   : > { %v4055_v33 = vadd.f32 %v2850_v59, %v1324_v52  ;;  %2970 = vrot.lane.b32.xlu0 %v4052_v47, %s4330_s16  ;;  %v3691_v52 = vunpack.c.l.bf16 %v3711_v18 }
 0x18e   : > { %2972 = vrot.lane.b32.xlu1 %v4054_v15, %s4330_s16  ;;  %v3688_v15 = vunpack.c.h.bf16 %v3710_v29 }
 0x191   : > { %v4034_v7 = vpop.f32.mrb[8].mxu0  ;;  %2966 = vrot.lane.b32.xlu0 %v4053_v62, %s4330_s16 }
 0x192   : > { %v3938_v20 = vpop.f32.mrb[8].mxu1  ;;  %v2863_v26 = vpop.f32.mrb[9].mxu0  ;;  %2968 = vrot.lane.b32.xlu1 %v4055_v33, %s4330_s16 }
 0x193   : > { %v4056_v55 = vadd.f32 %v4034_v7, %v3938_v20  ;;  %v1723_v4 = vpop.f32.mrb[9].mxu1  ;;  %v4035_v3 = vpop.f32.mrb[10].mxu0 }
 0x194   : > { %v4057_v35 = vadd.f32 %v2863_v26, %v1723_v4  ;;  %v3939_v24 = vpop.f32.mrb[10].mxu1  ;;  %v2866_v14 = vpop.f32.mrb[11].mxu0  ;;  %v3713_v26 = vld [vmem:[%s5442_s7 + $0x28] sm:$0xff]  }
 0x195   : > { %v4058_v11 = vadd.f32 %v4035_v3, %v3939_v24  ;;  %v1726_v39 = vpop.f32.mrb[11].mxu1  ;;  %2978 = vrot.lane.b32.xlu0 %v4056_v55, %s4330_s16 }
 0x196   : > { %v4059_v22 = vadd.f32 %v2866_v14, %v1726_v39  ;;  %v3699_v39 = vunpack.c.l.bf16 %v3713_v26 }
 0x197   : > { %2980 = vrot.lane.b32.xlu1 %v4058_v11, %s4330_s16 }
 0x199   : > { %v4038_v31 = vpop.f32.mrb[12].mxu0  ;;  %2974 = vrot.lane.b32.xlu0 %v4057_v35, %s4330_s16 }
 0x19a   : > { %v3942_v36 = vpop.f32.mrb[12].mxu1  ;;  %v2879_v16 = vpop.f32.mrb[13].mxu0 }
 0x19b   : > { %v4060_v0 = vadd.f32 %v4038_v31, %v3942_v36  ;;  %2976 = vrot.lane.b32.xlu1 %v4059_v22, %s4330_s16  ;;  %v1739_v42 = vpop.f32.mrb[13].mxu1  ;;  %v4039_v17 = vpop.f32.mrb[14].mxu0 }
 0x19c   : > { %v4061_v28 = vadd.f32 %v2879_v16, %v1739_v42  ;;  %v3943_v45 = vpop.f32.mrb[14].mxu1  ;;  %v2882_v13 = vpop.f32.mrb[15].mxu0  ;;  %v3712_v16 = vld [vmem:[%s5442_s7 + $0x20] sm:$0xff]  }
 0x19d   : > { %v4062_v43 = vadd.f32 %v4039_v17, %v3943_v45  ;;  %v1742_v8 = vpop.f32.mrb[15].mxu1  ;;  %v3695_v48 = vunpack.c.l.bf16 %v3712_v16 }
 0x19e   : > { %v4063_v49 = vadd.f32 %v2882_v13, %v1742_v8  ;;  %2982 = vrot.lane.b32.xlu0 %v4061_v28, %s4330_s16  ;;  %v3700_v28 = vunpack.c.h.bf16 %v3713_v26 }
 0x1a0   : > { %2984 = vrot.lane.b32.xlu1 %v4063_v49, %s4330_s16 }
 0x1a2   : > { %2986 = vrot.lane.b32.xlu0 %v4060_v0, %s4330_s16 }
 0x1a4   : > { %2988 = vrot.lane.b32.xlu1 %v4062_v43, %s4330_s16 }
 0x1f6   : > { %v2963_v23 = vpop.permute.xlu1 %2962 }
 0x1f7   : > { %v3009_v32 = vsel %vm3006_vm7, %v3683_v6, %v2963_v23  ;;  %v2959_v57 = vpop.permute.xlu0 %2958  ;;  %v3714_v23 = vld [vmem:[%s5442_s7 + $0x30] sm:$0xff]  }
 0x1f8   : > { %v3032_v58 = vadd.f32 %v5449_v19, %v3009_v32  ;;  %v3007_v54 = vsel %vm3006_vm7, %v3679_v9, %v2959_v57 }
 0x1f9   : > { %v3030_v46 = vadd.f32 %v5449_v19, %v3007_v54 }
 0x1fa   : > { %vm3048_vm8 = vcmp.ge.f32.partialorder %v3032_v58, 0.0  ;;  %v3071_v44 = vmul.f32 %v5454_v56, %v3032_v58  ;;  %v2965_v60 = vpop.permute.xlu1 %2964 }
 0x1fb   : > { %vm3046_vm10 = vcmp.ge.f32.partialorder %v3030_v46, 0.0  ;;  %v3069_v40 = vmul.f32 %v5454_v56, %v3030_v46  ;;  %v3010_v41 = vsel %vm3006_vm7, %v3684_v27, %v2965_v60  ;;  %v2961_v38 = vpop.permute.xlu0 %2960  ;;  %v3703_v60 = vunpack.c.l.bf16 %v3714_v23 }
 0x1fc   : > { %v3087_v12 = vsel %vm3048_vm8, %v3032_v58, %v3071_v44  ;;  %v3033_v25 = vadd.f32 %v5449_v19, %v3010_v41  ;;  %v3008_v63 = vsel %vm3006_vm7, %v3680_v51, %v2961_v38  ;;  %v3696_v58 = vunpack.c.h.bf16 %v3712_v16 }
 0x1fd   : > { %v3663_v1 = vpack.c.bf16 %v3087_v12, %v3087_v12  ;;  %v3085_v21 = vsel %vm3046_vm10, %v3030_v46, %v3069_v40  ;;  %v3031_v30 = vadd.f32 %v5449_v19, %v3008_v63 }
 0x1fe   : > { %v3661_v50 = vpack.c.bf16 %v3085_v21, %v3085_v21  ;;  %vm3049_vm11 = vcmp.ge.f32.partialorder %v3033_v25, 0.0  ;;  %v3072_v37 = vmul.f32 %v5454_v56, %v3033_v25 }
 0x1ff   : > { %3168 = vst.msk [vmem:[%s5467_s12 + $0x8] sm:$0xf] %vm3165_vm9, %v3663_v1  ;;  %vm3047_vm12 = vcmp.ge.f32.partialorder %v3031_v30, 0.0  ;;  %v3070_v2 = vmul.f32 %v5454_v56, %v3031_v30  ;;  %v2971_v10 = vpop.permute.xlu0 %2970  ;;  %v3704_v1 = vunpack.c.h.bf16 %v3714_v23 }
 0x200   : > { %3166 = vst.msk [vmem:[%s5467_s12] sm:$0xf] %vm3165_vm9, %v3661_v50  ;;  %v3088_v47 = vsel %vm3049_vm11, %v3033_v25, %v3072_v37  ;;  %v3013_v5 = vsel %vm3006_vm7, %v3691_v52, %v2971_v10  ;;  %v2973_v62 = vpop.permute.xlu1 %2972  ;;  %v3715_v25 = vld [vmem:[%s5442_s7 + $0x38] sm:$0xff]  }
 0x201   : > { %v3664_v59 = vpack.c.bf16 %v3088_v47, %v3088_v47  ;;  %v3086_v33 = vsel %vm3047_vm12, %v3031_v30, %v3070_v2  ;;  %v3036_v7 = vadd.f32 %v5449_v19, %v3013_v5  ;;  %v3014_v20 = vsel %vm3006_vm7, %v3692_v34, %v2973_v62 }
 0x202   : > { %v3662_v55 = vpack.c.bf16 %v3086_v33, %v3086_v33  ;;  %v3037_v4 = vadd.f32 %v5449_v19, %v3014_v20  ;;  %v3707_v37 = vunpack.c.l.bf16 %v3715_v25  ;;  %v3708_v33 = vunpack.c.h.bf16 %v3715_v25 }
 0x203   : > { %3169 = vst.msk [vmem:[%s5467_s12 + $0xc] sm:$0xf] %vm3165_vm9, %v3664_v59  ;;  %vm3052_vm13 = vcmp.ge.f32.partialorder %v3036_v7, 0.0  ;;  %v3075_v3 = vmul.f32 %v5454_v56, %v3036_v7  ;;  %v2967_v35 = vpop.permute.xlu0 %2966 }
 0x204   : > { %3167 = vst.msk [vmem:[%s5467_s12 + $0x4] sm:$0xf] %vm3165_vm9, %v3662_v55  ;;  %vm3053_vm14 = vcmp.ge.f32.partialorder %v3037_v4, 0.0  ;;  %v3076_v24 = vmul.f32 %v5454_v56, %v3037_v4  ;;  %v3011_v14 = vsel %vm3006_vm7, %v3687_v53, %v2967_v35  ;;  %v2969_v11 = vpop.permute.xlu1 %2968 }
 0x205   : > { %v3091_v22 = vsel %vm3052_vm13, %v3036_v7, %v3075_v3  ;;  %v3034_v31 = vadd.f32 %v5449_v19, %v3011_v14  ;;  %v3012_v36 = vsel %vm3006_vm7, %v3688_v15, %v2969_v11 }
 0x206   : > { %v3667_v0 = vpack.c.bf16 %v3091_v22, %v3091_v22  ;;  %v3092_v42 = vsel %vm3053_vm14, %v3037_v4, %v3076_v24  ;;  %v3035_v17 = vadd.f32 %v5449_v19, %v3012_v36 }
 0x207   : > { %v3668_v45 = vpack.c.bf16 %v3092_v42, %v3092_v42  ;;  %vm3050_vm15 = vcmp.ge.f32.partialorder %v3034_v31, 0.0  ;;  %v3073_v13 = vmul.f32 %v5454_v56, %v3034_v31  ;;  %v2979_v43 = vpop.permute.xlu0 %2978 }
 0x208   : > { %3172 = vst.msk [vmem:[%s5467_s12 + $0x18] sm:$0xf] %vm3165_vm9, %v3667_v0  ;;  %vm3051_vm0 = vcmp.ge.f32.partialorder %v3035_v17, 0.0  ;;  %v3074_v8 = vmul.f32 %v5454_v56, %v3035_v17  ;;  %v3017_v49 = vsel %vm3006_vm7, %v3699_v39, %v2979_v43 }
 0x209   : > { %3173 = vst.msk [vmem:[%s5467_s12 + $0x1c] sm:$0xf] %vm3165_vm9, %v3668_v45  ;;  %v3089_v61 = vsel %vm3050_vm15, %v3034_v31, %v3073_v13  ;;  %v3040_v6 = vadd.f32 %v5449_v19, %v3017_v49  ;;  %v2981_v9 = vpop.permute.xlu1 %2980 }
 0x20a   : > { %v3665_v32 = vpack.c.bf16 %v3089_v61, %v3089_v61  ;;  %v3090_v57 = vsel %vm3051_vm0, %v3035_v17, %v3074_v8  ;;  %v3018_v27 = vsel %vm3006_vm7, %v3700_v28, %v2981_v9 }
 0x20b   : > { %v3666_v54 = vpack.c.bf16 %v3090_v57, %v3090_v57  ;;  %vm3056_vm1 = vcmp.ge.f32.partialorder %v3040_v6, 0.0  ;;  %v3079_v51 = vmul.f32 %v5454_v56, %v3040_v6  ;;  %v3041_v46 = vadd.f32 %v5449_v19, %v3018_v27  ;;  %v2975_v18 = vpop.permute.xlu0 %2974 }
 0x20c   : > { %3170 = vst.msk [vmem:[%s5467_s12 + $0x10] sm:$0xf] %vm3165_vm9, %v3665_v32  ;;  %v3015_v44 = vsel %vm3006_vm7, %v3695_v48, %v2975_v18 }
 0x20d   : > { %3171 = vst.msk [vmem:[%s5467_s12 + $0x14] sm:$0xf] %vm3165_vm9, %v3666_v54  ;;  %v3095_v40 = vsel %vm3056_vm1, %v3040_v6, %v3079_v51  ;;  %vm3057_vm2 = vcmp.ge.f32.partialorder %v3041_v46, 0.0  ;;  %v3080_v41 = vmul.f32 %v5454_v56, %v3041_v46  ;;  %v3038_v38 = vadd.f32 %v5449_v19, %v3015_v44  ;;  %v2977_v12 = vpop.permute.xlu1 %2976 }
 0x20e   : > { %v3671_v63 = vpack.c.bf16 %v3095_v40, %v3095_v40  ;;  %v3016_v52 = vsel %vm3006_vm7, %v3696_v58, %v2977_v12 }
 0x20f   : > { %v3096_v21 = vsel %vm3057_vm2, %v3041_v46, %v3080_v41  ;;  %vm3054_vm3 = vcmp.ge.f32.partialorder %v3038_v38, 0.0  ;;  %v3077_v30 = vmul.f32 %v5454_v56, %v3038_v38  ;;  %v3039_v34 = vadd.f32 %v5449_v19, %v3016_v52 }
 0x210   : > { %3176 = vst.msk [vmem:[%s5467_s12 + $0x28] sm:$0xf] %vm3165_vm9, %v3671_v63  ;;  %v3672_v29 = vpack.c.bf16 %v3096_v21, %v3096_v21  ;;  %v2983_v50 = vpop.permute.xlu0 %2982 }
 0x211   : > { %v3093_v2 = vsel %vm3054_vm3, %v3038_v38, %v3077_v30  ;;  %vm3055_vm4 = vcmp.ge.f32.partialorder %v3039_v34, 0.0  ;;  %v3078_v10 = vmul.f32 %v5454_v56, %v3039_v34  ;;  %v3019_v47 = vsel %vm3006_vm7, %v3703_v60, %v2983_v50 }
 0x212   : > { %3177 = vst.msk [vmem:[%s5467_s12 + $0x2c] sm:$0xf] %vm3165_vm9, %v3672_v29  ;;  %v3669_v5 = vpack.c.bf16 %v3093_v2, %v3093_v2  ;;  %v3042_v62 = vadd.f32 %v5449_v19, %v3019_v47  ;;  %v2985_v53 = vpop.permute.xlu1 %2984 }
 0x213   : > { %v3094_v15 = vsel %vm3055_vm4, %v3039_v34, %v3078_v10  ;;  %v3020_v59 = vsel %vm3006_vm7, %v3704_v1, %v2985_v53 }
 0x214   : > { %3174 = vst.msk [vmem:[%s5467_s12 + $0x20] sm:$0xf] %vm3165_vm9, %v3669_v5  ;;  %v3670_v7 = vpack.c.bf16 %v3094_v15, %v3094_v15  ;;  %vm3058_vm5 = vcmp.ge.f32.partialorder %v3042_v62, 0.0  ;;  %v3081_v20 = vmul.f32 %v5454_v56, %v3042_v62  ;;  %v3043_v26 = vadd.f32 %v5449_v19, %v3020_v59  ;;  %v2987_v55 = vpop.permute.xlu0 %2986 }
 0x215   : > { %v3021_v4 = vsel %vm3006_vm7, %v3707_v37, %v2987_v55 }
 0x216   : > { %3175 = vst.msk [vmem:[%s5467_s12 + $0x24] sm:$0xf] %vm3165_vm9, %v3670_v7  ;;  %v3097_v3 = vsel %vm3058_vm5, %v3042_v62, %v3081_v20  ;;  %vm3059_vm6 = vcmp.ge.f32.partialorder %v3043_v26, 0.0  ;;  %v3082_v35 = vmul.f32 %v5454_v56, %v3043_v26  ;;  %v3044_v24 = vadd.f32 %v5449_v19, %v3021_v4  ;;  %v2989_v14 = vpop.permute.xlu1 %2988 }
 0x217   : > { %v3673_v11 = vpack.c.bf16 %v3097_v3, %v3097_v3  ;;  %v3022_v39 = vsel %vm3006_vm7, %v3708_v33, %v2989_v14 }
 0x218   : > { %v3098_v22 = vsel %vm3059_vm6, %v3043_v26, %v3082_v35  ;;  %vm3060_vm8 = vcmp.ge.f32.partialorder %v3044_v24, 0.0  ;;  %v3083_v31 = vmul.f32 %v5454_v56, %v3044_v24  ;;  %v3045_v36 = vadd.f32 %v5449_v19, %v3022_v39 }
 0x219   : > { %3178 = vst.msk [vmem:[%s5467_s12 + $0x30] sm:$0xf] %vm3165_vm9, %v3673_v11  ;;  %v3674_v16 = vpack.c.bf16 %v3098_v22, %v3098_v22 }
 0x21a   : > { %v3099_v0 = vsel %vm3060_vm8, %v3044_v24, %v3083_v31  ;;  %vm3061_vm10 = vcmp.ge.f32.partialorder %v3045_v36, 0.0  ;;  %v3084_v42 = vmul.f32 %v5454_v56, %v3045_v36 }
 0x21b   : > { %3179 = vst.msk [vmem:[%s5467_s12 + $0x34] sm:$0xf] %vm3165_vm9, %v3674_v16  ;;  %v3675_v17 = vpack.c.bf16 %v3099_v0, %v3099_v0 }
 0x21c   : > { %v3100_v28 = vsel %vm3061_vm10, %v3045_v36, %v3084_v42 }
 0x21d   : > { %3180 = vst.msk [vmem:[%s5467_s12 + $0x38] sm:$0xf] %vm3165_vm9, %v3675_v17  ;;  %v3676_v45 = vpack.c.bf16 %v3100_v28, %v3100_v28 }
 0x21f   : > { %3181 = vst.msk [vmem:[%s5467_s12 + $0x3c] sm:$0xf] %vm3165_vm9, %v3676_v45 }
 0x220 PF: > { %s15_s22 = sadd.s32 1, %s4328_s22   ;;  %s5639_s18 = smov %s4320_s20 }
 0x221   : > { %p12_p7 = scmp.ge.s32.totalorder %s15_s22, 6   ;;  %s5640_s19 = smov %s4324_s21 }
 0x222   : > { %s5641_s20 = smov %s5644_s23  ;;  %s5642_s21 = smov %s5648_s24 }
 0x223   :  { %14 = sbr.rel (!%p12_p7) target bundleno = 3 (0x3), region = 84 }

</bundles_post_ra>
